<compile_context>
chip_gen: v5e
topology: v5e:2x2
jax: 0.10.0
libtpu: 0.0.40
codegen_flags: <defaults>
</compile_context>

<pallas_src>
import math
import numpy as np
import jax
import jax.numpy as jnp
from jax import lax
from jax.experimental import pallas as pl
from jax.experimental.pallas import tpu as pltpu  # noqa: F401  (TPU backend assumed)

FEATURE_SIZE = 7      # d_model
NHEAD = 7             # -> head_dim = 1
NUM_LAYERS = 3
DIM_FF = 2048         # nn.TransformerEncoderLayer default dim_feedforward
LN_EPS = 1e-5


# ----------------------------- Pallas kernel ------------------------------ #
def transformer_kernel(x_ref, win_ref, bin_ref, wout_ref, bout_ref,
                       ln1w_ref, ln1b_ref, w1_ref, b1_ref, w2_ref, b2_ref,
                       ln2w_ref, ln2b_ref, wdec_ref, bdec_ref, out_ref):
    B, S, E = x_ref.shape
    H = NHEAD
    head_dim = E // H                      # == 1
    scale = 1.0 / math.sqrt(head_dim)      # == 1.0 -> multiply elided below

    # Fold batch into the matmul M dimension: (B*S, E). S is a sublane multiple
    # here (S == 8) so this reshape stays cheap.
    x = x_ref[...].reshape(B * S, E)

    # Additive causal mask: 0 on/below the diagonal, -inf strictly above.
    # Built once, reused by every layer (hoisted out of the layer loop).
    row = lax.broadcasted_iota(jnp.int32, (S, S), 0)
    col = lax.broadcasted_iota(jnp.int32, (S, S), 1)
    mask = jnp.where(col <= row, jnp.float32(0.0), jnp.float32(-jnp.inf))

    def layer_norm(v, w, b):
        mu = jnp.mean(v, axis=-1, keepdims=True)
        c = v - mu
        var = jnp.mean(c * c, axis=-1, keepdims=True)
        return c * lax.rsqrt(var + LN_EPS) * w + b

    for l in range(NUM_LAYERS):            # static unroll (3 layers)
        # ---------------- self-attention block (post-norm) ---------------- #
        qkv = jnp.dot(x, win_ref[l], preferred_element_type=jnp.float32) + bin_ref[l]
        q = qkv[:, 0:E]
        if scale != 1.0:                    # head_dim == 1 -> statically skipped
            q = q * scale
        q = q.reshape(B, S, E)
        k = qkv[:, E:2 * E].reshape(B, S, E)
        v = qkv[:, 2 * E:3 * E].reshape(B, S, E)

        # head_dim == 1 -> per-head scores are outer products over the sequence.
        # One broadcast computation for all heads: (B, Sq, Sk, H)
        #   Sk on sublanes, H on lanes  -> B*Sq vregs total.
        s = q[:, :, None, :] * k[:, None, :, :] + mask[None, :, :, None]
        s = s - jnp.max(s, axis=2, keepdims=True)         # sublane reduce (XLU)
        p = jnp.exp(s)                                     # EUP
        p = p * pl.reciprocal(jnp.sum(p, axis=2, keepdims=True), approx=True)
        attn = jnp.sum(p * v[:, None, :, :], axis=2).reshape(B * S, E)   # (B*S, E)

        attn = jnp.dot(attn, wout_ref[l], preferred_element_type=jnp.float32) + bout_ref[l]
        x = layer_norm(x + attn, ln1w_ref[l], ln1b_ref[l])

        # ----------------------- feed-forward block ----------------------- #
        # bf16 matmul inputs, f32 accumulation; both weights kept lane-dense (E, F).
        h1 = jnp.dot(x.astype(jnp.bfloat16), w1_ref[l],
                     preferred_element_type=jnp.float32) + b1_ref[l]
        h1 = jnp.maximum(h1, 0.0)                                          # ReLU
        h2 = lax.dot_general(h1.astype(jnp.bfloat16), w2_ref[l],
                             dimension_numbers=(((1,), (1,)), ((), ())),
                             preferred_element_type=jnp.float32) + b2_ref[l]
        x = layer_norm(x + h2, ln2w_ref[l], ln2b_ref[l])

    # -------------------------- decoder (E -> 1) -------------------------- #
    # Elementwise mult + lane reduce lands directly in the (B, S) output layout
    # (no (B*S, 1) -> (B, S) relayout needed).
    xr = x.reshape(B, S, E)
    dec = jnp.sum(xr * wdec_ref[...][None], axis=-1)                       # (B, S)
    out_ref[...] = dec + bdec_ref[...]                                     # (1,1) broadcast


# ------------------------------ host wrapper ------------------------------ #
@jax.jit
def transformer_forward(src, params):
    """src: (S, B, E) float32 (PyTorch seq-first layout). Returns (S, B, 1)."""
    S, B, E = src.shape
    x = jnp.transpose(src, (1, 0, 2))      # (B, S, E) for the kernel

    weight_args = (params['win_t'], params['b_in'], params['wout_t'], params['b_out'],
                   params['ln1_w'], params['ln1_b'], params['w1_t'], params['b1'],
                   params['w2'], params['b2'], params['ln2_w'], params['ln2_b'],
                   params['wdec'], params['bdec'])

    # Single grid-less call: all operands live whole in VMEM (< 0.5 MiB total).
    out = pl.pallas_call(
        transformer_kernel,
        out_shape=jax.ShapeDtypeStruct((B, S), jnp.float32),
    )(x, *weight_args)

    return jnp.transpose(out, (1, 0))[:, :, None]   # back to (S, B, 1)


# --------------------------- parameter creation ---------------------------- #
def init_params(key):
    E, L, F = FEATURE_SIZE, NUM_LAYERS, DIM_FF
    ks = jax.random.split(key, 8)

    def u(k, shape, bound):
        return jax.random.uniform(k, shape, jnp.float32, -bound, bound)

    win = u(ks[0], (L, 3 * E, E), math.sqrt(6.0 / (4 * E)))   # xavier-uniform-ish
    b_in = jnp.zeros((L, 1, 3 * E), jnp.float32)              # PyTorch: in_proj_bias = 0
    wout = u(ks[1], (L, E, E), 1.0 / math.sqrt(E))
    b_out = jnp.zeros((L, 1, E), jnp.float32)                 # PyTorch: out_proj.bias = 0
    ln1_w = jnp.ones((L, 1, E), jnp.float32)
    ln1_b = jnp.zeros((L, 1, E), jnp.float32)
    w1 = u(ks[2], (L, F, E), 1.0 / math.sqrt(E))              # PyTorch linear1.weight (F, E)
    b1 = u(ks[3], (L, 1, F), 1.0 / math.sqrt(E))
    w2 = u(ks[4], (L, E, F), 1.0 / math.sqrt(F))              # PyTorch linear2.weight (E, F), kept lane-dense
    b2 = u(ks[5], (L, 1, E), 1.0 / math.sqrt(F))
    ln2_w = jnp.ones((L, 1, E), jnp.float32)
    ln2_b = jnp.zeros((L, 1, E), jnp.float32)
    wdec = u(ks[6], (1, E), 0.1)                              # decoder: uniform(-0.1, 0.1)
    bdec = jnp.zeros((1, 1), jnp.float32)                     # decoder bias zeroed

    return dict(
        win_t=jnp.transpose(win, (0, 2, 1)), b_in=b_in,
        wout_t=jnp.transpose(wout, (0, 2, 1)), b_out=b_out,
        ln1_w=ln1_w, ln1_b=ln1_b,
        w1_t=jnp.transpose(w1, (0, 2, 1)).astype(jnp.bfloat16), b1=b1,   # (L, E, F) bf16
        w2=w2.astype(jnp.bfloat16), b2=b2,                               # (L, E, F) bf16
        ln2_w=ln2_w, ln2_b=ln2_b,
        wdec=wdec, bdec=bdec)


# --------------------------- plain-JAX reference --------------------------- #
def reference_forward(src, params):
    S, B, E = src.shape
    x = src.astype(jnp.float32)
    causal = np.tril(np.ones((S, S), dtype=bool))
    mask = jnp.where(jnp.asarray(causal), 0.0, -jnp.inf).astype(jnp.float32)

    def ln(v, w, b):
        mu = jnp.mean(v, -1, keepdims=True)
        var = jnp.mean((v - mu) ** 2, -1, keepdims=True)
        return (v - mu) / jnp.sqrt(var + LN_EPS) * w + b

    for l in range(NUM_LAYERS):
        qkv = jnp.einsum('sbe,ef->sbf', x, params['win_t'][l]) + params['b_in'][l][0]
        q, k, v = qkv[..., :E], qkv[..., E:2 * E], qkv[..., 2 * E:]
        scores = jnp.einsum('sbh,tbh->bhst', q, k) + mask[None, None]   # head_dim == 1
        w_attn = jax.nn.softmax(scores, axis=-1)
        attn = jnp.einsum('bhst,tbh->sbh', w_attn, v)
        attn = jnp.einsum('sbe,ef->sbf', attn, params['wout_t'][l]) + params['b_out'][l][0]
        x = ln(x + attn, params['ln1_w'][l][0], params['ln1_b'][l][0])
        h1 = jax.nn.relu(jnp.einsum('sbe,ef->sbf', x, params['w1_t'][l].astype(jnp.float32))
                         + params['b1'][l][0])
        h2 = jnp.einsum('sbf,ef->sbe', h1, params['w2'][l].astype(jnp.float32)) + params['b2'][l][0]
        x = ln(x + h2, params['ln2_w'][l][0], params['ln2_b'][l][0])
    return jnp.einsum('sbe,oe->sbo', x, params['wdec']) + params['bdec'][0]


if __name__ == "__main__":
    key = jax.random.PRNGKey(0)
    k_src, k_par = jax.random.split(key)
    S, B, E = 8, 2, FEATURE_SIZE
    src = jax.random.normal(k_src, (S, B, E), jnp.float32)   # PyTorch (seq, batch, feature)
    params = init_params(k_par)

    out = jax.block_until_ready(transformer_forward(src, params))
    ref = jax.block_until_ready(reference_forward(src, params))

    assert out.shape == (S, B, 1)
    if not np.allclose(np.asarray(out), np.asarray(ref), atol=2e-2, rtol=2e-2):
        diff = float(np.max(np.abs(np.asarray(out) - np.asarray(ref))))
        raise SystemExit(f"mismatch vs reference, max abs diff = {diff}")
    print("KERNEL_OK")
</pallas_src>

<mosaic_0001>
module attributes {stable_mosaic.version = 11 : i64} {
  func.func @transformer_kernel(%arg0: memref<2x8x7xf32, #tpu.memory_space<vmem>>, %arg1: memref<3x7x21xf32, #tpu.memory_space<vmem>>, %arg2: memref<3x1x21xf32, #tpu.memory_space<vmem>>, %arg3: memref<3x7x7xf32, #tpu.memory_space<vmem>>, %arg4: memref<3x1x7xf32, #tpu.memory_space<vmem>>, %arg5: memref<3x1x7xf32, #tpu.memory_space<vmem>>, %arg6: memref<3x1x7xf32, #tpu.memory_space<vmem>>, %arg7: memref<3x7x2048xbf16, #tpu.memory_space<vmem>>, %arg8: memref<3x1x2048xf32, #tpu.memory_space<vmem>>, %arg9: memref<3x7x2048xbf16, #tpu.memory_space<vmem>>, %arg10: memref<3x1x7xf32, #tpu.memory_space<vmem>>, %arg11: memref<3x1x7xf32, #tpu.memory_space<vmem>>, %arg12: memref<3x1x7xf32, #tpu.memory_space<vmem>>, %arg13: memref<1x7xf32, #tpu.memory_space<vmem>>, %arg14: memref<1x1xf32, #tpu.memory_space<vmem>>, %arg15: memref<2x8xf32, #tpu.memory_space<vmem>>) attributes {dimension_semantics = [], scalar_prefetch = 0 : i64, scratch_operands = 0 : i64, tpu.core_type = #tpu.core_type<tc>} {
    %c0 = arith.constant 0 : index
    %c0_0 = arith.constant 0 : index
    %c0_1 = arith.constant 0 : index
    %0 = vector.load %arg0[%c0, %c0_0, %c0_1] : memref<2x8x7xf32, #tpu.memory_space<vmem>>, vector<2x8x7xf32>
    %1 = vector.shape_cast %0 : vector<2x8x7xf32> to vector<16x7xf32>
    %2 = tpu.iota {dimensions = array<i32: 0>} : vector<8x8xi32>
    %3 = tpu.iota {dimensions = array<i32: 1>} : vector<8x8xi32>
    %4 = arith.cmpi sle, %3, %2 : vector<8x8xi32>
    %cst = arith.constant 0.000000e+00 : f32
    %cst_2 = arith.constant 0xFF800000 : f32
    %5 = vector.broadcast %cst : f32 to vector<8x8xf32>
    %6 = vector.broadcast %cst_2 : f32 to vector<8x8xf32>
    %7 = arith.select %4, %5, %6 : vector<8x8xi1>, vector<8x8xf32>
    %c0_3 = arith.constant 0 : index
    %c0_4 = arith.constant 0 : index
    %c0_5 = arith.constant 0 : index
    %8 = vector.load %arg1[%c0_3, %c0_4, %c0_5] : memref<3x7x21xf32, #tpu.memory_space<vmem>>, vector<1x7x21xf32>
    %9 = vector.shape_cast %8 : vector<1x7x21xf32> to vector<7x21xf32>
    %cst_6 = arith.constant dense<0.000000e+00> : vector<16x21xf32>
    %10 = tpu.matmul %1, %9, %cst_6 {dimension_numbers = #tpu.dot_dimension_numbers<[1], [0], [0], [1], [0, 0, 1, 1], [], []>} : vector<16x7xf32>, vector<7x21xf32>, vector<16x21xf32> -> vector<16x21xf32>
    %c0_7 = arith.constant 0 : index
    %c0_8 = arith.constant 0 : index
    %c0_9 = arith.constant 0 : index
    %11 = vector.load %arg2[%c0_7, %c0_8, %c0_9] : memref<3x1x21xf32, #tpu.memory_space<vmem>>, vector<1x1x21xf32>
    %12 = vector.shape_cast %11 : vector<1x1x21xf32> to vector<1x21xf32>
    %13 = vector.broadcast %12 : vector<1x21xf32> to vector<16x21xf32>
    %14 = arith.addf %10, %13 : vector<16x21xf32>
    %15 = vector.extract_strided_slice %14 {offsets = [0, 0], sizes = [16, 7], strides = [1, 1]} : vector<16x21xf32> to vector<16x7xf32>
    %16 = vector.shape_cast %15 : vector<16x7xf32> to vector<2x8x7xf32>
    %17 = vector.extract_strided_slice %14 {offsets = [0, 7], sizes = [16, 7], strides = [1, 1]} : vector<16x21xf32> to vector<16x7xf32>
    %18 = vector.shape_cast %17 : vector<16x7xf32> to vector<2x8x7xf32>
    %19 = vector.extract_strided_slice %14 {offsets = [0, 14], sizes = [16, 7], strides = [1, 1]} : vector<16x21xf32> to vector<16x7xf32>
    %20 = vector.shape_cast %19 : vector<16x7xf32> to vector<2x8x7xf32>
    %21 = vector.shape_cast %16 : vector<2x8x7xf32> to vector<2x8x1x7xf32>
    %22 = vector.shape_cast %18 : vector<2x8x7xf32> to vector<2x1x8x7xf32>
    %23 = vector.broadcast %21 : vector<2x8x1x7xf32> to vector<2x8x8x7xf32>
    %24 = vector.broadcast %22 : vector<2x1x8x7xf32> to vector<2x8x8x7xf32>
    %25 = arith.mulf %23, %24 : vector<2x8x8x7xf32>
    %26 = vector.shape_cast %7 : vector<8x8xf32> to vector<1x8x8x1xf32>
    %27 = vector.broadcast %26 : vector<1x8x8x1xf32> to vector<2x8x8x7xf32>
    %28 = arith.addf %25, %27 : vector<2x8x8x7xf32>
    %cst_10 = arith.constant dense<0xFF800000> : vector<2x8x7xf32>
    %29 = vector.multi_reduction <maximumf>, %28, %cst_10 [2] : vector<2x8x8x7xf32> to vector<2x8x7xf32>
    %30 = vector.shape_cast %29 : vector<2x8x7xf32> to vector<2x8x1x7xf32>
    %31 = vector.broadcast %30 : vector<2x8x1x7xf32> to vector<2x8x8x7xf32>
    %32 = arith.subf %28, %31 : vector<2x8x8x7xf32>
    %33 = math.exp %32 : vector<2x8x8x7xf32>
    %cst_11 = arith.constant dense<0.000000e+00> : vector<2x8x7xf32>
    %34 = vector.multi_reduction <add>, %33, %cst_11 [2] : vector<2x8x8x7xf32> to vector<2x8x7xf32>
    %35 = vector.shape_cast %34 : vector<2x8x7xf32> to vector<2x8x1x7xf32>
    %36 = tpu.reciprocal %35 {approx = true} : vector<2x8x1x7xf32> -> vector<2x8x1x7xf32>
    %37 = vector.broadcast %36 : vector<2x8x1x7xf32> to vector<2x8x8x7xf32>
    %38 = arith.mulf %33, %37 : vector<2x8x8x7xf32>
    %39 = vector.shape_cast %20 : vector<2x8x7xf32> to vector<2x1x8x7xf32>
    %40 = vector.broadcast %39 : vector<2x1x8x7xf32> to vector<2x8x8x7xf32>
    %41 = arith.mulf %38, %40 : vector<2x8x8x7xf32>
    %cst_12 = arith.constant dense<0.000000e+00> : vector<2x8x7xf32>
    %42 = vector.multi_reduction <add>, %41, %cst_12 [2] : vector<2x8x8x7xf32> to vector<2x8x7xf32>
    %43 = vector.shape_cast %42 : vector<2x8x7xf32> to vector<16x7xf32>
    %c0_13 = arith.constant 0 : index
    %c0_14 = arith.constant 0 : index
    %c0_15 = arith.constant 0 : index
    %44 = vector.load %arg3[%c0_13, %c0_14, %c0_15] : memref<3x7x7xf32, #tpu.memory_space<vmem>>, vector<1x7x7xf32>
    %45 = vector.shape_cast %44 : vector<1x7x7xf32> to vector<7x7xf32>
    %cst_16 = arith.constant dense<0.000000e+00> : vector<16x7xf32>
    %46 = tpu.matmul %43, %45, %cst_16 {dimension_numbers = #tpu.dot_dimension_numbers<[1], [0], [0], [1], [0, 0, 1, 1], [], []>} : vector<16x7xf32>, vector<7x7xf32>, vector<16x7xf32> -> vector<16x7xf32>
    %c0_17 = arith.constant 0 : index
    %c0_18 = arith.constant 0 : index
    %c0_19 = arith.constant 0 : index
    %47 = vector.load %arg4[%c0_17, %c0_18, %c0_19] : memref<3x1x7xf32, #tpu.memory_space<vmem>>, vector<1x1x7xf32>
    %48 = vector.shape_cast %47 : vector<1x1x7xf32> to vector<1x7xf32>
    %49 = vector.broadcast %48 : vector<1x7xf32> to vector<16x7xf32>
    %50 = arith.addf %46, %49 : vector<16x7xf32>
    %51 = arith.addf %1, %50 : vector<16x7xf32>
    %c0_20 = arith.constant 0 : index
    %c0_21 = arith.constant 0 : index
    %c0_22 = arith.constant 0 : index
    %52 = vector.load %arg5[%c0_20, %c0_21, %c0_22] : memref<3x1x7xf32, #tpu.memory_space<vmem>>, vector<1x1x7xf32>
    %53 = vector.shape_cast %52 : vector<1x1x7xf32> to vector<1x7xf32>
    %c0_23 = arith.constant 0 : index
    %c0_24 = arith.constant 0 : index
    %c0_25 = arith.constant 0 : index
    %54 = vector.load %arg6[%c0_23, %c0_24, %c0_25] : memref<3x1x7xf32, #tpu.memory_space<vmem>>, vector<1x1x7xf32>
    %55 = vector.shape_cast %54 : vector<1x1x7xf32> to vector<1x7xf32>
    %cst_26 = arith.constant dense<0.000000e+00> : vector<16xf32>
    %56 = vector.multi_reduction <add>, %51, %cst_26 [1] : vector<16x7xf32> to vector<16xf32>
    %57 = vector.shape_cast %56 : vector<16xf32> to vector<16x1xf32>
    %cst_27 = arith.constant 7.000000e+00 : f32
    %58 = vector.broadcast %cst_27 : f32 to vector<16x1xf32>
    %59 = arith.divf %57, %58 : vector<16x1xf32>
    %60 = vector.broadcast %59 : vector<16x1xf32> to vector<16x7xf32>
    %61 = arith.subf %51, %60 : vector<16x7xf32>
    %62 = arith.mulf %61, %61 : vector<16x7xf32>
    %cst_28 = arith.constant dense<0.000000e+00> : vector<16xf32>
    %63 = vector.multi_reduction <add>, %62, %cst_28 [1] : vector<16x7xf32> to vector<16xf32>
    %64 = vector.shape_cast %63 : vector<16xf32> to vector<16x1xf32>
    %cst_29 = arith.constant 7.000000e+00 : f32
    %65 = vector.broadcast %cst_29 : f32 to vector<16x1xf32>
    %66 = arith.divf %64, %65 : vector<16x1xf32>
    %cst_30 = arith.constant 9.99999974E-6 : f32
    %67 = vector.broadcast %cst_30 : f32 to vector<16x1xf32>
    %68 = arith.addf %66, %67 : vector<16x1xf32>
    %69 = math.rsqrt %68 : vector<16x1xf32>
    %70 = vector.broadcast %69 : vector<16x1xf32> to vector<16x7xf32>
    %71 = arith.mulf %61, %70 : vector<16x7xf32>
    %72 = vector.broadcast %53 : vector<1x7xf32> to vector<16x7xf32>
    %73 = arith.mulf %71, %72 : vector<16x7xf32>
    %74 = vector.broadcast %55 : vector<1x7xf32> to vector<16x7xf32>
    %75 = arith.addf %73, %74 : vector<16x7xf32>
    %76 = arith.truncf %75 : vector<16x7xf32> to vector<16x7xbf16>
    %c0_31 = arith.constant 0 : index
    %c0_32 = arith.constant 0 : index
    %c0_33 = arith.constant 0 : index
    %77 = vector.load %arg7[%c0_31, %c0_32, %c0_33] : memref<3x7x2048xbf16, #tpu.memory_space<vmem>>, vector<1x7x2048xbf16>
    %78 = vector.shape_cast %77 : vector<1x7x2048xbf16> to vector<7x2048xbf16>
    %cst_34 = arith.constant dense<0.000000e+00> : vector<16x2048xf32>
    %79 = tpu.matmul %76, %78, %cst_34 {dimension_numbers = #tpu.dot_dimension_numbers<[1], [0], [0], [1], [0, 0, 1, 1], [], []>} : vector<16x7xbf16>, vector<7x2048xbf16>, vector<16x2048xf32> -> vector<16x2048xf32>
    %c0_35 = arith.constant 0 : index
    %c0_36 = arith.constant 0 : index
    %c0_37 = arith.constant 0 : index
    %80 = vector.load %arg8[%c0_35, %c0_36, %c0_37] : memref<3x1x2048xf32, #tpu.memory_space<vmem>>, vector<1x1x2048xf32>
    %81 = vector.shape_cast %80 : vector<1x1x2048xf32> to vector<1x2048xf32>
    %82 = vector.broadcast %81 : vector<1x2048xf32> to vector<16x2048xf32>
    %83 = arith.addf %79, %82 : vector<16x2048xf32>
    %cst_38 = arith.constant 0.000000e+00 : f32
    %84 = vector.broadcast %cst_38 : f32 to vector<16x2048xf32>
    %85 = arith.maximumf %83, %84 : vector<16x2048xf32>
    %86 = arith.truncf %85 : vector<16x2048xf32> to vector<16x2048xbf16>
    %c0_39 = arith.constant 0 : index
    %c0_40 = arith.constant 0 : index
    %c0_41 = arith.constant 0 : index
    %87 = vector.load %arg9[%c0_39, %c0_40, %c0_41] : memref<3x7x2048xbf16, #tpu.memory_space<vmem>>, vector<1x7x2048xbf16>
    %88 = vector.shape_cast %87 : vector<1x7x2048xbf16> to vector<7x2048xbf16>
    %cst_42 = arith.constant dense<0.000000e+00> : vector<16x7xf32>
    %89 = tpu.matmul %86, %88, %cst_42 {dimension_numbers = #tpu.dot_dimension_numbers<[1], [1], [0], [0], [0, 0, 1, 0], [], []>} : vector<16x2048xbf16>, vector<7x2048xbf16>, vector<16x7xf32> -> vector<16x7xf32>
    %c0_43 = arith.constant 0 : index
    %c0_44 = arith.constant 0 : index
    %c0_45 = arith.constant 0 : index
    %90 = vector.load %arg10[%c0_43, %c0_44, %c0_45] : memref<3x1x7xf32, #tpu.memory_space<vmem>>, vector<1x1x7xf32>
    %91 = vector.shape_cast %90 : vector<1x1x7xf32> to vector<1x7xf32>
    %92 = vector.broadcast %91 : vector<1x7xf32> to vector<16x7xf32>
    %93 = arith.addf %89, %92 : vector<16x7xf32>
    %94 = arith.addf %75, %93 : vector<16x7xf32>
    %c0_46 = arith.constant 0 : index
    %c0_47 = arith.constant 0 : index
    %c0_48 = arith.constant 0 : index
    %95 = vector.load %arg11[%c0_46, %c0_47, %c0_48] : memref<3x1x7xf32, #tpu.memory_space<vmem>>, vector<1x1x7xf32>
    %96 = vector.shape_cast %95 : vector<1x1x7xf32> to vector<1x7xf32>
    %c0_49 = arith.constant 0 : index
    %c0_50 = arith.constant 0 : index
    %c0_51 = arith.constant 0 : index
    %97 = vector.load %arg12[%c0_49, %c0_50, %c0_51] : memref<3x1x7xf32, #tpu.memory_space<vmem>>, vector<1x1x7xf32>
    %98 = vector.shape_cast %97 : vector<1x1x7xf32> to vector<1x7xf32>
    %cst_52 = arith.constant dense<0.000000e+00> : vector<16xf32>
    %99 = vector.multi_reduction <add>, %94, %cst_52 [1] : vector<16x7xf32> to vector<16xf32>
    %100 = vector.shape_cast %99 : vector<16xf32> to vector<16x1xf32>
    %cst_53 = arith.constant 7.000000e+00 : f32
    %101 = vector.broadcast %cst_53 : f32 to vector<16x1xf32>
    %102 = arith.divf %100, %101 : vector<16x1xf32>
    %103 = vector.broadcast %102 : vector<16x1xf32> to vector<16x7xf32>
    %104 = arith.subf %94, %103 : vector<16x7xf32>
    %105 = arith.mulf %104, %104 : vector<16x7xf32>
    %cst_54 = arith.constant dense<0.000000e+00> : vector<16xf32>
    %106 = vector.multi_reduction <add>, %105, %cst_54 [1] : vector<16x7xf32> to vector<16xf32>
    %107 = vector.shape_cast %106 : vector<16xf32> to vector<16x1xf32>
    %cst_55 = arith.constant 7.000000e+00 : f32
    %108 = vector.broadcast %cst_55 : f32 to vector<16x1xf32>
    %109 = arith.divf %107, %108 : vector<16x1xf32>
    %cst_56 = arith.constant 9.99999974E-6 : f32
    %110 = vector.broadcast %cst_56 : f32 to vector<16x1xf32>
    %111 = arith.addf %109, %110 : vector<16x1xf32>
    %112 = math.rsqrt %111 : vector<16x1xf32>
    %113 = vector.broadcast %112 : vector<16x1xf32> to vector<16x7xf32>
    %114 = arith.mulf %104, %113 : vector<16x7xf32>
    %115 = vector.broadcast %96 : vector<1x7xf32> to vector<16x7xf32>
    %116 = arith.mulf %114, %115 : vector<16x7xf32>
    %117 = vector.broadcast %98 : vector<1x7xf32> to vector<16x7xf32>
    %118 = arith.addf %116, %117 : vector<16x7xf32>
    %c1 = arith.constant 1 : index
    %c0_57 = arith.constant 0 : index
    %c0_58 = arith.constant 0 : index
    %119 = vector.load %arg1[%c1, %c0_57, %c0_58] : memref<3x7x21xf32, #tpu.memory_space<vmem>>, vector<1x7x21xf32>
    %120 = vector.shape_cast %119 : vector<1x7x21xf32> to vector<7x21xf32>
    %cst_59 = arith.constant dense<0.000000e+00> : vector<16x21xf32>
    %121 = tpu.matmul %118, %120, %cst_59 {dimension_numbers = #tpu.dot_dimension_numbers<[1], [0], [0], [1], [0, 0, 1, 1], [], []>} : vector<16x7xf32>, vector<7x21xf32>, vector<16x21xf32> -> vector<16x21xf32>
    %c1_60 = arith.constant 1 : index
    %c0_61 = arith.constant 0 : index
    %c0_62 = arith.constant 0 : index
    %122 = vector.load %arg2[%c1_60, %c0_61, %c0_62] : memref<3x1x21xf32, #tpu.memory_space<vmem>>, vector<1x1x21xf32>
    %123 = vector.shape_cast %122 : vector<1x1x21xf32> to vector<1x21xf32>
    %124 = vector.broadcast %123 : vector<1x21xf32> to vector<16x21xf32>
    %125 = arith.addf %121, %124 : vector<16x21xf32>
    %126 = vector.extract_strided_slice %125 {offsets = [0, 0], sizes = [16, 7], strides = [1, 1]} : vector<16x21xf32> to vector<16x7xf32>
    %127 = vector.shape_cast %126 : vector<16x7xf32> to vector<2x8x7xf32>
    %128 = vector.extract_strided_slice %125 {offsets = [0, 7], sizes = [16, 7], strides = [1, 1]} : vector<16x21xf32> to vector<16x7xf32>
    %129 = vector.shape_cast %128 : vector<16x7xf32> to vector<2x8x7xf32>
    %130 = vector.extract_strided_slice %125 {offsets = [0, 14], sizes = [16, 7], strides = [1, 1]} : vector<16x21xf32> to vector<16x7xf32>
    %131 = vector.shape_cast %130 : vector<16x7xf32> to vector<2x8x7xf32>
    %132 = vector.shape_cast %127 : vector<2x8x7xf32> to vector<2x8x1x7xf32>
    %133 = vector.shape_cast %129 : vector<2x8x7xf32> to vector<2x1x8x7xf32>
    %134 = vector.broadcast %132 : vector<2x8x1x7xf32> to vector<2x8x8x7xf32>
    %135 = vector.broadcast %133 : vector<2x1x8x7xf32> to vector<2x8x8x7xf32>
    %136 = arith.mulf %134, %135 : vector<2x8x8x7xf32>
    %137 = vector.shape_cast %7 : vector<8x8xf32> to vector<1x8x8x1xf32>
    %138 = vector.broadcast %137 : vector<1x8x8x1xf32> to vector<2x8x8x7xf32>
    %139 = arith.addf %136, %138 : vector<2x8x8x7xf32>
    %cst_63 = arith.constant dense<0xFF800000> : vector<2x8x7xf32>
    %140 = vector.multi_reduction <maximumf>, %139, %cst_63 [2] : vector<2x8x8x7xf32> to vector<2x8x7xf32>
    %141 = vector.shape_cast %140 : vector<2x8x7xf32> to vector<2x8x1x7xf32>
    %142 = vector.broadcast %141 : vector<2x8x1x7xf32> to vector<2x8x8x7xf32>
    %143 = arith.subf %139, %142 : vector<2x8x8x7xf32>
    %144 = math.exp %143 : vector<2x8x8x7xf32>
    %cst_64 = arith.constant dense<0.000000e+00> : vector<2x8x7xf32>
    %145 = vector.multi_reduction <add>, %144, %cst_64 [2] : vector<2x8x8x7xf32> to vector<2x8x7xf32>
    %146 = vector.shape_cast %145 : vector<2x8x7xf32> to vector<2x8x1x7xf32>
    %147 = tpu.reciprocal %146 {approx = true} : vector<2x8x1x7xf32> -> vector<2x8x1x7xf32>
    %148 = vector.broadcast %147 : vector<2x8x1x7xf32> to vector<2x8x8x7xf32>
    %149 = arith.mulf %144, %148 : vector<2x8x8x7xf32>
    %150 = vector.shape_cast %131 : vector<2x8x7xf32> to vector<2x1x8x7xf32>
    %151 = vector.broadcast %150 : vector<2x1x8x7xf32> to vector<2x8x8x7xf32>
    %152 = arith.mulf %149, %151 : vector<2x8x8x7xf32>
    %cst_65 = arith.constant dense<0.000000e+00> : vector<2x8x7xf32>
    %153 = vector.multi_reduction <add>, %152, %cst_65 [2] : vector<2x8x8x7xf32> to vector<2x8x7xf32>
    %154 = vector.shape_cast %153 : vector<2x8x7xf32> to vector<16x7xf32>
    %c1_66 = arith.constant 1 : index
    %c0_67 = arith.constant 0 : index
    %c0_68 = arith.constant 0 : index
    %155 = vector.load %arg3[%c1_66, %c0_67, %c0_68] : memref<3x7x7xf32, #tpu.memory_space<vmem>>, vector<1x7x7xf32>
    %156 = vector.shape_cast %155 : vector<1x7x7xf32> to vector<7x7xf32>
    %cst_69 = arith.constant dense<0.000000e+00> : vector<16x7xf32>
    %157 = tpu.matmul %154, %156, %cst_69 {dimension_numbers = #tpu.dot_dimension_numbers<[1], [0], [0], [1], [0, 0, 1, 1], [], []>} : vector<16x7xf32>, vector<7x7xf32>, vector<16x7xf32> -> vector<16x7xf32>
    %c1_70 = arith.constant 1 : index
    %c0_71 = arith.constant 0 : index
    %c0_72 = arith.constant 0 : index
    %158 = vector.load %arg4[%c1_70, %c0_71, %c0_72] : memref<3x1x7xf32, #tpu.memory_space<vmem>>, vector<1x1x7xf32>
    %159 = vector.shape_cast %158 : vector<1x1x7xf32> to vector<1x7xf32>
    %160 = vector.broadcast %159 : vector<1x7xf32> to vector<16x7xf32>
    %161 = arith.addf %157, %160 : vector<16x7xf32>
    %162 = arith.addf %118, %161 : vector<16x7xf32>
    %c1_73 = arith.constant 1 : index
    %c0_74 = arith.constant 0 : index
    %c0_75 = arith.constant 0 : index
    %163 = vector.load %arg5[%c1_73, %c0_74, %c0_75] : memref<3x1x7xf32, #tpu.memory_space<vmem>>, vector<1x1x7xf32>
    %164 = vector.shape_cast %163 : vector<1x1x7xf32> to vector<1x7xf32>
    %c1_76 = arith.constant 1 : index
    %c0_77 = arith.constant 0 : index
    %c0_78 = arith.constant 0 : index
    %165 = vector.load %arg6[%c1_76, %c0_77, %c0_78] : memref<3x1x7xf32, #tpu.memory_space<vmem>>, vector<1x1x7xf32>
    %166 = vector.shape_cast %165 : vector<1x1x7xf32> to vector<1x7xf32>
    %cst_79 = arith.constant dense<0.000000e+00> : vector<16xf32>
    %167 = vector.multi_reduction <add>, %162, %cst_79 [1] : vector<16x7xf32> to vector<16xf32>
    %168 = vector.shape_cast %167 : vector<16xf32> to vector<16x1xf32>
    %cst_80 = arith.constant 7.000000e+00 : f32
    %169 = vector.broadcast %cst_80 : f32 to vector<16x1xf32>
    %170 = arith.divf %168, %169 : vector<16x1xf32>
    %171 = vector.broadcast %170 : vector<16x1xf32> to vector<16x7xf32>
    %172 = arith.subf %162, %171 : vector<16x7xf32>
    %173 = arith.mulf %172, %172 : vector<16x7xf32>
    %cst_81 = arith.constant dense<0.000000e+00> : vector<16xf32>
    %174 = vector.multi_reduction <add>, %173, %cst_81 [1] : vector<16x7xf32> to vector<16xf32>
    %175 = vector.shape_cast %174 : vector<16xf32> to vector<16x1xf32>
    %cst_82 = arith.constant 7.000000e+00 : f32
    %176 = vector.broadcast %cst_82 : f32 to vector<16x1xf32>
    %177 = arith.divf %175, %176 : vector<16x1xf32>
    %cst_83 = arith.constant 9.99999974E-6 : f32
    %178 = vector.broadcast %cst_83 : f32 to vector<16x1xf32>
    %179 = arith.addf %177, %178 : vector<16x1xf32>
    %180 = math.rsqrt %179 : vector<16x1xf32>
    %181 = vector.broadcast %180 : vector<16x1xf32> to vector<16x7xf32>
    %182 = arith.mulf %172, %181 : vector<16x7xf32>
    %183 = vector.broadcast %164 : vector<1x7xf32> to vector<16x7xf32>
    %184 = arith.mulf %182, %183 : vector<16x7xf32>
    %185 = vector.broadcast %166 : vector<1x7xf32> to vector<16x7xf32>
    %186 = arith.addf %184, %185 : vector<16x7xf32>
    %187 = arith.truncf %186 : vector<16x7xf32> to vector<16x7xbf16>
    %c1_84 = arith.constant 1 : index
    %c0_85 = arith.constant 0 : index
    %c0_86 = arith.constant 0 : index
    %188 = vector.load %arg7[%c1_84, %c0_85, %c0_86] : memref<3x7x2048xbf16, #tpu.memory_space<vmem>>, vector<1x7x2048xbf16>
    %189 = vector.shape_cast %188 : vector<1x7x2048xbf16> to vector<7x2048xbf16>
    %cst_87 = arith.constant dense<0.000000e+00> : vector<16x2048xf32>
    %190 = tpu.matmul %187, %189, %cst_87 {dimension_numbers = #tpu.dot_dimension_numbers<[1], [0], [0], [1], [0, 0, 1, 1], [], []>} : vector<16x7xbf16>, vector<7x2048xbf16>, vector<16x2048xf32> -> vector<16x2048xf32>
    %c1_88 = arith.constant 1 : index
    %c0_89 = arith.constant 0 : index
    %c0_90 = arith.constant 0 : index
    %191 = vector.load %arg8[%c1_88, %c0_89, %c0_90] : memref<3x1x2048xf32, #tpu.memory_space<vmem>>, vector<1x1x2048xf32>
    %192 = vector.shape_cast %191 : vector<1x1x2048xf32> to vector<1x2048xf32>
    %193 = vector.broadcast %192 : vector<1x2048xf32> to vector<16x2048xf32>
    %194 = arith.addf %190, %193 : vector<16x2048xf32>
    %cst_91 = arith.constant 0.000000e+00 : f32
    %195 = vector.broadcast %cst_91 : f32 to vector<16x2048xf32>
    %196 = arith.maximumf %194, %195 : vector<16x2048xf32>
    %197 = arith.truncf %196 : vector<16x2048xf32> to vector<16x2048xbf16>
    %c1_92 = arith.constant 1 : index
    %c0_93 = arith.constant 0 : index
    %c0_94 = arith.constant 0 : index
    %198 = vector.load %arg9[%c1_92, %c0_93, %c0_94] : memref<3x7x2048xbf16, #tpu.memory_space<vmem>>, vector<1x7x2048xbf16>
    %199 = vector.shape_cast %198 : vector<1x7x2048xbf16> to vector<7x2048xbf16>
    %cst_95 = arith.constant dense<0.000000e+00> : vector<16x7xf32>
    %200 = tpu.matmul %197, %199, %cst_95 {dimension_numbers = #tpu.dot_dimension_numbers<[1], [1], [0], [0], [0, 0, 1, 0], [], []>} : vector<16x2048xbf16>, vector<7x2048xbf16>, vector<16x7xf32> -> vector<16x7xf32>
    %c1_96 = arith.constant 1 : index
    %c0_97 = arith.constant 0 : index
    %c0_98 = arith.constant 0 : index
    %201 = vector.load %arg10[%c1_96, %c0_97, %c0_98] : memref<3x1x7xf32, #tpu.memory_space<vmem>>, vector<1x1x7xf32>
    %202 = vector.shape_cast %201 : vector<1x1x7xf32> to vector<1x7xf32>
    %203 = vector.broadcast %202 : vector<1x7xf32> to vector<16x7xf32>
    %204 = arith.addf %200, %203 : vector<16x7xf32>
    %205 = arith.addf %186, %204 : vector<16x7xf32>
    %c1_99 = arith.constant 1 : index
    %c0_100 = arith.constant 0 : index
    %c0_101 = arith.constant 0 : index
    %206 = vector.load %arg11[%c1_99, %c0_100, %c0_101] : memref<3x1x7xf32, #tpu.memory_space<vmem>>, vector<1x1x7xf32>
    %207 = vector.shape_cast %206 : vector<1x1x7xf32> to vector<1x7xf32>
    %c1_102 = arith.constant 1 : index
    %c0_103 = arith.constant 0 : index
    %c0_104 = arith.constant 0 : index
    %208 = vector.load %arg12[%c1_102, %c0_103, %c0_104] : memref<3x1x7xf32, #tpu.memory_space<vmem>>, vector<1x1x7xf32>
    %209 = vector.shape_cast %208 : vector<1x1x7xf32> to vector<1x7xf32>
    %cst_105 = arith.constant dense<0.000000e+00> : vector<16xf32>
    %210 = vector.multi_reduction <add>, %205, %cst_105 [1] : vector<16x7xf32> to vector<16xf32>
    %211 = vector.shape_cast %210 : vector<16xf32> to vector<16x1xf32>
    %cst_106 = arith.constant 7.000000e+00 : f32
    %212 = vector.broadcast %cst_106 : f32 to vector<16x1xf32>
    %213 = arith.divf %211, %212 : vector<16x1xf32>
    %214 = vector.broadcast %213 : vector<16x1xf32> to vector<16x7xf32>
    %215 = arith.subf %205, %214 : vector<16x7xf32>
    %216 = arith.mulf %215, %215 : vector<16x7xf32>
    %cst_107 = arith.constant dense<0.000000e+00> : vector<16xf32>
    %217 = vector.multi_reduction <add>, %216, %cst_107 [1] : vector<16x7xf32> to vector<16xf32>
    %218 = vector.shape_cast %217 : vector<16xf32> to vector<16x1xf32>
    %cst_108 = arith.constant 7.000000e+00 : f32
    %219 = vector.broadcast %cst_108 : f32 to vector<16x1xf32>
    %220 = arith.divf %218, %219 : vector<16x1xf32>
    %cst_109 = arith.constant 9.99999974E-6 : f32
    %221 = vector.broadcast %cst_109 : f32 to vector<16x1xf32>
    %222 = arith.addf %220, %221 : vector<16x1xf32>
    %223 = math.rsqrt %222 : vector<16x1xf32>
    %224 = vector.broadcast %223 : vector<16x1xf32> to vector<16x7xf32>
    %225 = arith.mulf %215, %224 : vector<16x7xf32>
    %226 = vector.broadcast %207 : vector<1x7xf32> to vector<16x7xf32>
    %227 = arith.mulf %225, %226 : vector<16x7xf32>
    %228 = vector.broadcast %209 : vector<1x7xf32> to vector<16x7xf32>
    %229 = arith.addf %227, %228 : vector<16x7xf32>
    %c2 = arith.constant 2 : index
    %c0_110 = arith.constant 0 : index
    %c0_111 = arith.constant 0 : index
    %230 = vector.load %arg1[%c2, %c0_110, %c0_111] : memref<3x7x21xf32, #tpu.memory_space<vmem>>, vector<1x7x21xf32>
    %231 = vector.shape_cast %230 : vector<1x7x21xf32> to vector<7x21xf32>
    %cst_112 = arith.constant dense<0.000000e+00> : vector<16x21xf32>
    %232 = tpu.matmul %229, %231, %cst_112 {dimension_numbers = #tpu.dot_dimension_numbers<[1], [0], [0], [1], [0, 0, 1, 1], [], []>} : vector<16x7xf32>, vector<7x21xf32>, vector<16x21xf32> -> vector<16x21xf32>
    %c2_113 = arith.constant 2 : index
    %c0_114 = arith.constant 0 : index
    %c0_115 = arith.constant 0 : index
    %233 = vector.load %arg2[%c2_113, %c0_114, %c0_115] : memref<3x1x21xf32, #tpu.memory_space<vmem>>, vector<1x1x21xf32>
    %234 = vector.shape_cast %233 : vector<1x1x21xf32> to vector<1x21xf32>
    %235 = vector.broadcast %234 : vector<1x21xf32> to vector<16x21xf32>
    %236 = arith.addf %232, %235 : vector<16x21xf32>
    %237 = vector.extract_strided_slice %236 {offsets = [0, 0], sizes = [16, 7], strides = [1, 1]} : vector<16x21xf32> to vector<16x7xf32>
    %238 = vector.shape_cast %237 : vector<16x7xf32> to vector<2x8x7xf32>
    %239 = vector.extract_strided_slice %236 {offsets = [0, 7], sizes = [16, 7], strides = [1, 1]} : vector<16x21xf32> to vector<16x7xf32>
    %240 = vector.shape_cast %239 : vector<16x7xf32> to vector<2x8x7xf32>
    %241 = vector.extract_strided_slice %236 {offsets = [0, 14], sizes = [16, 7], strides = [1, 1]} : vector<16x21xf32> to vector<16x7xf32>
    %242 = vector.shape_cast %241 : vector<16x7xf32> to vector<2x8x7xf32>
    %243 = vector.shape_cast %238 : vector<2x8x7xf32> to vector<2x8x1x7xf32>
    %244 = vector.shape_cast %240 : vector<2x8x7xf32> to vector<2x1x8x7xf32>
    %245 = vector.broadcast %243 : vector<2x8x1x7xf32> to vector<2x8x8x7xf32>
    %246 = vector.broadcast %244 : vector<2x1x8x7xf32> to vector<2x8x8x7xf32>
    %247 = arith.mulf %245, %246 : vector<2x8x8x7xf32>
    %248 = vector.shape_cast %7 : vector<8x8xf32> to vector<1x8x8x1xf32>
    %249 = vector.broadcast %248 : vector<1x8x8x1xf32> to vector<2x8x8x7xf32>
    %250 = arith.addf %247, %249 : vector<2x8x8x7xf32>
    %cst_116 = arith.constant dense<0xFF800000> : vector<2x8x7xf32>
    %251 = vector.multi_reduction <maximumf>, %250, %cst_116 [2] : vector<2x8x8x7xf32> to vector<2x8x7xf32>
    %252 = vector.shape_cast %251 : vector<2x8x7xf32> to vector<2x8x1x7xf32>
    %253 = vector.broadcast %252 : vector<2x8x1x7xf32> to vector<2x8x8x7xf32>
    %254 = arith.subf %250, %253 : vector<2x8x8x7xf32>
    %255 = math.exp %254 : vector<2x8x8x7xf32>
    %cst_117 = arith.constant dense<0.000000e+00> : vector<2x8x7xf32>
    %256 = vector.multi_reduction <add>, %255, %cst_117 [2] : vector<2x8x8x7xf32> to vector<2x8x7xf32>
    %257 = vector.shape_cast %256 : vector<2x8x7xf32> to vector<2x8x1x7xf32>
    %258 = tpu.reciprocal %257 {approx = true} : vector<2x8x1x7xf32> -> vector<2x8x1x7xf32>
    %259 = vector.broadcast %258 : vector<2x8x1x7xf32> to vector<2x8x8x7xf32>
    %260 = arith.mulf %255, %259 : vector<2x8x8x7xf32>
    %261 = vector.shape_cast %242 : vector<2x8x7xf32> to vector<2x1x8x7xf32>
    %262 = vector.broadcast %261 : vector<2x1x8x7xf32> to vector<2x8x8x7xf32>
    %263 = arith.mulf %260, %262 : vector<2x8x8x7xf32>
    %cst_118 = arith.constant dense<0.000000e+00> : vector<2x8x7xf32>
    %264 = vector.multi_reduction <add>, %263, %cst_118 [2] : vector<2x8x8x7xf32> to vector<2x8x7xf32>
    %265 = vector.shape_cast %264 : vector<2x8x7xf32> to vector<16x7xf32>
    %c2_119 = arith.constant 2 : index
    %c0_120 = arith.constant 0 : index
    %c0_121 = arith.constant 0 : index
    %266 = vector.load %arg3[%c2_119, %c0_120, %c0_121] : memref<3x7x7xf32, #tpu.memory_space<vmem>>, vector<1x7x7xf32>
    %267 = vector.shape_cast %266 : vector<1x7x7xf32> to vector<7x7xf32>
    %cst_122 = arith.constant dense<0.000000e+00> : vector<16x7xf32>
    %268 = tpu.matmul %265, %267, %cst_122 {dimension_numbers = #tpu.dot_dimension_numbers<[1], [0], [0], [1], [0, 0, 1, 1], [], []>} : vector<16x7xf32>, vector<7x7xf32>, vector<16x7xf32> -> vector<16x7xf32>
    %c2_123 = arith.constant 2 : index
    %c0_124 = arith.constant 0 : index
    %c0_125 = arith.constant 0 : index
    %269 = vector.load %arg4[%c2_123, %c0_124, %c0_125] : memref<3x1x7xf32, #tpu.memory_space<vmem>>, vector<1x1x7xf32>
    %270 = vector.shape_cast %269 : vector<1x1x7xf32> to vector<1x7xf32>
    %271 = vector.broadcast %270 : vector<1x7xf32> to vector<16x7xf32>
    %272 = arith.addf %268, %271 : vector<16x7xf32>
    %273 = arith.addf %229, %272 : vector<16x7xf32>
    %c2_126 = arith.constant 2 : index
    %c0_127 = arith.constant 0 : index
    %c0_128 = arith.constant 0 : index
    %274 = vector.load %arg5[%c2_126, %c0_127, %c0_128] : memref<3x1x7xf32, #tpu.memory_space<vmem>>, vector<1x1x7xf32>
    %275 = vector.shape_cast %274 : vector<1x1x7xf32> to vector<1x7xf32>
    %c2_129 = arith.constant 2 : index
    %c0_130 = arith.constant 0 : index
    %c0_131 = arith.constant 0 : index
    %276 = vector.load %arg6[%c2_129, %c0_130, %c0_131] : memref<3x1x7xf32, #tpu.memory_space<vmem>>, vector<1x1x7xf32>
    %277 = vector.shape_cast %276 : vector<1x1x7xf32> to vector<1x7xf32>
    %cst_132 = arith.constant dense<0.000000e+00> : vector<16xf32>
    %278 = vector.multi_reduction <add>, %273, %cst_132 [1] : vector<16x7xf32> to vector<16xf32>
    %279 = vector.shape_cast %278 : vector<16xf32> to vector<16x1xf32>
    %cst_133 = arith.constant 7.000000e+00 : f32
    %280 = vector.broadcast %cst_133 : f32 to vector<16x1xf32>
    %281 = arith.divf %279, %280 : vector<16x1xf32>
    %282 = vector.broadcast %281 : vector<16x1xf32> to vector<16x7xf32>
    %283 = arith.subf %273, %282 : vector<16x7xf32>
    %284 = arith.mulf %283, %283 : vector<16x7xf32>
    %cst_134 = arith.constant dense<0.000000e+00> : vector<16xf32>
    %285 = vector.multi_reduction <add>, %284, %cst_134 [1] : vector<16x7xf32> to vector<16xf32>
    %286 = vector.shape_cast %285 : vector<16xf32> to vector<16x1xf32>
    %cst_135 = arith.constant 7.000000e+00 : f32
    %287 = vector.broadcast %cst_135 : f32 to vector<16x1xf32>
    %288 = arith.divf %286, %287 : vector<16x1xf32>
    %cst_136 = arith.constant 9.99999974E-6 : f32
    %289 = vector.broadcast %cst_136 : f32 to vector<16x1xf32>
    %290 = arith.addf %288, %289 : vector<16x1xf32>
    %291 = math.rsqrt %290 : vector<16x1xf32>
    %292 = vector.broadcast %291 : vector<16x1xf32> to vector<16x7xf32>
    %293 = arith.mulf %283, %292 : vector<16x7xf32>
    %294 = vector.broadcast %275 : vector<1x7xf32> to vector<16x7xf32>
    %295 = arith.mulf %293, %294 : vector<16x7xf32>
    %296 = vector.broadcast %277 : vector<1x7xf32> to vector<16x7xf32>
    %297 = arith.addf %295, %296 : vector<16x7xf32>
    %298 = arith.truncf %297 : vector<16x7xf32> to vector<16x7xbf16>
    %c2_137 = arith.constant 2 : index
    %c0_138 = arith.constant 0 : index
    %c0_139 = arith.constant 0 : index
    %299 = vector.load %arg7[%c2_137, %c0_138, %c0_139] : memref<3x7x2048xbf16, #tpu.memory_space<vmem>>, vector<1x7x2048xbf16>
    %300 = vector.shape_cast %299 : vector<1x7x2048xbf16> to vector<7x2048xbf16>
    %cst_140 = arith.constant dense<0.000000e+00> : vector<16x2048xf32>
    %301 = tpu.matmul %298, %300, %cst_140 {dimension_numbers = #tpu.dot_dimension_numbers<[1], [0], [0], [1], [0, 0, 1, 1], [], []>} : vector<16x7xbf16>, vector<7x2048xbf16>, vector<16x2048xf32> -> vector<16x2048xf32>
    %c2_141 = arith.constant 2 : index
    %c0_142 = arith.constant 0 : index
    %c0_143 = arith.constant 0 : index
    %302 = vector.load %arg8[%c2_141, %c0_142, %c0_143] : memref<3x1x2048xf32, #tpu.memory_space<vmem>>, vector<1x1x2048xf32>
    %303 = vector.shape_cast %302 : vector<1x1x2048xf32> to vector<1x2048xf32>
    %304 = vector.broadcast %303 : vector<1x2048xf32> to vector<16x2048xf32>
    %305 = arith.addf %301, %304 : vector<16x2048xf32>
    %cst_144 = arith.constant 0.000000e+00 : f32
    %306 = vector.broadcast %cst_144 : f32 to vector<16x2048xf32>
    %307 = arith.maximumf %305, %306 : vector<16x2048xf32>
    %308 = arith.truncf %307 : vector<16x2048xf32> to vector<16x2048xbf16>
    %c2_145 = arith.constant 2 : index
    %c0_146 = arith.constant 0 : index
    %c0_147 = arith.constant 0 : index
    %309 = vector.load %arg9[%c2_145, %c0_146, %c0_147] : memref<3x7x2048xbf16, #tpu.memory_space<vmem>>, vector<1x7x2048xbf16>
    %310 = vector.shape_cast %309 : vector<1x7x2048xbf16> to vector<7x2048xbf16>
    %cst_148 = arith.constant dense<0.000000e+00> : vector<16x7xf32>
    %311 = tpu.matmul %308, %310, %cst_148 {dimension_numbers = #tpu.dot_dimension_numbers<[1], [1], [0], [0], [0, 0, 1, 0], [], []>} : vector<16x2048xbf16>, vector<7x2048xbf16>, vector<16x7xf32> -> vector<16x7xf32>
    %c2_149 = arith.constant 2 : index
    %c0_150 = arith.constant 0 : index
    %c0_151 = arith.constant 0 : index
    %312 = vector.load %arg10[%c2_149, %c0_150, %c0_151] : memref<3x1x7xf32, #tpu.memory_space<vmem>>, vector<1x1x7xf32>
    %313 = vector.shape_cast %312 : vector<1x1x7xf32> to vector<1x7xf32>
    %314 = vector.broadcast %313 : vector<1x7xf32> to vector<16x7xf32>
    %315 = arith.addf %311, %314 : vector<16x7xf32>
    %316 = arith.addf %297, %315 : vector<16x7xf32>
    %c2_152 = arith.constant 2 : index
    %c0_153 = arith.constant 0 : index
    %c0_154 = arith.constant 0 : index
    %317 = vector.load %arg11[%c2_152, %c0_153, %c0_154] : memref<3x1x7xf32, #tpu.memory_space<vmem>>, vector<1x1x7xf32>
    %318 = vector.shape_cast %317 : vector<1x1x7xf32> to vector<1x7xf32>
    %c2_155 = arith.constant 2 : index
    %c0_156 = arith.constant 0 : index
    %c0_157 = arith.constant 0 : index
    %319 = vector.load %arg12[%c2_155, %c0_156, %c0_157] : memref<3x1x7xf32, #tpu.memory_space<vmem>>, vector<1x1x7xf32>
    %320 = vector.shape_cast %319 : vector<1x1x7xf32> to vector<1x7xf32>
    %cst_158 = arith.constant dense<0.000000e+00> : vector<16xf32>
    %321 = vector.multi_reduction <add>, %316, %cst_158 [1] : vector<16x7xf32> to vector<16xf32>
    %322 = vector.shape_cast %321 : vector<16xf32> to vector<16x1xf32>
    %cst_159 = arith.constant 7.000000e+00 : f32
    %323 = vector.broadcast %cst_159 : f32 to vector<16x1xf32>
    %324 = arith.divf %322, %323 : vector<16x1xf32>
    %325 = vector.broadcast %324 : vector<16x1xf32> to vector<16x7xf32>
    %326 = arith.subf %316, %325 : vector<16x7xf32>
    %327 = arith.mulf %326, %326 : vector<16x7xf32>
    %cst_160 = arith.constant dense<0.000000e+00> : vector<16xf32>
    %328 = vector.multi_reduction <add>, %327, %cst_160 [1] : vector<16x7xf32> to vector<16xf32>
    %329 = vector.shape_cast %328 : vector<16xf32> to vector<16x1xf32>
    %cst_161 = arith.constant 7.000000e+00 : f32
    %330 = vector.broadcast %cst_161 : f32 to vector<16x1xf32>
    %331 = arith.divf %329, %330 : vector<16x1xf32>
    %cst_162 = arith.constant 9.99999974E-6 : f32
    %332 = vector.broadcast %cst_162 : f32 to vector<16x1xf32>
    %333 = arith.addf %331, %332 : vector<16x1xf32>
    %334 = math.rsqrt %333 : vector<16x1xf32>
    %335 = vector.broadcast %334 : vector<16x1xf32> to vector<16x7xf32>
    %336 = arith.mulf %326, %335 : vector<16x7xf32>
    %337 = vector.broadcast %318 : vector<1x7xf32> to vector<16x7xf32>
    %338 = arith.mulf %336, %337 : vector<16x7xf32>
    %339 = vector.broadcast %320 : vector<1x7xf32> to vector<16x7xf32>
    %340 = arith.addf %338, %339 : vector<16x7xf32>
    %341 = vector.shape_cast %340 : vector<16x7xf32> to vector<2x8x7xf32>
    %c0_163 = arith.constant 0 : index
    %c0_164 = arith.constant 0 : index
    %342 = vector.load %arg13[%c0_163, %c0_164] : memref<1x7xf32, #tpu.memory_space<vmem>>, vector<1x7xf32>
    %343 = vector.shape_cast %342 : vector<1x7xf32> to vector<1x1x7xf32>
    %344 = vector.broadcast %343 : vector<1x1x7xf32> to vector<2x8x7xf32>
    %345 = arith.mulf %341, %344 : vector<2x8x7xf32>
    %cst_165 = arith.constant dense<0.000000e+00> : vector<2x8xf32>
    %346 = vector.multi_reduction <add>, %345, %cst_165 [2] : vector<2x8x7xf32> to vector<2x8xf32>
    %c0_166 = arith.constant 0 : index
    %c0_167 = arith.constant 0 : index
    %347 = vector.load %arg14[%c0_166, %c0_167] : memref<1x1xf32, #tpu.memory_space<vmem>>, vector<1x1xf32>
    %348 = vector.broadcast %347 : vector<1x1xf32> to vector<2x8xf32>
    %349 = arith.addf %346, %348 : vector<2x8xf32>
    %c0_168 = arith.constant 0 : index
    %c0_169 = arith.constant 0 : index
    %350 = vector.load %arg15[%c0_168, %c0_169] : memref<2x8xf32, #tpu.memory_space<vmem>>, vector<2x8xf32>
    tpu.vector_store %arg15[%c0_168, %c0_169], %349 {strides = array<i32>} : memref<2x8xf32, #tpu.memory_space<vmem>>, vector<2x8xf32>,
    return
  }
}

</mosaic_0001>

<bundles_post_ra>
// kernel: transformer_forward.1
= control target key start
LH: loop header
LB: loop body
LE: loop exit
PB: predicated region body
PF: predicated region fallthrough
CT: control target
= control target key end

     0   :  { %s6586_s0 = inlined_call_operand.vmem [shape: f32[2,8,7], index: 0, kind: input, shape index: {}]   ;;  %s6587_s1 = inlined_call_operand.vmem [shape: f32[3,7,21], index: 1, kind: input, shape index: {}]   ;;  %s6588_s2 = inlined_call_operand.vmem [shape: f32[3,1,21], index: 2, kind: input, shape index: {}]   ;;  %s6589_s3 = inlined_call_operand.hbm [shape: f32[3,7,7], index: 3, kind: input, shape index: {}]   ;;  %s6590_s4 = inlined_call_operand.vmem [shape: f32[3,1,7], index: 4, kind: input, shape index: {}]   ;;  %s6591_s5 = inlined_call_operand.vmem [shape: f32[3,1,7], index: 5, kind: input, shape index: {}]   ;;  %s6592_s6 = inlined_call_operand.vmem [shape: f32[3,1,7], index: 6, kind: input, shape index: {}]   ;;  %s6593_s7 = inlined_call_operand.hbm [shape: bf16[3,7,2048], index: 7, kind: input, shape index: {}]   ;;  %s6594_s8 = inlined_call_operand.hbm [shape: f32[3,1,2048], index: 8, kind: input, shape index: {}]   ;;  %s6595_s9 = inlined_call_operand.hbm [shape: bf16[3,7,2048], index: 9, kind: input, shape index: {}]   ;;  %s6596_s10 = inlined_call_operand.vmem [shape: f32[3,1,7], index: 10, kind: input, shape index: {}]   ;;  %s6597_s11 = inlined_call_operand.vmem [shape: f32[3,1,7], index: 11, kind: input, shape index: {}]   ;;  %s6598_s12 = inlined_call_operand.hbm [shape: f32[3,1,7], index: 12, kind: input, shape index: {}]   ;;  %s6599_s13 = inlined_call_operand.vmem [shape: f32[1,7], index: 13, kind: input, shape index: {}]   ;;  %s6600_s14 = inlined_call_operand.<no memory space> [shape: f32[1,1], index: 14, kind: input, shape index: {}]   ;;  %s6601_s15 = inlined_call_operand.hbm [shape: f32[2,8], index: 15, kind: output, shape index: {}]  }
   0x1   :  { %v20_v0 = vstv %s6600_s14 }
   0x2   :  { %21 = vst [vmem:[#allocation2] sm:$0x1] %v20_v0 }
   0x3   :  { %22 = vsyncpa [#allocation4], 0 }
   0x4   :  { %23 = vsyncpa [#allocation7], 0 }
   0x5   :  { %24 = vsyncpa [#allocation10], 0  ;;  %s55_s22 = sshll.u32 %s6593_s7, 4  ;;  %s56_s22 = int_to_ptr.hbm [resolvable:$true] %s55_s22 }
   0x6   :  { %25 = vsyncpa [#allocation5], 0  ;;  %s5135_s23 = smov [#allocation6]   ;;  %s81_s27 = sshll.u32 %s6595_s9, 4  ;;  %s82_s27 = int_to_ptr.hbm [resolvable:$true] %s81_s27 }
   0x7   :  { %s57_s24 = sshll.u32 %s5135_s23, 4  ;;  %s5136_s28 = smov 1024   ;;  %s58_s24 = int_to_ptr.vmem [resolvable:$true] %s57_s24 }
   0x8   :  { %s5137_s29 = smov 64   ;;  %s5138_s14 = smov [#allocation9]  }
   0x9   :  { %63 = dma.hbm_to_vmem [thread:$0]  %s56_s22, 3072, %s58_s24, [#allocation7], %s5136_s28, %s5136_s28, %s5137_s29  }
   0xa   :  { %s83_s30 = sshll.u32 %s5138_s14, 4  ;;  %s36_s18 = sshll.u32 %s6589_s3, 4  ;;  %s84_s30 = int_to_ptr.vmem [resolvable:$true] %s83_s30  ;;  %s37_s18 = int_to_ptr.hbm [resolvable:$true] %s36_s18 }
   0xb   :  { %89 = dma.hbm_to_vmem [thread:$0]  %s82_s27, 3072, %s84_s30, [#allocation10], %s5136_s28, %s5136_s28, %s5137_s29  }
   0xc   :  { %s5139_s7 = smov [#allocation3]   ;;  %s68_s9 = sshll.u32 %s6594_s8, 4  ;;  %s69_s9 = int_to_ptr.hbm [resolvable:$true] %s68_s9 }
   0xd   :  { %s38_s19 = sshll.u32 %s5139_s7, 4  ;;  %s5140_s23 = smov 128   ;;  %s39_s19 = int_to_ptr.vmem [resolvable:$true] %s38_s19 }
   0xe   :  { %s5141_s25 = smov 8   ;;  %s5142_s22 = smov [#allocation8]  }
   0xf   :  { %44 = dma.hbm_to_vmem [thread:$0]  %s37_s18, 384, %s39_s19, [#allocation4], %s5140_s23, %s5140_s23, %s5141_s25  }
  0x10   :  { %s70_s24 = sshll.u32 %s5142_s22, 4  ;;  %s5143_s26 = smov 256   ;;  %s71_s24 = int_to_ptr.vmem [resolvable:$true] %s70_s24 }
  0x11   :  { %s5144_s14 = smov 16   ;;  %s98_s27 = sshll.u32 %s6598_s12, 4  ;;  %s99_s27 = int_to_ptr.hbm [resolvable:$true] %s98_s27 }
  0x12   :  { %76 = dma.hbm_to_vmem [thread:$0]  %s69_s9, 768, %s71_s24, [#allocation7], %s5143_s26, %s5143_s26, %s5144_s14  }
  0x13   :  { %s5145_s28 = smov [#allocation11]   ;;  %s5146_s30 = smov 1  }
  0x14   :  { %s100_s29 = sshll.u32 %s5145_s28, 4  ;;  %s101_s29 = int_to_ptr.vmem [resolvable:$true] %s100_s29 }
  0x15   :  { %106 = dma.hbm_to_vmem [thread:$0]  %s99_s27, 48, %s101_s29, [#allocation10], %s5144_s14, %s5144_s14, %s5146_s30  }
  0x16   :  { %5127 = dma.done.wait [#allocation4], 384  }
  0x17   :  { %5128 = vsyncadd [#allocation4], 4294966912 }
  0x18   :  { %5129 = dma.done.wait [#allocation7], 3840  }
  0x19   :  { %5130 = vsyncadd [#allocation7], 4294963456 }
  0x1a   :  { %5131 = dma.done.wait [#allocation10], 3120  }
  0x1b   :  { %5132 = vsyncadd [#allocation10], 4294964176  ;;  %v134_v1 = vlaneseq  ;;  %vm152_vm1 = vcmask 1046528   ;;  %v5147_v4 = vmov -inf   ;;  %vm145_vm2 = vcmask 56320   ;;  %v132_v9 = vld [vmem:[%s6586_s0] sm:$0xff] }
  0x1c   :  { %v140_v8 = vld [vmem:[%s6587_s1] sm:$0x7f]  ;;  %v133_v10 = vld [vmem:[%s6586_s0 + $0x8] sm:$0xff]  ;;  %s5148_s9 = smov 121   ;;  %s5149_s23 = smov 114   ;;  %vm780_vm3 = vcmask 1041409  }
  0x1d   :  { %v135_v2 = vshrl.u32 %v134_v1, 7  ;;  %v5252_v3 = vand.u32 127, %v134_v1  ;;  %4614 = vmatpush.msk.msra.mxu0 %vm152_vm1, %v140_v8  ;;  %4694 = vmatpush.msk.msra.mxu2 %vm152_vm1, %v140_v8  ;;  %v4740_v15 = vld [vmem:[%s6588_s2] ss:$0 sm:$0xff]  ;;  %vm782_vm4 = vcmask 1042434   ;;  %vm784_vm5 = vcmask 1043459  }
  0x1e   :  { %4615 = vmatmul.msk.f32.vlgmr.msra.gmra.mxu0 %vm145_vm2, %v132_v9  ;;  %4616 = vmatmul.msk.f32.vlgmr.msra.gmra.mxu2 %vm145_vm2, %v133_v10  ;;  %vm786_vm6 = vcmask 1044484   ;;  %vm788_vm7 = vcmask 1045509   ;;  %vm790_vm8 = vcmask 1046534   ;;  %vm792_vm9 = vcmask 1047559   ;;  %s4602_s20 = sshll.u32 %s6601_s15, 4  ;;  %s4603_s20 = int_to_ptr.hbm [resolvable:$true] %s4602_s20 }
  0x1f   :  { %6606 = vst [vmem:[#allocation17_spill] sm:$0xff] %v5252_v3  ;;  %4721 = vset.pattern.permute.xlu1 %v135_v2  ;;  %vm138_vm0 = vcmp.le.s32.totalorder %v5252_v3, %v135_v2  ;;  %4732 = vset.pattern.permute.xlu2 %v135_v2  ;;  %vm984_vm11 = vcmask 1042432   ;;  %vm985_vm12 = vcmask 1043456  }
  0x20   :  { %v139_v5 = vsel %vm138_vm0, 0.0, %v5147_v4  ;;  %4715 = vset.pattern.permute.xlu0 %v135_v2 }
  0x21   :  { %v263_v6 = vperm.slane %v139_v5, 2  ;;  %v270_v7 = vperm.slane %v139_v5, 3  ;;  %v277_v12 = vperm.slane %v139_v5, 4  ;;  %v284_v13 = vperm.slane %v139_v5, 5 }
  0x22   :  { %v291_v18 = vperm.slane %v139_v5, 6  ;;  %v298_v19 = vperm.slane %v139_v5, 7  ;;  %v249_v23 = vperm.slane %v139_v5, 0  ;;  %v256_v24 = vperm.slane %v139_v5, 1 }
  0x23   :  { %v4722_v11 = vpack.i.bf16 %v270_v7, %v263_v6  ;;  %v4727_v14 = vpack.i.bf16 %v284_v13, %v277_v12 }
  0x24   :  { %v4733_v22 = vpack.i.bf16 %v298_v19, %v291_v18  ;;  %v4716_v25 = vpack.i.bf16 %v256_v24, %v249_v23 }
  0x27   :  { %4723 = vperm.xlu1 %4721, %v4722_v11  }
  0x2f   :  { %4728 = vperm.xlu1 %4721, %v4727_v14  }
  0x99   :  { %v4724_v26 = vpop.permute.xlu1 %4723 }
  0x9a   :  { %v5287_v32 = vunpack.i.h.bf16 %v4724_v26  ;;  %v5289_v33 = vunpack.i.l.bf16 %v4724_v26 }
  0x9b   :  { %v173_v16 = vpop.f32.mrf.mxu0 }
  0x9c   :  { %v5271_v17 = vadd.f32 %v4740_v15, %v173_v16 }
  0x9e   :  { %227 = vrot.lane.b32.xlu2 %v5271_v17, %s5148_s9  ;;  %v182_v27 = vrot.slane %v5271_v17, 2  ;;  %v183_v28 = vrot.slane %v5271_v17, 3  ;;  %v184_v29 = vrot.slane %v5271_v17, 4  ;;  %v185_v30 = vrot.slane %v5271_v17, 5 }
  0x9f   :  { %v186_v41 = vrot.slane %v5271_v17, 6  ;;  %v187_v42 = vrot.slane %v5271_v17, 7 }
  0xa0   :  { %v197_v34 = vperm.slane %v182_v27, 0  ;;  %v198_v35 = vperm.slane %v183_v28, 0  ;;  %v199_v39 = vperm.slane %v184_v29, 0  ;;  %v200_v40 = vperm.slane %v185_v30, 0 }
  0xa1   :  { %v176_v20 = vpop.f32.mrf.mxu2  ;;  %v4729_v31 = vpop.permute.xlu1 %4728  ;;  %v201_v51 = vperm.slane %v186_v41, 0  ;;  %v202_v52 = vperm.slane %v187_v42, 0 }
  0xa2   :  { %v5275_v21 = vadd.f32 %v4740_v15, %v176_v20  ;;  %v5291_v36 = vunpack.i.h.bf16 %v4729_v31  ;;  %v5293_v37 = vunpack.i.l.bf16 %v4729_v31 }
  0xa4   :  { %627 = vrot.lane.b32.xlu1 %v5275_v21, %s5149_s23  ;;  %229 = vrot.lane.b32.xlu0 %v5275_v21, %s5148_s9 }
  0xa6   :  { %4734 = vperm.xlu2 %4732, %v4733_v22  }
  0xac   :  { %4717 = vperm.xlu0 %4715, %v4716_v25  }
  0xae   :  { %625 = vrot.lane.b32.xlu2 %v5271_v17, %s5149_s23 }
  0xf8   :  { %v5295_v38 = vpop.permute.xlu2 %227 }
  0xf9   :  { %v235_v43 = vmul.f32 %v5295_v38, %v197_v34  ;;  %v236_v44 = vmul.f32 %v5295_v38, %v198_v35  ;;  %v237_v45 = vmul.f32 %v5295_v38, %v199_v39  ;;  %v238_v46 = vmul.f32 %v5295_v38, %v200_v40 }
  0xfa   :  { %v239_v61 = vmul.f32 %v5295_v38, %v201_v51  ;;  %v240_v62 = vmul.f32 %v5295_v38, %v202_v52 }
  0xfb   :  { %v307_v47 = vadd.f32 %v5289_v33, %v235_v43  ;;  %v308_v48 = vadd.f32 %v5287_v32, %v236_v44  ;;  %v309_v49 = vadd.f32 %v5293_v37, %v237_v45  ;;  %v5307_v50 = vadd.f32 %v5291_v36, %v238_v46 }
  0xfd   :  { %v335_v53 = vsel %vm145_vm2, %v307_v47, -inf  ;;  %v342_v54 = vsel %vm145_vm2, %v308_v48, -inf  ;;  %v349_v57 = vsel %vm145_vm2, %v309_v49, -inf  ;;  %v356_v58 = vsel %vm145_vm2, %v5307_v50, -inf }
  0xfe   :  { %v336_v55 = vrot.slane %v335_v53, 4  ;;  %v343_v56 = vrot.slane %v342_v54, 4  ;;  %v350_v59 = vrot.slane %v349_v57, 4  ;;  %v357_v60 = vrot.slane %v356_v58, 4 }
 0x100   :  { %v337_v63 = vmax.f32 %v335_v53, %v336_v55  ;;  %v344_v0 = vmax.f32 %v342_v54, %v343_v56  ;;  %v4735_v1 = vpop.permute.xlu2 %4734  ;;  %v351_v2 = vmax.f32 %v349_v57, %v350_v59  ;;  %v358_v4 = vmax.f32 %v356_v58, %v357_v60 }
 0x101   :  { %v5316_v5 = vunpack.i.h.bf16 %v4735_v1  ;;  %v5318_v6 = vunpack.i.l.bf16 %v4735_v1  ;;  %v181_v53 = vrot.slane %v5271_v17, 1  ;;  %v188_v54 = vrot.slane %v5275_v21, 1 }
 0x102   :  { %v338_v7 = vrot.slane %v337_v63, 2  ;;  %v345_v8 = vrot.slane %v344_v0, 2  ;;  %v352_v9 = vrot.slane %v351_v2, 2  ;;  %v359_v10 = vrot.slane %v358_v4, 2 }
 0x103   :  { %6607 = vst [vmem:[#allocation18_spill] sm:$0xff] %v5316_v5  ;;  %v5321_v11 = vadd.f32 %v5318_v6, %v239_v61  ;;  %v5324_v12 = vadd.f32 %v5316_v5, %v240_v62  ;;  %v189_v55 = vrot.slane %v5275_v21, 2  ;;  %v191_v57 = vrot.slane %v5275_v21, 4 }
 0x104   :  { %v339_v13 = vmax.f32 %v337_v63, %v338_v7  ;;  %v346_v14 = vmax.f32 %v344_v0, %v345_v8  ;;  %v353_v15 = vmax.f32 %v351_v2, %v352_v9  ;;  %v360_v16 = vmax.f32 %v358_v4, %v359_v10 }
 0x105   :  { %v363_v18 = vsel %vm145_vm2, %v5321_v11, -inf  ;;  %v370_v19 = vsel %vm145_vm2, %v5324_v12, -inf  ;;  %v192_v58 = vrot.slane %v5275_v21, 5  ;;  %v193_v59 = vrot.slane %v5275_v21, 6 }
 0x106   :  { %v340_v20 = vrot.slane %v339_v13, 1  ;;  %v347_v22 = vrot.slane %v346_v14, 1  ;;  %v364_v23 = vrot.slane %v363_v18, 4  ;;  %v371_v24 = vrot.slane %v370_v19, 4 }
 0x107   :  { %v354_v25 = vrot.slane %v353_v15, 1  ;;  %v361_v26 = vrot.slane %v360_v16, 1  ;;  %v194_v60 = vrot.slane %v5275_v21, 7  ;;  %v195_v61 = vperm.slane %v5271_v17, 0 }
 0x108   :  { %v341_v27 = vmax.f32 %v339_v13, %v340_v20  ;;  %v348_v28 = vmax.f32 %v346_v14, %v347_v22  ;;  %v365_v29 = vmax.f32 %v363_v18, %v364_v23  ;;  %v372_v30 = vmax.f32 %v370_v19, %v371_v24 }
 0x109   :  { %v355_v31 = vmax.f32 %v353_v15, %v354_v25  ;;  %v362_v42 = vmax.f32 %v360_v16, %v361_v26  ;;  %v196_v62 = vperm.slane %v181_v53, 0  ;;  %v203_v63 = vperm.slane %v5275_v21, 0 }
 0x10a   :  { %v435_v34 = vsub.f32 %v307_v47, %v341_v27  ;;  %v436_v35 = vsub.f32 %v308_v48, %v348_v28  ;;  %v366_v39 = vrot.slane %v365_v29, 2  ;;  %v373_v40 = vrot.slane %v372_v30, 2 }
 0x10b   :  { %v437_v41 = vsub.f32 %v309_v49, %v355_v31  ;;  %v438_v47 = vsub.f32 %v5307_v50, %v362_v42  ;;  %v190_v49 = vrot.slane %v5275_v21, 3  ;;  %v5341_v0 = vperm.slane %v188_v54, 0 }
 0x10c   :  { %v453_v43 = vmul.f32 1.442695, %v435_v34  ;;  %v455_v44 = vmul.f32 1.442695, %v436_v35  ;;  %v367_v45 = vmax.f32 %v365_v29, %v366_v39  ;;  %v374_v51 = vmax.f32 %v372_v30, %v373_v40 }
 0x10d   :  { %v457_v46 = vmul.f32 1.442695, %v437_v41  ;;  %v459_v1 = vmul.f32 1.442695, %v438_v47  ;;  %v205_v4 = vperm.slane %v189_v55, 0  ;;  %v206_v7 = vperm.slane %v190_v49, 0 }
 0x10e   :  { %4763 = vpow2.f32 %v453_v43  ;;  %v368_v52 = vrot.slane %v367_v45, 1  ;;  %v375_v56 = vrot.slane %v374_v51, 1  ;;  %v207_v17 = vperm.slane %v191_v57, 0 }
 0x10f   :  { %4765 = vpow2.f32 %v455_v44  ;;  %v208_v13 = vperm.slane %v192_v58, 0  ;;  %v209_v18 = vperm.slane %v193_v59, 0  ;;  %v5357_v19 = vmul.f32 %v5295_v38, %v195_v61 }
 0x110   :  { %4767 = vpow2.f32 %v457_v46  ;;  %v369_v48 = vmax.f32 %v367_v45, %v368_v52  ;;  %v5350_v10 = vmax.f32 %v374_v51, %v375_v56  ;;  %v5360_v20 = vmul.f32 %v5295_v38, %v196_v62 }
 0x111   :  { %4769 = vpow2.f32 %v459_v1 }
 0x112   :  { %v439_v2 = vsub.f32 %v5321_v11, %v369_v48  ;;  %v210_v11 = vperm.slane %v194_v60, 0  ;;  %v440_v28 = vsub.f32 %v5324_v12, %v5350_v10 }
 0x114   :  { %v5343_v50 = vpop.eup %4763  ;;  %v461_v25 = vmul.f32 1.442695, %v439_v2 }
 0x115   :  { %v5346_v8 = vpop.eup %4765  ;;  %v495_v9 = vsel %vm145_vm2, %v5343_v50, 0.0 }
 0x116   :  { %v5352_v14 = vpop.eup %4767  ;;  %v496_v21 = vrot.slane %v495_v9, 4  ;;  %v502_v15 = vsel %vm145_vm2, %v5346_v8, 0.0  ;;  %v230_v16 = vpop.permute.xlu0 %229  ;;  %4771 = vpow2.f32 %v461_v25 }
 0x117   :  { %v503_v22 = vrot.slane %v502_v15, 4  ;;  %v509_v23 = vsel %vm145_vm2, %v5352_v14, 0.0  ;;  %v243_v26 = vmul.f32 %v230_v16, %v205_v4  ;;  %v244_v29 = vmul.f32 %v230_v16, %v206_v7  ;;  %v5390_v54 = vpop.eup %4769 }
 0x118   :  { %v497_v24 = vadd.f32 %v496_v21, %v495_v9  ;;  %v245_v30 = vmul.f32 %v230_v16, %v207_v17  ;;  %v510_v31 = vrot.slane %v509_v23, 4  ;;  %v246_v34 = vmul.f32 %v230_v16, %v208_v13 }
 0x119   :  { %v504_v27 = vadd.f32 %v503_v22, %v502_v15  ;;  %v247_v35 = vmul.f32 %v230_v16, %v209_v18  ;;  %v248_v39 = vmul.f32 %v230_v16, %v210_v11  ;;  %v5367_v38 = vadd.f32 %v5289_v33, %v243_v26 }
 0x11a   :  { %v5370_v40 = vadd.f32 %v5287_v32, %v244_v29  ;;  %v5373_v41 = vadd.f32 %v5293_v37, %v245_v30  ;;  %v498_v42 = vrot.slane %v497_v24, 2  ;;  %v5376_v43 = vadd.f32 %v5291_v36, %v246_v34 }
 0x11b   :  { %v5379_v44 = vadd.f32 %v5318_v6, %v247_v35  ;;  %v5382_v45 = vadd.f32 %v5316_v5, %v248_v39  ;;  %v391_v46 = vsel %vm145_vm2, %v5367_v38, -inf  ;;  %v505_v53 = vrot.slane %v504_v27, 2 }
 0x11c   :  { %v398_v51 = vsel %vm145_vm2, %v5370_v40, -inf  ;;  %v405_v52 = vsel %vm145_vm2, %v5373_v41, -inf  ;;  %v5392_v55 = vmul.f32 %v230_v16, %v203_v63  ;;  %v392_v47 = vrot.slane %v391_v46, 4  ;;  %v5400_v9 = vpop.eup %4771 }
 0x11d   :  { %v399_v48 = vrot.slane %v398_v51, 4  ;;  %v406_v49 = vrot.slane %v405_v52, 4  ;;  %v511_v56 = vadd.f32 %v510_v31, %v509_v23  ;;  %v412_v57 = vsel %vm145_vm2, %v5376_v43, -inf }
 0x11e   :  { %v419_v58 = vsel %vm145_vm2, %v5379_v44, -inf  ;;  %v499_v59 = vadd.f32 %v498_v42, %v497_v24  ;;  %v393_v60 = vmax.f32 %v391_v46, %v392_v47  ;;  %v413_v1 = vrot.slane %v412_v57, 4 }
 0x11f   :  { %v400_v61 = vmax.f32 %v398_v51, %v399_v48  ;;  %v407_v62 = vmax.f32 %v405_v52, %v406_v49  ;;  %v420_v2 = vrot.slane %v419_v58, 4  ;;  %v426_v63 = vsel %vm145_vm2, %v5382_v45, -inf  ;;  %v4718_v51 = vpop.permute.xlu0 %4717 }
 0x120   :  { %v500_v4 = vrot.slane %v499_v59, 1  ;;  %v506_v7 = vadd.f32 %v505_v53, %v504_v27  ;;  %v394_v17 = vrot.slane %v393_v60, 2  ;;  %v414_v15 = vmax.f32 %v412_v57, %v413_v1 }
 0x121   :  { %v401_v13 = vrot.slane %v400_v61, 2  ;;  %v408_v21 = vrot.slane %v407_v62, 2  ;;  %v242_v18 = vmul.f32 %v230_v16, %v5341_v0  ;;  %v421_v11 = vmax.f32 %v419_v58, %v420_v2 }
 0x122   :  { %v501_v22 = vadd.f32 %v500_v4, %v499_v59  ;;  %v507_v23 = vrot.slane %v506_v7, 1  ;;  %v395_v24 = vmax.f32 %v393_v60, %v394_v17  ;;  %v415_v29 = vrot.slane %v414_v15, 2 }
 0x123   :  { %v402_v25 = vmax.f32 %v400_v61, %v401_v13  ;;  %v409_v26 = vmax.f32 %v407_v62, %v408_v21  ;;  %v5405_v30 = vsel %vm145_vm2, %v5390_v54, 0.0  ;;  %v422_v27 = vrot.slane %v421_v11, 2 }
 0x124   :  { %v427_v31 = vrot.slane %v426_v63, 4  ;;  %v512_v34 = vrot.slane %v511_v56, 2  ;;  %v396_v35 = vrot.slane %v395_v24, 1  ;;  %v416_v46 = vmax.f32 %v414_v15, %v415_v29 }
 0x125   :  { %v403_v39 = vrot.slane %v402_v25, 1  ;;  %v410_v42 = vrot.slane %v409_v26, 1  ;;  %v5409_v0 = vsel %vm145_vm2, %v5400_v9, 0.0  ;;  %v508_v16 = vadd.f32 %v507_v23, %v506_v7 }
 0x126   :  { %v513_v52 = vadd.f32 %v512_v34, %v511_v56  ;;  %4773 = vrcp.f32 %v501_v22  ;;  %v397_v53 = vmax.f32 %v395_v24, %v396_v35  ;;  %v417_v49 = vrot.slane %v416_v46, 1 }
 0x127   :  { %v404_v47 = vmax.f32 %v402_v25, %v403_v39  ;;  %v411_v48 = vmax.f32 %v409_v26, %v410_v42  ;;  %v423_v57 = vmax.f32 %v421_v11, %v422_v27  ;;  %v428_v58 = vmax.f32 %v426_v63, %v427_v31 }
 0x128   :  { %v514_v59 = vrot.slane %v513_v52, 1  ;;  %v5411_v60 = vunpack.i.h.bf16 %v4718_v51  ;;  %v418_v61 = vmax.f32 %v416_v46, %v417_v49  ;;  %v443_v62 = vsub.f32 %v5367_v38, %v397_v53 }
 0x129   :  { %v444_v1 = vsub.f32 %v5370_v40, %v404_v47  ;;  %v445_v2 = vsub.f32 %v5373_v41, %v411_v48  ;;  %4775 = vrcp.f32 %v508_v16  ;;  %v5416_v56 = vunpack.i.l.bf16 %v4718_v51 }
 0x12a   :  { %v515_v4 = vadd.f32 %v514_v59, %v513_v52  ;;  %v5420_v7 = vadd.f32 %v5411_v60, %v5360_v20  ;;  %v446_v63 = vsub.f32 %v5376_v43, %v418_v61  ;;  %v469_v17 = vmul.f32 1.442695, %v443_v62 }
 0x12b   :  { %v471_v13 = vmul.f32 1.442695, %v444_v1  ;;  %v473_v21 = vmul.f32 1.442695, %v445_v2  ;;  %v424_v11 = vrot.slane %v423_v57, 1  ;;  %v5425_v38 = vadd.f32 %v5416_v56, %v5357_v19 }
 0x12c   :  { %v4774_v15 = vpop.eup %4773  ;;  %4777 = vrcp.f32 %v515_v4  ;;  %v5429_v40 = vadd.f32 %v5416_v56, %v5392_v55  ;;  %v429_v41 = vrot.slane %v428_v58, 2  ;;  %v5433_v43 = vadd.f32 %v5411_v60, %v242_v18  ;;  %v5445_v18 = vpop.permute.xlu2 %625 }
 0x12d   :  { %4779 = vpow2.f32 %v469_v17  ;;  %v611_v20 = vmul.f32 %v4774_v15, %v5343_v50  ;;  %v475_v22 = vmul.f32 1.442695, %v446_v63  ;;  %v321_v23 = vsel %vm145_vm2, %v5425_v38, -inf }
 0x12e   :  { %4781 = vpow2.f32 %v471_v13  ;;  %v328_v19 = vsel %vm145_vm2, %v5420_v7, -inf  ;;  %v517_v24 = vrot.slane %v5405_v30, 4  ;;  %v463_v55 = vmul.f32 1.442695, %v440_v28 }
 0x12f   :  { %4783 = vpow2.f32 %v473_v21  ;;  %v322_v25 = vrot.slane %v321_v23, 4  ;;  %v4776_v50 = vpop.eup %4775  ;;  %v5443_v26 = vmax.f32 %v423_v57, %v424_v11  ;;  %v329_v29 = vrot.slane %v328_v19, 4 }
 0x130   :  { %v377_v27 = vsel %vm145_vm2, %v5429_v40, -inf  ;;  %v384_v31 = vsel %vm145_vm2, %v5433_v43, -inf  ;;  %v524_v34 = vrot.slane %v5409_v0, 4  ;;  %v633_v35 = vmul.f32 %v5445_v18, %v611_v20 }
 0x131   :  { %v323_v12 = vmax.f32 %v321_v23, %v322_v25  ;;  %v378_v10 = vrot.slane %v377_v27, 4  ;;  %v5453_v39 = vmax.f32 %v428_v58, %v429_v41  ;;  %4785 = vpow2.f32 %v475_v22 }
 0x132   :  { %v4778_v28 = vpop.eup %4777  ;;  %v330_v42 = vmax.f32 %v328_v19, %v329_v29  ;;  %v385_v46 = vrot.slane %v384_v31, 4  ;;  %v612_v16 = vmul.f32 %v4776_v50, %v5346_v8  ;;  %4787 = vpow2.f32 %v463_v55  ;;  %v759_v50 = vld [vmem:[#allocation3] sm:$0x7f] }
 0x133   :  { %v5455_v51 = vpop.eup %4779  ;;  %v324_v52 = vrot.slane %v323_v12, 2  ;;  %v379_v53 = vmax.f32 %v377_v27, %v378_v10  ;;  %v447_v48 = vsub.f32 %v5379_v44, %v5443_v26  ;;  %v613_v57 = vmul.f32 %v4778_v28, %v5352_v14  ;;  %4617 = vmatpush.msk.msra.mxu1 %vm152_vm1, %v759_v50  ;;  %4695 = vmatpush.msk.msra.mxu3 %vm152_vm1, %v759_v50 }
 0x134   :  { %v5458_v47 = vpop.eup %4781  ;;  %v551_v49 = vsel %vm145_vm2, %v5455_v51, 0.0  ;;  %v331_v58 = vrot.slane %v330_v42, 2  ;;  %v661_v62 = vsel %vm145_vm2, %v633_v35, 0.0  ;;  %v386_v1 = vmax.f32 %v384_v31, %v385_v46 }
 0x135   :  { %v5465_v59 = vpop.eup %4783  ;;  %v552_v61 = vrot.slane %v551_v49, 4  ;;  %v325_v8 = vmax.f32 %v323_v12, %v324_v52  ;;  %v558_v2 = vsel %vm145_vm2, %v5458_v47, 0.0  ;;  %v380_v63 = vrot.slane %v379_v53, 2 }
 0x136   :  { %v332_v4 = vmax.f32 %v330_v42, %v331_v58  ;;  %v518_v17 = vadd.f32 %v517_v24, %v5405_v30  ;;  %v5473_v13 = vsel %vm145_vm2, %v5465_v59, 0.0  ;;  %v634_v14 = vmul.f32 %v5445_v18, %v612_v16 }
 0x137   :  { %v326_v21 = vrot.slane %v325_v8, 1  ;;  %v525_v15 = vadd.f32 %v524_v34, %v5409_v0  ;;  %v5477_v11 = vpop.eup %4785  ;;  %v635_v41 = vmul.f32 %v5445_v18, %v613_v57  ;;  %v662_v20 = vrot.slane %v661_v62, 4 }
 0x138   :  { %v333_v22 = vrot.slane %v332_v4, 1  ;;  %v381_v23 = vmax.f32 %v379_v53, %v380_v63  ;;  %v5480_v19 = vpop.eup %4787  ;;  %v5482_v55 = vadd.f32 %v552_v61, %v551_v49  ;;  %v559_v30 = vrot.slane %v558_v2, 4 }
 0x139   :  { %v327_v24 = vmax.f32 %v325_v8, %v326_v21  ;;  %v387_v25 = vrot.slane %v386_v1, 2  ;;  %v566_v29 = vrot.slane %v5473_v13, 4  ;;  %v519_v0 = vrot.slane %v518_v17, 2 }
 0x13a   :  { %v334_v27 = vmax.f32 %v332_v4, %v333_v22  ;;  %v382_v31 = vrot.slane %v381_v23, 1  ;;  %v5489_v34 = vsel %vm145_vm2, %v5477_v11, 0.0  ;;  %v526_v10 = vrot.slane %v525_v15, 2 }
 0x13b   :  { %v388_v35 = vmax.f32 %v386_v1, %v387_v25  ;;  %v433_v12 = vsub.f32 %v5425_v38, %v327_v24  ;;  %v520_v46 = vadd.f32 %v519_v0, %v518_v17  ;;  %v530_v16 = vsel %vm145_vm2, %v5480_v19, 0.0 }
 0x13c   :  { %v383_v28 = vmax.f32 %v381_v23, %v382_v31  ;;  %v434_v42 = vsub.f32 %v5420_v7, %v334_v27  ;;  %v527_v49 = vadd.f32 %v526_v10, %v525_v15  ;;  %v531_v57 = vrot.slane %v530_v16, 4 }
 0x13d   :  { %v389_v52 = vrot.slane %v388_v35, 1  ;;  %v449_v53 = vmul.f32 1.442695, %v433_v12  ;;  %v521_v8 = vrot.slane %v520_v46, 1  ;;  %v663_v4 = vadd.f32 %v662_v20, %v661_v62 }
 0x13e   :  { %v441_v58 = vsub.f32 %v5429_v40, %v383_v28  ;;  %v451_v61 = vmul.f32 1.442695, %v434_v42  ;;  %v528_v38 = vrot.slane %v527_v49, 1  ;;  %v532_v63 = vadd.f32 %v531_v57, %v530_v16 }
 0x13f   :  { %v390_v1 = vmax.f32 %v388_v35, %v389_v52  ;;  %4789 = vpow2.f32 %v449_v53  ;;  %v522_v7 = vadd.f32 %v521_v8, %v520_v46  ;;  %v664_v17 = vrot.slane %v663_v4, 2 }
 0x140   :  { %4791 = vpow2.f32 %v451_v61  ;;  %v465_v21 = vmul.f32 1.442695, %v441_v58  ;;  %v529_v23 = vadd.f32 %v528_v38, %v527_v49  ;;  %v533_v24 = vrot.slane %v532_v63, 2 }
 0x141   :  { %v442_v22 = vsub.f32 %v5433_v43, %v390_v1  ;;  %v668_v15 = vsel %vm145_vm2, %v634_v14, 0.0  ;;  %v5498_v25 = vadd.f32 %v559_v30, %v558_v2  ;;  %v675_v62 = vsel %vm145_vm2, %v635_v41, 0.0 }
 0x142   :  { %4793 = vpow2.f32 %v465_v21  ;;  %v669_v40 = vrot.slane %v668_v15, 4  ;;  %v534_v50 = vadd.f32 %v533_v24, %v532_v63  ;;  %v676_v27 = vrot.slane %v675_v62, 4 }
 0x143   :  { %v467_v20 = vmul.f32 1.442695, %v442_v22  ;;  %4795 = vrcp.f32 %v522_v7  ;;  %v554_v31 = vrot.slane %v5482_v55, 2  ;;  %v431_v43 = vrot.slane %v5453_v39, 1 }
 0x144   :  { %4797 = vrcp.f32 %v529_v23  ;;  %v670_v0 = vadd.f32 %v669_v40, %v668_v15  ;;  %v477_v2 = vmul.f32 1.442695, %v447_v48  ;;  %v535_v14 = vrot.slane %v534_v50, 1 }
 0x145   :  { %v5503_v35 = vpop.eup %4789  ;;  %4799 = vpow2.f32 %v467_v20  ;;  %v5508_v30 = vadd.f32 %v664_v17, %v663_v4  ;;  %v573_v12 = vrot.slane %v5489_v34, 4  ;;  %v677_v42 = vadd.f32 %v676_v27, %v675_v62 }
 0x146   :  { %v5510_v41 = vpop.eup %4791  ;;  %v481_v10 = vsel %vm145_vm2, %v5503_v35, 0.0  ;;  %v671_v28 = vrot.slane %v670_v0, 2  ;;  %v536_v52 = vadd.f32 %v535_v14, %v534_v50  ;;  %v5518_v44 = vmax.f32 %v5453_v39, %v431_v43 }
 0x147   :  { %v482_v46 = vrot.slane %v481_v10, 4  ;;  %v488_v16 = vsel %vm145_vm2, %v5510_v41, 0.0  ;;  %v5523_v48 = vadd.f32 %v554_v31, %v5482_v55  ;;  %v561_v53 = vrot.slane %v5498_v25, 2 }
 0x148   :  { %v5520_v26 = vpop.eup %4793  ;;  %v5529_v49 = vadd.f32 %v566_v29, %v5473_v13  ;;  %v489_v57 = vrot.slane %v488_v16, 4  ;;  %4801 = vrcp.f32 %v536_v52  ;;  %v666_v39 = vrot.slane %v5508_v30, 1 }
 0x149   :  { %v4796_v58 = vpop.eup %4795  ;;  %v483_v61 = vadd.f32 %v482_v46, %v481_v10  ;;  %v537_v8 = vsel %vm145_vm2, %v5520_v26, 0.0  ;;  %v678_v63 = vrot.slane %v677_v42, 2  ;;  %v672_v29 = vadd.f32 %v671_v28, %v670_v0 }
 0x14a   :  { %v4798_v4 = vpop.eup %4797  ;;  %v490_v1 = vadd.f32 %v489_v57, %v488_v16  ;;  %v538_v55 = vrot.slane %v537_v8, 4  ;;  %v614_v38 = vmul.f32 %v4796_v58, %v5390_v54  ;;  %v448_v17 = vsub.f32 %v5382_v45, %v5518_v44 }
 0x14b   :  { %v5535_v21 = vpop.eup %4799  ;;  %v484_v7 = vrot.slane %v483_v61, 2  ;;  %v615_v13 = vmul.f32 %v4798_v4, %v5400_v9  ;;  %4803 = vpow2.f32 %v477_v2  ;;  %v679_v27 = vadd.f32 %v678_v63, %v677_v42 }
 0x14c   :  { %v491_v22 = vrot.slane %v490_v1, 2  ;;  %v539_v23 = vadd.f32 %v538_v55, %v537_v8  ;;  %v544_v24 = vsel %vm145_vm2, %v5535_v21, 0.0  ;;  %v636_v15 = vmul.f32 %v5445_v18, %v614_v38 }
 0x14d   :  { %v485_v40 = vadd.f32 %v484_v7, %v483_v61  ;;  %v545_v62 = vrot.slane %v544_v24, 4  ;;  %v637_v54 = vmul.f32 %v5445_v18, %v615_v13  ;;  %v673_v57 = vrot.slane %v672_v29, 1 }
 0x14e   :  { %v492_v20 = vadd.f32 %v491_v22, %v490_v1  ;;  %v540_v50 = vrot.slane %v539_v23, 2  ;;  %v682_v9 = vsel %vm145_vm2, %v636_v15, 0.0  ;;  %v4802_v31 = vpop.eup %4801  ;;  %v680_v55 = vrot.slane %v679_v27, 1 }
 0x14f   :  { %v486_v0 = vrot.slane %v485_v40, 1  ;;  %v546_v45 = vadd.f32 %v545_v62, %v544_v24  ;;  %v683_v43 = vrot.slane %v682_v9, 4  ;;  %v689_v14 = vsel %vm145_vm2, %v637_v54, 0.0 }
 0x150   :  { %v493_v10 = vrot.slane %v492_v20, 1  ;;  %v541_v28 = vadd.f32 %v540_v50, %v539_v23  ;;  %v616_v46 = vmul.f32 %v4802_v31, %v5480_v19  ;;  %v690_v16 = vrot.slane %v689_v14, 4 }
 0x151   :  { %v487_v52 = vadd.f32 %v486_v0, %v485_v40  ;;  %v547_v44 = vrot.slane %v546_v45, 2  ;;  %v684_v2 = vadd.f32 %v683_v43, %v682_v9  ;;  %v5548_v4 = vpop.eup %4803  ;;  %v574_v24 = vadd.f32 %v573_v12, %v5489_v34 }
 0x152   :  { %v494_v58 = vadd.f32 %v493_v10, %v492_v20  ;;  %v542_v61 = vrot.slane %v541_v28, 1  ;;  %v638_v42 = vmul.f32 %v5445_v18, %v616_v46  ;;  %v691_v8 = vadd.f32 %v690_v16, %v689_v14 }
 0x153   :  { %v548_v1 = vadd.f32 %v547_v44, %v546_v45  ;;  %4805 = vrcp.f32 %v487_v52  ;;  %v685_v38 = vrot.slane %v684_v2, 2  ;;  %v5555_v15 = vadd.f32 %v666_v39, %v5508_v30 }
 0x154   :  { %v543_v63 = vadd.f32 %v542_v61, %v541_v28  ;;  %4807 = vrcp.f32 %v494_v58  ;;  %v692_v7 = vrot.slane %v691_v8, 2  ;;  %v696_v19 = vsel %vm145_vm2, %v638_v42, 0.0 }
 0x155   :  { %v549_v13 = vrot.slane %v548_v1, 1  ;;  %v686_v22 = vadd.f32 %v685_v38, %v684_v2  ;;  %v697_v23 = vrot.slane %v696_v19, 4  ;;  %v5557_v40 = vadd.f32 %v673_v57, %v672_v29 }
 0x156   :  { %4809 = vrcp.f32 %v543_v63  ;;  %v693_v62 = vadd.f32 %v692_v7, %v691_v8  ;;  %v5559_v20 = vadd.f32 %v680_v55, %v679_v27  ;;  %v479_v0 = vmul.f32 1.442695, %v448_v17 }
 0x157   :  { %v550_v54 = vadd.f32 %v549_v13, %v548_v1  ;;  %v687_v50 = vrot.slane %v686_v22, 1  ;;  %v698_v9 = vadd.f32 %v697_v23, %v696_v19  ;;  %v556_v45 = vrot.slane %v5523_v48, 1 }
 0x158   :  { %v694_v31 = vrot.slane %v693_v62, 1  ;;  %v562_v34 = vadd.f32 %v561_v53, %v5498_v25  ;;  %v568_v29 = vrot.slane %v5529_v49, 2  ;;  %v575_v52 = vrot.slane %v574_v24, 2 }
 0x159   :  { %v4806_v12 = vpop.eup %4805  ;;  %4811 = vrcp.f32 %v550_v54  ;;  %v5565_v30 = vadd.f32 %v687_v50, %v686_v22  ;;  %v699_v39 = vrot.slane %v698_v9, 2  ;;  %v557_v17 = vadd.f32 %v556_v45, %v5523_v48 }
 0x15a   :  { %v4808_v43 = vpop.eup %4807  ;;  %v609_v27 = vmul.f32 %v4806_v12, %v5503_v35  ;;  %v5569_v14 = vadd.f32 %v694_v31, %v693_v62  ;;  %4813 = vpow2.f32 %v479_v0  ;;  %v563_v46 = vrot.slane %v562_v34, 1 }
 0x15b   :  { %v610_v10 = vmul.f32 %v4808_v43, %v5510_v41  ;;  %v700_v28 = vadd.f32 %v699_v39, %v698_v9  ;;  %v569_v25 = vadd.f32 %v568_v29, %v5529_v49  ;;  %v579_v44 = vsel %vm145_vm2, %v5548_v4, 0.0 }
 0x15c   :  { %v4810_v53 = vpop.eup %4809  ;;  %v631_v16 = vmul.f32 %v5445_v18, %v609_v27  ;;  %4815 = vrcp.f32 %v557_v17  ;;  %v564_v2 = vadd.f32 %v563_v46, %v562_v34  ;;  %v576_v41 = vadd.f32 %v575_v52, %v574_v24  ;;  %v5588_v24 = vpop.permute.xlu1 %627 }
 0x15d   :  { %v632_v35 = vmul.f32 %v5445_v18, %v610_v10  ;;  %v701_v57 = vrot.slane %v700_v28, 1  ;;  %v570_v58 = vrot.slane %v569_v25, 1  ;;  %v580_v61 = vrot.slane %v579_v44, 4 }
 0x15e   :  { %v647_v48 = vsel %vm145_vm2, %v631_v16, 0.0  ;;  %v617_v42 = vmul.f32 %v4810_v53, %v5520_v26  ;;  %v577_v18 = vrot.slane %v576_v41, 1  ;;  %4817 = vrcp.f32 %v564_v2 }
 0x15f   :  { %v4812_v49 = vpop.eup %4811  ;;  %v648_v8 = vrot.slane %v647_v48, 4  ;;  %v654_v1 = vsel %vm145_vm2, %v632_v35, 0.0  ;;  %v5581_v55 = vadd.f32 %v701_v57, %v700_v28  ;;  %v571_v38 = vadd.f32 %v570_v58, %v569_v25 }
 0x160   :  { %v5583_v63 = vpop.eup %4813  ;;  %v655_v7 = vrot.slane %v654_v1, 4  ;;  %v581_v19 = vadd.f32 %v580_v61, %v579_v44  ;;  %v618_v26 = vmul.f32 %v4812_v49, %v5535_v21  ;;  %v578_v54 = vadd.f32 %v577_v18, %v576_v41 }
 0x161   :  { %v649_v13 = vadd.f32 %v648_v8, %v647_v48  ;;  %v586_v22 = vsel %vm145_vm2, %v5583_v63, 0.0  ;;  %4819 = vrcp.f32 %v571_v38  ;;  %v639_v45 = vmul.f32 %v5588_v24, %v617_v42 }
 0x162   :  { %v4816_v23 = vpop.eup %4815  ;;  %v656_v62 = vadd.f32 %v655_v7, %v654_v1  ;;  %v582_v50 = vrot.slane %v581_v19, 2  ;;  %v587_v9 = vrot.slane %v586_v22, 4  ;;  %v640_v34 = vmul.f32 %v5588_v24, %v618_v26 }
 0x163   :  { %v650_v31 = vrot.slane %v649_v13, 2  ;;  %v619_v0 = vmul.f32 %v4816_v23, %v5455_v51  ;;  %4821 = vrcp.f32 %v578_v54  ;;  %v703_v27 = vsel %vm145_vm2, %v639_v45, 0.0 }
 0x164   :  { %v657_v12 = vrot.slane %v656_v62, 2  ;;  %v583_v39 = vadd.f32 %v582_v50, %v581_v19  ;;  %v588_v21 = vadd.f32 %v587_v9, %v586_v22  ;;  %v710_v17 = vsel %vm145_vm2, %v640_v34, 0.0  ;;  %v4818_v10 = vpop.eup %4817 }
 0x165   :  { %v651_v29 = vadd.f32 %v650_v31, %v649_v13  ;;  %v641_v43 = vmul.f32 %v5588_v24, %v619_v0  ;;  %v704_v25 = vrot.slane %v703_v27, 4  ;;  %v620_v52 = vmul.f32 %v4818_v10, %v5458_v47 }
 0x166   :  { %v658_v28 = vadd.f32 %v657_v12, %v656_v62  ;;  %v584_v51 = vrot.slane %v583_v39, 1  ;;  %v589_v46 = vrot.slane %v588_v21, 2  ;;  %v711_v44 = vrot.slane %v710_v17, 4 }
 0x167   :  { %v4820_v53 = vpop.eup %4819  ;;  %v652_v16 = vrot.slane %v651_v29, 1  ;;  %v717_v35 = vsel %vm145_vm2, %v641_v43, 0.0  ;;  %v642_v61 = vmul.f32 %v5588_v24, %v620_v52  ;;  %v705_v42 = vadd.f32 %v704_v25, %v703_v27 }
 0x168   :  { %v659_v57 = vrot.slane %v658_v28, 1  ;;  %v585_v2 = vadd.f32 %v584_v51, %v583_v39  ;;  %v590_v58 = vadd.f32 %v589_v46, %v588_v21  ;;  %v621_v48 = vmul.f32 %v4820_v53, %v5465_v59 }
 0x169   :  { %v653_v41 = vadd.f32 %v652_v16, %v651_v29  ;;  %v712_v49 = vadd.f32 %v711_v44, %v710_v17  ;;  %v4822_v8 = vpop.eup %4821  ;;  %v706_v18 = vrot.slane %v705_v42, 2  ;;  %v718_v13 = vrot.slane %v717_v35, 4 }
 0x16a   :  { %v660_v1 = vadd.f32 %v659_v57, %v658_v28  ;;  %v591_v38 = vrot.slane %v590_v58, 1  ;;  %4823 = vrcp.f32 %v585_v2  ;;  %v643_v7 = vmul.f32 %v5588_v24, %v621_v48 }
 0x16b   :  { %v622_v47 = vmul.f32 %v4822_v8, %v5477_v11  ;;  %v713_v19 = vrot.slane %v712_v49, 2  ;;  %v724_v59 = vsel %vm145_vm2, %v642_v61, 0.0  ;;  %v707_v50 = vadd.f32 %v706_v18, %v705_v42 }
 0x16c   :  { %v781_v22 = vsel %vm780_vm3, %v660_v1, %v653_v41  ;;  %v592_v26 = vadd.f32 %v591_v38, %v590_v58  ;;  %v731_v23 = vsel %vm145_vm2, %v643_v7, 0.0  ;;  %v719_v31 = vadd.f32 %v718_v13, %v717_v35 }
 0x16d   :  { %v783_v62 = vsel %vm782_vm4, %v5555_v15, %v781_v22  ;;  %v644_v54 = vmul.f32 %v5588_v24, %v622_v47  ;;  %v714_v9 = vadd.f32 %v713_v19, %v712_v49  ;;  %v725_v0 = vrot.slane %v724_v59, 4 }
 0x16e   :  { %v785_v11 = vsel %vm784_vm5, %v5557_v40, %v783_v62  ;;  %4825 = vrcp.f32 %v592_v26  ;;  %v708_v34 = vrot.slane %v707_v50, 1  ;;  %v732_v39 = vrot.slane %v731_v23, 4 }
 0x16f   :  { %v787_v45 = vsel %vm786_vm6, %v5559_v20, %v785_v11  ;;  %v715_v12 = vrot.slane %v714_v9, 1  ;;  %v720_v29 = vrot.slane %v719_v31, 2  ;;  %v726_v43 = vadd.f32 %v725_v0, %v724_v59 }
 0x170   :  { %v4824_v21 = vpop.eup %4823  ;;  %v789_v15 = vsel %vm788_vm7, %v5565_v30, %v787_v45  ;;  %v738_v27 = vsel %vm145_vm2, %v644_v54, 0.0  ;;  %v709_v10 = vadd.f32 %v708_v34, %v707_v50  ;;  %v733_v25 = vadd.f32 %v732_v39, %v731_v23 }
 0x171   :  { %v791_v40 = vsel %vm790_vm8, %v5569_v14, %v789_v15  ;;  %v623_v17 = vmul.f32 %v4824_v21, %v5548_v4  ;;  %v716_v28 = vadd.f32 %v715_v12, %v714_v9  ;;  %v721_v51 = vadd.f32 %v720_v29, %v719_v31  ;;  %v4741_v12 = vld [vmem:[%s6590_s4] ss:$0 sm:$0xff] }
 0x172   :  { %v793_v20 = vsel %vm792_vm9, %v5581_v55, %v791_v40  ;;  %v727_v46 = vrot.slane %v726_v43, 2  ;;  %v739_v53 = vrot.slane %v738_v27, 4  ;;  %v734_v35 = vrot.slane %v733_v25, 2  ;;  %v4981_v15 = vld [vmem:[%s6586_s0] sm:$0xff] }
 0x173   :  { %4618 = vmatmul.msk.f32.vlgmr.msra.gmra.mxu1 %vm145_vm2, %v793_v20  ;;  %v645_v30 = vmul.f32 %v5588_v24, %v623_v17  ;;  %v722_v52 = vrot.slane %v721_v51, 1  ;;  %v794_v2 = vsel %vm780_vm3, %v716_v28, %v709_v10  ;;  %v4982_v17 = vld [vmem:[%s6586_s0 + $0x8] sm:$0xff]  ;;  %v5150_v20 = vmov 7.0  }
 0x174   :  { %v4826_v16 = vpop.eup %4825  ;;  %v728_v44 = vadd.f32 %v727_v46, %v726_v43  ;;  %v740_v4 = vadd.f32 %v739_v53, %v738_v27  ;;  %v735_v48 = vadd.f32 %v734_v35, %v733_v25  ;;  %4827 = vrcp.f32 %v5150_v20 }
 0x175   :  { %v624_v14 = vmul.f32 %v4826_v16, %v5583_v63  ;;  %v745_v57 = vsel %vm145_vm2, %v645_v30, 0.0  ;;  %v723_v55 = vadd.f32 %v722_v52, %v721_v51 }
 0x176   :  { %v729_v58 = vrot.slane %v728_v44, 1  ;;  %v746_v41 = vrot.slane %v745_v57, 4  ;;  %v741_v42 = vrot.slane %v740_v4, 2  ;;  %v736_v8 = vrot.slane %v735_v48, 1 }
 0x177   :  { %v646_v61 = vmul.f32 %v5588_v24, %v624_v14  ;;  %v795_v38 = vsel %vm782_vm4, %v723_v55, %v794_v2 }
 0x178   :  { %v730_v49 = vadd.f32 %v729_v58, %v728_v44  ;;  %v747_v1 = vadd.f32 %v746_v41, %v745_v57  ;;  %v742_v7 = vadd.f32 %v741_v42, %v740_v4  ;;  %v737_v13 = vadd.f32 %v736_v8, %v735_v48 }
 0x179   :  { %v752_v63 = vsel %vm145_vm2, %v646_v61, 0.0 }
 0x17a   :  { %v748_v47 = vrot.slane %v747_v1, 2  ;;  %v753_v18 = vrot.slane %v752_v63, 4  ;;  %v796_v19 = vsel %vm784_vm5, %v730_v49, %v795_v38  ;;  %v743_v22 = vrot.slane %v742_v7, 1  ;;  %v4828_v51 = vpop.eup %4827  ;;  %v898_v38 = vld [vmem:[#allocation6 + $0x8] sm:$0xff] }
 0x17b   :  { %v797_v23 = vsel %vm786_vm6, %v737_v13, %v796_v19  ;;  %v842_v46 = vmul.f32 7.0, %v4828_v51  ;;  %vm846_vm10 = vweird.f32 %v4828_v51  ;;  %v951_v19 = vunpack.c.l.b16 %v898_v38 }
 0x17c   :  { %v749_v26 = vadd.f32 %v748_v47, %v747_v1  ;;  %v754_v59 = vadd.f32 %v753_v18, %v752_v63  ;;  %v744_v24 = vadd.f32 %v743_v22, %v742_v7  ;;  %v897_v1 = vld [vmem:[#allocation6] sm:$0xff]  ;;  %v5151_v63 = vmov 65535  }
 0x17d   :  { %v843_v25 = vsub.f32 1.0, %v842_v46  ;;  %v949_v7 = vunpack.c.l.b16 %v897_v1  ;;  %v986_v47 = vsel %vm984_vm11, 4294967295, %v5151_v63  ;;  %v950_v18 = vunpack.c.h.b16 %v897_v1 }
 0x17e   :  { %v750_v62 = vrot.slane %v749_v26, 1  ;;  %v755_v54 = vrot.slane %v754_v59, 2  ;;  %v798_v9 = vsel %vm788_vm7, %v744_v24, %v797_v23  ;;  %v5663_v13 = vsel %vm985_vm12, %v986_v47, 0 }
 0x17f   :  { %v844_v30 = vmul.f32 %v4828_v51, %v843_v25  ;;  %v952_v22 = vunpack.c.h.b16 %v898_v38  ;;  %v965_v23 = vpack.c.b16 %v949_v7, %v949_v7  ;;  %v966_v24 = vpack.c.b16 %v950_v18, %v950_v18 }
 0x180   :  { %v756_v50 = vadd.f32 %v755_v54, %v754_v59  ;;  %v751_v11 = vadd.f32 %v750_v62, %v749_v26  ;;  %v967_v62 = vpack.c.b16 %v951_v19, %v951_v19  ;;  %v899_v54 = vld [vmem:[#allocation6 + $0x10] sm:$0xff] }
 0x181   :  { %v845_v53 = vadd.f32 %v4828_v51, %v844_v30 }
 0x182   :  { %v757_v31 = vrot.slane %v756_v50, 1  ;;  %v799_v0 = vsel %vm790_vm8, %v751_v11, %v798_v9  ;;  %v968_v11 = vpack.c.b16 %v952_v22, %v952_v22 }
 0x183   :  { %v5645_v16 = vsel %vm846_vm10, %v4828_v51, %v845_v53 }
 0x184   :  { %v758_v45 = vadd.f32 %v757_v31, %v756_v50  ;;  %v900_v50 = vld [vmem:[#allocation6 + $0x18] sm:$0xff]  ;;  %v953_v31 = vunpack.c.l.b16 %v899_v54 }
 0x186   :  { %v800_v34 = vsel %vm792_vm9, %v758_v45, %v799_v0  ;;  %v989_v0 = vand.u32 %v5663_v13, %v965_v23  ;;  %v992_v45 = vand.u32 %v5663_v13, %v966_v24 }
 0x187   :  { %4619 = vmatmul.msk.f32.vlgmr.msra.gmra.mxu3 %vm145_vm2, %v800_v34  ;;  %v995_v34 = vand.u32 %v5663_v13, %v967_v62 }
 0x188   :  { %1043 = vmatpush.bf16.msrb.mxu2 %v989_v0  ;;  %1057 = vmatpush.bf16.msrb.mxu3 %v992_v45 }
 0x189   :  { %1071 = vmatpush.bf16.msrb.mxu0 %v995_v34 }
 0x1f0   :  { %v825_v39 = vpop.f32.mrf.mxu1 }
 0x1f1   :  { %v826_v21 = vadd.f32 %v4741_v12, %v825_v39 }
 0x1f3   :  { %v831_v29 = vadd.f32 %v4981_v15, %v826_v21  ;;  %v998_v21 = vand.u32 %v5663_v13, %v968_v11  ;;  %v969_v15 = vpack.c.b16 %v953_v31, %v953_v31  ;;  %v904_v11 = vld [vmem:[#allocation6 + $0x38] sm:$0xff] }
 0x1f4   :  { %v963_v45 = vunpack.c.l.b16 %v904_v11  ;;  %v964_v34 = vunpack.c.h.b16 %v904_v11 }
 0x1f5   :  { %v835_v43 = vsel %vm145_vm2, %v831_v29, 0.0  ;;  %1085 = vmatpush.bf16.msrb.mxu1 %v998_v21 }
 0x1f6   :  { %836 = vadd.xlane.f32.xlu0 %v835_v43  ;;  %v979_v21 = vpack.c.b16 %v963_v45, %v963_v45 }
 0x20a   :  { %v828_v27 = vpop.f32.mrf.mxu3 }
 0x20b   :  { %v829_v40 = vadd.f32 %v4741_v12, %v828_v27  ;;  %v954_v12 = vunpack.c.h.b16 %v899_v54 }
 0x20d   :  { %v832_v10 = vadd.f32 %v4982_v17, %v829_v40  ;;  %v970_v27 = vpack.c.b16 %v954_v12, %v954_v12  ;;  %v956_v40 = vunpack.c.h.b16 %v900_v50  ;;  %v1001_v17 = vand.u32 %v5663_v13, %v969_v15 }
 0x20e   :  { %v980_v15 = vpack.c.b16 %v964_v34, %v964_v34 }
 0x20f   :  { %v838_v28 = vsel %vm145_vm2, %v832_v10, 0.0  ;;  %v972_v20 = vpack.c.b16 %v956_v40, %v956_v40  ;;  %1099 = vmatpush.bf16.msra.mxu2 %v1001_v17  ;;  %v1308_v17 = vld [vmem:[#allocation9] sm:$0xff] }
 0x210   :  { %839 = vadd.xlane.f32.xlu1 %v838_v28  ;;  %v1004_v28 = vand.u32 %v5663_v13, %v970_v27  ;;  %v1031_v27 = vand.u32 %v5663_v13, %v979_v21  ;;  %v1034_v40 = vand.u32 %v5663_v13, %v980_v15 }
 0x211   :  { %v1010_v25 = vand.u32 %v5663_v13, %v972_v20  ;;  %v1329_v20 = vunpack.c.h.b16 %v1308_v17 }
 0x212   :  { %1113 = vmatpush.bf16.msra.mxu3 %v1004_v28 }
 0x213   :  { %1141 = vmatpush.bf16.msra.mxu1 %v1010_v25 }
 0x269   :  { %v837_v52 = vpop.xlane.xlu0 %836 }
 0x26a   :  { %v848_v44 = vmul.f32 %v5645_v16, %v837_v52 }
 0x26c   :  { %v5648_v35 = vsub.f32 %v831_v29, %v848_v44  ;;  %v955_v29 = vunpack.c.l.b16 %v900_v50 }
 0x26e   :  { %v852_v14 = vmul.f32 %v5648_v35, %v5648_v35 }
 0x270   :  { %v854_v4 = vsel %vm145_vm2, %v852_v14, 0.0 }
 0x271   :  { %855 = vadd.xlane.f32.xlu2 %v854_v4 }
 0x283   :  { %v840_v57 = vpop.xlane.xlu1 %839 }
 0x284   :  { %v849_v2 = vmul.f32 %v5645_v16, %v840_v57 }
 0x286   :  { %v5654_v55 = vsub.f32 %v832_v10, %v849_v2  ;;  %v971_v10 = vpack.c.b16 %v955_v29, %v955_v29  ;;  %v901_v2 = vld [vmem:[#allocation6 + $0x20] sm:$0xff] }
 0x288   :  { %v853_v58 = vmul.f32 %v5654_v55, %v5654_v55  ;;  %v1007_v51 = vand.u32 %v5663_v13, %v971_v10  ;;  %v1328_v10 = vunpack.c.l.b16 %v1308_v17 }
 0x28a   :  { %v857_v48 = vsel %vm145_vm2, %v853_v58, 0.0  ;;  %1127 = vmatpush.bf16.msra.mxu0 %v1007_v51  ;;  %v4742_v58 = vld [vmem:[%s6591_s5] ss:$0 sm:$0xff]  ;;  %v1344_v28 = vpack.c.b16 %v1328_v10, %v1328_v10  ;;  %v1345_v51 = vpack.c.b16 %v1329_v20, %v1329_v20 }
 0x28b   :  { %858 = vadd.xlane.f32.xlu2 %v857_v48 }
 0x2e4   :  { %v856_v41 = vpop.xlane.xlu2 %855 }
 0x2e5   :  { %v860_v61 = vmul.f32 %v856_v41, %v5645_v16  ;;  %v902_v41 = vld [vmem:[#allocation6 + $0x28] sm:$0xff] }
 0x2e6   :  { %v959_v38 = vunpack.c.l.b16 %v902_v41  ;;  %v960_v7 = vunpack.c.h.b16 %v902_v41 }
 0x2e7   :  { %v862_v42 = vadd.f32 1e-05, %v860_v61 }
 0x2e9   :  { %4829 = vrsqrt.f32 %v862_v42  ;;  %vm870_vm14 = vweird.f32 %v862_v42 }
 0x2ef   :  { %v5660_v49 = vpop.eup %4829 }
 0x2f0   :  { %v865_v8 = vmul.f32 %v5660_v49, %v862_v42  ;;  %vm871_vm13 = vweird.f32 %v5660_v49  ;;  %v958_v42 = vunpack.c.h.b16 %v901_v2 }
 0x2f1   :  { %vm872_vm15 = vmor %vm870_vm14, %vm871_vm13 }
 0x2f2   :  { %v866_v26 = vmul.f32 %v5660_v49, %v865_v8  ;;  %v957_v8 = vunpack.c.l.b16 %v901_v2  ;;  %v974_v22 = vpack.c.b16 %v958_v42, %v958_v42 }
 0x2f4   :  { %v867_v43 = vmul.f32 0.5, %v866_v26  ;;  %v973_v19 = vpack.c.b16 %v957_v8, %v957_v8  ;;  %v976_v26 = vpack.c.b16 %v960_v7, %v960_v7  ;;  %v1016_v54 = vand.u32 %v5663_v13, %v974_v22 }
 0x2f6   :  { %v868_v46 = vsub.f32 1.5, %v867_v43  ;;  %v1013_v62 = vand.u32 %v5663_v13, %v973_v19 }
 0x2f8   :  { %v869_v53 = vmul.f32 %v5660_v49, %v868_v46  ;;  %v1309_v46 = vld [vmem:[#allocation9 + $0x8] sm:$0xff] }
 0x2f9   :  { %v1330_v25 = vunpack.c.l.b16 %v1309_v46 }
 0x2fa   :  { %v873_v14 = vsel %vm872_vm15, %v5660_v49, %v869_v53  ;;  %v4743_v49 = vld [vmem:[%s6592_s6] ss:$0 sm:$0xff] }
 0x2fb   :  { %v884_v48 = vmul.f32 %v873_v14, %v5648_v35  ;;  %v975_v35 = vpack.c.b16 %v959_v38, %v959_v38  ;;  %v1346_v53 = vpack.c.b16 %v1330_v25, %v1330_v25 }
 0x2fd   :  { %v889_v63 = vmul.f32 %v4742_v58, %v884_v48  ;;  %v1019_v50 = vand.u32 %v5663_v13, %v975_v35 }
 0x2fe   :  { %v859_v59 = vpop.xlane.xlu2 %858 }
 0x2ff   :  { %v861_v9 = vmul.f32 %v859_v59, %v5645_v16  ;;  %v5686_v59 = vadd.f32 %v4743_v49, %v889_v63 }
 0x301   :  { %v863_v39 = vadd.f32 1e-05, %v861_v9  ;;  %v903_v9 = vld [vmem:[#allocation6 + $0x30] sm:$0xff] }
 0x302   :  { %v961_v31 = vunpack.c.l.b16 %v903_v9  ;;  %v962_v0 = vunpack.c.h.b16 %v903_v9  ;;  %v1312_v9 = vld [vmem:[#allocation9 + $0x20] sm:$0xff] }
 0x303   :  { %4831 = vrsqrt.f32 %v863_v39  ;;  %vm880_vm10 = vweird.f32 %v863_v39  ;;  %v1336_v15 = vunpack.c.l.b16 %v1312_v9 }
 0x304   :  { %v977_v12 = vpack.c.b16 %v961_v31, %v961_v31 }
 0x306   :  { %v1025_v29 = vand.u32 %v5663_v13, %v977_v12 }
 0x309   :  { %v4832_v30 = vpop.eup %4831 }
 0x30a   :  { %v875_v52 = vmul.f32 %v4832_v30, %v863_v39  ;;  %vm881_vm0 = vweird.f32 %v4832_v30  ;;  %v978_v39 = vpack.c.b16 %v962_v0, %v962_v0 }
 0x30b   :  { %vm882_vm11 = vmor %vm880_vm10, %vm881_vm0 }
 0x30c   :  { %v876_v44 = vmul.f32 %v4832_v30, %v875_v52  ;;  %v1028_v43 = vand.u32 %v5663_v13, %v978_v39 }
 0x30e   :  { %v877_v4 = vmul.f32 0.5, %v876_v44  ;;  %v1310_v44 = vld [vmem:[#allocation9 + $0x10] sm:$0xff] }
 0x30f   :  { %v1332_v14 = vunpack.c.l.b16 %v1310_v44 }
 0x310   :  { %v878_v57 = vsub.f32 1.5, %v877_v4 }
 0x311   :  { %v1348_v4 = vpack.c.b16 %v1332_v14, %v1332_v14 }
 0x312   :  { %v879_v61 = vmul.f32 %v4832_v30, %v878_v57  ;;  %v1333_v57 = vunpack.c.h.b16 %v1310_v44  ;;  %v1352_v44 = vpack.c.b16 %v1336_v15, %v1336_v15 }
 0x314   :  { %v883_v1 = vsel %vm882_vm11, %v4832_v30, %v879_v61  ;;  %v1331_v30 = vunpack.c.h.b16 %v1309_v46  ;;  %v1349_v2 = vpack.c.b16 %v1333_v57, %v1333_v57  ;;  %v5716_v61 = vld [vmem:[#allocation8] sm:$0xff] }
 0x315   :  { %v885_v47 = vmul.f32 %v883_v1, %v5654_v55  ;;  %v1022_v55 = vand.u32 %v5663_v13, %v976_v26  ;;  %v911_v7 = vperm.slane %v5716_v61, 2  ;;  %v909_v22 = vperm.slane %v5716_v61, 0 }
 0x316   :  { %v1347_v52 = vpack.c.b16 %v1331_v30, %v1331_v30  ;;  %v910_v35 = vperm.slane %v5716_v61, 1 }
 0x317   :  { %v890_v18 = vmul.f32 %v4742_v58, %v885_v47  ;;  %v1311_v58 = vld [vmem:[#allocation9 + $0x18] sm:$0xff] }
 0x318   :  { %v1334_v48 = vunpack.c.l.b16 %v1311_v58  ;;  %v1335_v41 = vunpack.c.h.b16 %v1311_v58  ;;  %v916_v58 = vperm.slane %v5716_v61, 7 }
 0x319   :  { %v5688_v23 = vadd.f32 %v4743_v49, %v890_v18  ;;  %v912_v49 = vperm.slane %v5716_v61, 3 }
 0x31a   :  { %v1350_v1 = vpack.c.b16 %v1334_v48, %v1334_v48  ;;  %v1351_v38 = vpack.c.b16 %v1335_v41, %v1335_v41 }
 0x31b   :  { %v896_v24 = vpack.c.bf16 %v5688_v23, %v5686_v59 }
 0x31d   :  { %4620 = vmatmul.msk.bf16.vlgmr.msrb.gmra.mxu2 %vm145_vm2, %v896_v24  ;;  %4621 = vmatmul.msk.bf16.vlgmr.msrb.gmra.mxu3 %vm145_vm2, %v896_v24 }
 0x31e   :  { %4622 = vmatmul.msk.bf16.vlgmr.msrb.gmra.mxu0 %vm145_vm2, %v896_v24  ;;  %4623 = vmatmul.msk.bf16.vlgmr.msrb.gmra.mxu1 %vm145_vm2, %v896_v24 }
 0x31f   :  { %1155 = vmatpush.bf16.msrb.mxu2 %v1013_v62  ;;  %1169 = vmatpush.bf16.msrb.mxu3 %v1016_v54 }
 0x320   :  { %1183 = vmatpush.bf16.msrb.mxu0 %v1019_v50  ;;  %1197 = vmatpush.bf16.msrb.mxu1 %v1022_v55 }
 0x32d   :  { %4624 = vmatmul.msk.bf16.vlgmr.msra.gmra.mxu2 %vm145_vm2, %v896_v24  ;;  %4625 = vmatmul.msk.bf16.vlgmr.msra.gmra.mxu3 %vm145_vm2, %v896_v24 }
 0x32e   :  { %4626 = vmatmul.msk.bf16.vlgmr.msra.gmra.mxu0 %vm145_vm2, %v896_v24  ;;  %4627 = vmatmul.msk.bf16.vlgmr.msra.gmra.mxu1 %vm145_vm2, %v896_v24 }
 0x32f   :  { %1211 = vmatpush.bf16.msra.mxu2 %v1025_v29  ;;  %1225 = vmatpush.bf16.msra.mxu3 %v1028_v43  ;;  %v1337_v29 = vunpack.c.h.b16 %v1312_v9  ;;  %v1313_v43 = vld [vmem:[#allocation9 + $0x28] sm:$0xff] }
 0x330   :  { %1239 = vmatpush.bf16.msra.mxu0 %v1031_v27  ;;  %1253 = vmatpush.bf16.msra.mxu1 %v1034_v40  ;;  %v1338_v17 = vunpack.c.l.b16 %v1313_v43  ;;  %v1339_v10 = vunpack.c.h.b16 %v1313_v43  ;;  %v5726_v43 = vld [vmem:[#allocation8 + $0x8] sm:$0xff] }
 0x331   :  { %v1353_v14 = vpack.c.b16 %v1337_v29, %v1337_v29 }
 0x33d   :  { %4628 = vmatmul.msk.bf16.vlgmr.msrb.gmra.mxu2 %vm145_vm2, %v896_v24  ;;  %4629 = vmatmul.msk.bf16.vlgmr.msrb.gmra.mxu3 %vm145_vm2, %v896_v24 }
 0x33e   :  { %4630 = vmatmul.msk.bf16.vlgmr.msrb.gmra.mxu0 %vm145_vm2, %v896_v24  ;;  %4631 = vmatmul.msk.bf16.vlgmr.msrb.gmra.mxu1 %vm145_vm2, %v896_v24 }
 0x33f   :  { %1383 = vmatpush.bf16.xpose.msrb.mxu2 %v1344_v28  ;;  %1397 = vmatpush.bf16.xpose.msrb.mxu3 %v1345_v51 }
 0x340   :  { %1411 = vmatpush.bf16.xpose.msrb.mxu0 %v1346_v53  ;;  %1425 = vmatpush.bf16.xpose.msrb.mxu1 %v1347_v52  ;;  %v1354_v53 = vpack.c.b16 %v1338_v17, %v1338_v17  ;;  %v1355_v52 = vpack.c.b16 %v1339_v10, %v1339_v10 }
 0x34d   :  { %4632 = vmatmul.msk.bf16.vlgmr.msra.gmra.mxu2 %vm145_vm2, %v896_v24  ;;  %4633 = vmatmul.msk.bf16.vlgmr.msra.gmra.mxu3 %vm145_vm2, %v896_v24 }
 0x34e   :  { %4634 = vmatmul.msk.bf16.vlgmr.msra.gmra.mxu0 %vm145_vm2, %v896_v24  ;;  %4635 = vmatmul.msk.bf16.vlgmr.msra.gmra.mxu1 %vm145_vm2, %v896_v24 }
 0x34f   :  { %1439 = vmatpush.bf16.xpose.msra.mxu2 %v1348_v4  ;;  %1453 = vmatpush.bf16.xpose.msra.mxu3 %v1349_v2  ;;  %v915_v2 = vperm.slane %v5716_v61, 6 }
 0x350   :  { %1467 = vmatpush.bf16.xpose.msra.mxu0 %v1350_v1  ;;  %1481 = vmatpush.bf16.xpose.msra.mxu1 %v1351_v38  ;;  %v913_v1 = vperm.slane %v5716_v61, 4  ;;  %v914_v38 = vperm.slane %v5716_v61, 5 }
 0x39b   :  { %v1073_v8 = vpop.f32.mrf.mxu0  ;;  %v1087_v42 = vpop.f32.mrf.mxu1 }
 0x39c   :  { %v1074_v18 = vadd.f32 %v1073_v8, %v911_v7  ;;  %v1088_v19 = vadd.f32 %v1087_v42, %v912_v49 }
 0x39e   :  { %v1262_v50 = vmax.f32 %v1074_v18, 0.0  ;;  %v1263_v55 = vmax.f32 %v1088_v19, 0.0 }
 0x3a0   :  { %v1045_v63 = vpop.f32.mrf.mxu2  ;;  %v1059_v47 = vpop.f32.mrf.mxu3 }
 0x3a1   :  { %v1046_v11 = vadd.f32 %v1045_v63, %v909_v22  ;;  %v1060_v31 = vadd.f32 %v1059_v47, %v910_v35 }
 0x3a3   :  { %v1075_v26 = vpop.f32.mrf.mxu0  ;;  %v1089_v24 = vpop.f32.mrf.mxu1  ;;  %v1260_v28 = vmax.f32 %v1046_v11, 0.0  ;;  %v1261_v20 = vmax.f32 %v1060_v31, 0.0 }
 0x3a4   :  { %v1076_v62 = vadd.f32 %v1075_v26, %v911_v7  ;;  %v1090_v54 = vadd.f32 %v1089_v24, %v912_v49 }
 0x3a6   :  { %v1278_v0 = vmax.f32 %v1076_v62, 0.0  ;;  %v1279_v45 = vmax.f32 %v1090_v54, 0.0 }
 0x3a8   :  { %v1294_v34 = vpack.c.bf16 %v1278_v0, %v1262_v50  ;;  %v1295_v12 = vpack.c.bf16 %v1279_v45, %v1263_v55  ;;  %v1047_v39 = vpop.f32.mrf.mxu2  ;;  %v1061_v21 = vpop.f32.mrf.mxu3  ;;  %v1315_v0 = vld [vmem:[#allocation9 + $0x38] sm:$0xff] }
 0x3a9   :  { %v1048_v27 = vadd.f32 %v1047_v39, %v909_v22  ;;  %v1062_v40 = vadd.f32 %v1061_v21, %v910_v35  ;;  %v1314_v22 = vld [vmem:[#allocation9 + $0x30] sm:$0xff] }
 0x3aa   :  { %1412 = vmatmul.bf16.vlgmr.msrb.gmra.mxu0 %v1294_v34  ;;  %1426 = vmatmul.bf16.vlgmr.msrb.gmra.mxu1 %v1295_v12  ;;  %v1340_v11 = vunpack.c.l.b16 %v1314_v22  ;;  %v1341_v31 = vunpack.c.h.b16 %v1314_v22  ;;  %v1342_v34 = vunpack.c.l.b16 %v1315_v0  ;;  %v1343_v12 = vunpack.c.h.b16 %v1315_v0 }
 0x3ab   :  { %v1276_v51 = vmax.f32 %v1048_v27, 0.0  ;;  %v1277_v46 = vmax.f32 %v1062_v40, 0.0  ;;  %v1129_v25 = vpop.f32.mrf.mxu0  ;;  %v1143_v30 = vpop.f32.mrf.mxu1  ;;  %1523 = vmatpush.bf16.xpose.msrb.mxu0 %v1354_v53  ;;  %1537 = vmatpush.bf16.xpose.msrb.mxu1 %v1355_v52  ;;  %v924_v0 = vperm.slane %v5726_v43, 7 }
 0x3ac   :  { %v1130_v8 = vadd.f32 %v1129_v25, %v915_v2  ;;  %v1144_v42 = vadd.f32 %v1143_v30, %v916_v58  ;;  %v1358_v17 = vpack.c.b16 %v1342_v34, %v1342_v34  ;;  %v1359_v10 = vpack.c.b16 %v1343_v12, %v1343_v12 }
 0x3ad   :  { %v1292_v4 = vpack.c.bf16 %v1276_v51, %v1260_v28  ;;  %v1293_v57 = vpack.c.bf16 %v1277_v46, %v1261_v20  ;;  %v1356_v28 = vpack.c.b16 %v1340_v11, %v1340_v11  ;;  %v1357_v20 = vpack.c.b16 %v1341_v31, %v1341_v31 }
 0x3ae   :  { %v1266_v18 = vmax.f32 %v1130_v8, 0.0  ;;  %v1267_v19 = vmax.f32 %v1144_v42, 0.0  ;;  %v919_v25 = vperm.slane %v5726_v43, 2  ;;  %v920_v30 = vperm.slane %v5726_v43, 3 }
 0x3af   :  { %1384 = vmatmul.bf16.vlgmr.msrb.gmra.mxu2 %v1292_v4  ;;  %1398 = vmatmul.bf16.vlgmr.msrb.gmra.mxu3 %v1293_v57  ;;  %v917_v4 = vperm.slane %v5726_v43, 0  ;;  %v918_v57 = vperm.slane %v5726_v43, 1  ;;  %v923_v31 = vperm.slane %v5726_v43, 6 }
 0x3b0   :  { %v1101_v48 = vpop.f32.mrf.mxu2  ;;  %v1115_v41 = vpop.f32.mrf.mxu3  ;;  %1495 = vmatpush.bf16.xpose.msrb.mxu2 %v1352_v44  ;;  %1509 = vmatpush.bf16.xpose.msrb.mxu3 %v1353_v14 }
 0x3b1   :  { %v1102_v35 = vadd.f32 %v1101_v48, %v913_v1  ;;  %v1116_v26 = vadd.f32 %v1115_v41, %v914_v38 }
 0x3b3   :  { %v1131_v7 = vpop.f32.mrf.mxu0  ;;  %v1145_v49 = vpop.f32.mrf.mxu1  ;;  %v1264_v39 = vmax.f32 %v1102_v35, 0.0  ;;  %v1265_v21 = vmax.f32 %v1116_v26, 0.0 }
 0x3b4   :  { %v1132_v63 = vadd.f32 %v1131_v7, %v915_v2  ;;  %v1146_v47 = vadd.f32 %v1145_v49, %v916_v58 }
 0x3b6   :  { %v1282_v24 = vmax.f32 %v1132_v63, 0.0  ;;  %v1283_v62 = vmax.f32 %v1146_v47, 0.0 }
 0x3b8   :  { %v1298_v54 = vpack.c.bf16 %v1282_v24, %v1266_v18  ;;  %v1299_v50 = vpack.c.bf16 %v1283_v62, %v1267_v19  ;;  %v1103_v55 = vpop.f32.mrf.mxu2  ;;  %v1117_v9 = vpop.f32.mrf.mxu3 }
 0x3b9   :  { %v1104_v45 = vadd.f32 %v1103_v55, %v913_v1  ;;  %v1118_v61 = vadd.f32 %v1117_v9, %v914_v38 }
 0x3ba   :  { %1468 = vmatmul.bf16.vlgmr.msra.gmra.mxu0 %v1298_v54  ;;  %1482 = vmatmul.bf16.vlgmr.msra.gmra.mxu1 %v1299_v50 }
 0x3bb   :  { %v1280_v15 = vmax.f32 %v1104_v45, 0.0  ;;  %v1281_v29 = vmax.f32 %v1118_v61, 0.0  ;;  %v1185_v27 = vpop.f32.mrf.mxu0  ;;  %v1199_v40 = vpop.f32.mrf.mxu1  ;;  %1579 = vmatpush.bf16.xpose.msra.mxu0 %v1358_v17  ;;  %1593 = vmatpush.bf16.xpose.msra.mxu1 %v1359_v10 }
 0x3bc   :  { %v1186_v44 = vadd.f32 %v1185_v27, %v919_v25  ;;  %v1200_v14 = vadd.f32 %v1199_v40, %v920_v30 }
 0x3bd   :  { %v1296_v51 = vpack.c.bf16 %v1280_v15, %v1264_v39  ;;  %v1297_v46 = vpack.c.bf16 %v1281_v29, %v1265_v21  ;;  %v921_v39 = vperm.slane %v5726_v43, 4  ;;  %v922_v21 = vperm.slane %v5726_v43, 5 }
 0x3be   :  { %v1270_v8 = vmax.f32 %v1186_v44, 0.0  ;;  %v1271_v42 = vmax.f32 %v1200_v14, 0.0 }
 0x3bf   :  { %1440 = vmatmul.bf16.vlgmr.msra.gmra.mxu2 %v1296_v51  ;;  %1454 = vmatmul.bf16.vlgmr.msra.gmra.mxu3 %v1297_v46 }
 0x3c0   :  { %v1157_v53 = vpop.f32.mrf.mxu2  ;;  %v1171_v52 = vpop.f32.mrf.mxu3  ;;  %1551 = vmatpush.bf16.xpose.msra.mxu2 %v1356_v28  ;;  %1565 = vmatpush.bf16.xpose.msra.mxu3 %v1357_v20 }
 0x3c1   :  { %v1158_v7 = vadd.f32 %v1157_v53, %v917_v4  ;;  %v1172_v49 = vadd.f32 %v1171_v52, %v918_v57 }
 0x3c3   :  { %v1187_v2 = vpop.f32.mrf.mxu0  ;;  %v1201_v58 = vpop.f32.mrf.mxu1  ;;  %v1268_v26 = vmax.f32 %v1158_v7, 0.0  ;;  %v1269_v24 = vmax.f32 %v1172_v49, 0.0  ;;  %v4744_v49 = vld [vmem:[%s6596_s10] ss:$0 sm:$0xff] }
 0x3c4   :  { %v1188_v48 = vadd.f32 %v1187_v2, %v919_v25  ;;  %v1202_v41 = vadd.f32 %v1201_v58, %v920_v30 }
 0x3c6   :  { %v1286_v1 = vmax.f32 %v1188_v48, 0.0  ;;  %v1287_v38 = vmax.f32 %v1202_v41, 0.0 }
 0x3c8   :  { %v1302_v63 = vpack.c.bf16 %v1286_v1, %v1270_v8  ;;  %v1303_v47 = vpack.c.bf16 %v1287_v38, %v1271_v42  ;;  %v1159_v18 = vpop.f32.mrf.mxu2  ;;  %v1173_v19 = vpop.f32.mrf.mxu3 }
 0x3c9   :  { %v1160_v22 = vadd.f32 %v1159_v18, %v917_v4  ;;  %v1174_v35 = vadd.f32 %v1173_v19, %v918_v57 }
 0x3ca   :  { %1524 = vmatmul.bf16.vlgmr.msrb.gmra.mxu0 %v1302_v63  ;;  %1538 = vmatmul.bf16.vlgmr.msrb.gmra.mxu1 %v1303_v47 }
 0x3cb   :  { %v1284_v62 = vmax.f32 %v1160_v22, 0.0  ;;  %v1285_v54 = vmax.f32 %v1174_v35, 0.0  ;;  %v1241_v50 = vpop.f32.mrf.mxu0  ;;  %v1255_v55 = vpop.f32.mrf.mxu1 }
 0x3cc   :  { %v1242_v34 = vadd.f32 %v1241_v50, %v923_v31  ;;  %v1256_v12 = vadd.f32 %v1255_v55, %v924_v0 }
 0x3cd   :  { %v1300_v9 = vpack.c.bf16 %v1284_v62, %v1268_v26  ;;  %v1301_v11 = vpack.c.bf16 %v1285_v54, %v1269_v24 }
 0x3ce   :  { %v1274_v17 = vmax.f32 %v1242_v34, 0.0  ;;  %v1275_v10 = vmax.f32 %v1256_v12, 0.0 }
 0x3cf   :  { %1496 = vmatmul.bf16.vlgmr.msrb.gmra.mxu2 %v1300_v9  ;;  %1510 = vmatmul.bf16.vlgmr.msrb.gmra.mxu3 %v1301_v11 }
 0x3d0   :  { %v1213_v45 = vpop.f32.mrf.mxu2  ;;  %v1227_v61 = vpop.f32.mrf.mxu3 }
 0x3d1   :  { %v1214_v51 = vadd.f32 %v1213_v45, %v921_v39  ;;  %v1228_v46 = vadd.f32 %v1227_v61, %v922_v21 }
 0x3d3   :  { %v1243_v15 = vpop.f32.mrf.mxu0  ;;  %v1257_v29 = vpop.f32.mrf.mxu1  ;;  %v1272_v4 = vmax.f32 %v1214_v51, 0.0  ;;  %v1273_v43 = vmax.f32 %v1228_v46, 0.0 }
 0x3d4   :  { %v1244_v27 = vadd.f32 %v1243_v15, %v923_v31  ;;  %v1258_v40 = vadd.f32 %v1257_v29, %v924_v0 }
 0x3d6   :  { %v1290_v28 = vmax.f32 %v1244_v27, 0.0  ;;  %v1291_v20 = vmax.f32 %v1258_v40, 0.0 }
 0x3d8   :  { %v1306_v25 = vpack.c.bf16 %v1290_v28, %v1274_v17  ;;  %v1307_v30 = vpack.c.bf16 %v1291_v20, %v1275_v10  ;;  %v1215_v53 = vpop.f32.mrf.mxu2  ;;  %v1229_v52 = vpop.f32.mrf.mxu3 }
 0x3d9   :  { %v1216_v44 = vadd.f32 %v1215_v53, %v921_v39  ;;  %v1230_v14 = vadd.f32 %v1229_v52, %v922_v21 }
 0x3da   :  { %1580 = vmatmul.bf16.vlgmr.msra.gmra.mxu0 %v1306_v25  ;;  %1594 = vmatmul.bf16.vlgmr.msra.gmra.mxu1 %v1307_v30 }
 0x3db   :  { %v1288_v57 = vmax.f32 %v1216_v44, 0.0  ;;  %v1289_v2 = vmax.f32 %v1230_v14, 0.0 }
 0x3dd   :  { %v1304_v58 = vpack.c.bf16 %v1288_v57, %v1272_v4  ;;  %v1305_v48 = vpack.c.bf16 %v1289_v2, %v1273_v43 }
 0x3df   :  { %1552 = vmatmul.bf16.vlgmr.msra.gmra.mxu2 %v1304_v58  ;;  %1566 = vmatmul.bf16.vlgmr.msra.gmra.mxu3 %v1305_v48 }
 0x427   :  { %v1413_v41 = vpop.f32.mrf.mxu0  ;;  %v1427_v8 = vpop.f32.mrf.mxu1 }
 0x42f   :  { %v1415_v42 = vpop.f32.mrf.mxu0  ;;  %v1429_v7 = vpop.f32.mrf.mxu1 }
 0x432   :  { %v1385_v1 = vpop.f32.mrf.mxu2  ;;  %v1399_v38 = vpop.f32.mrf.mxu3 }
 0x433   :  { %v1386_v63 = vadd.f32 %v4744_v49, %v1385_v1 }
 0x435   :  { %v1400_v22 = vadd.f32 %v1399_v38, %v1386_v63 }
 0x437   :  { %v1469_v19 = vpop.f32.mrf.mxu0  ;;  %v1483_v35 = vpop.f32.mrf.mxu1  ;;  %v1414_v26 = vadd.f32 %v1413_v41, %v1400_v22 }
 0x439   :  { %v1428_v9 = vadd.f32 %v1427_v8, %v1414_v26 }
 0x43a   :  { %v1387_v47 = vpop.f32.mrf.mxu2  ;;  %v1401_v18 = vpop.f32.mrf.mxu3 }
 0x43b   :  { %v1388_v24 = vadd.f32 %v4744_v49, %v1387_v47 }
 0x43d   :  { %v1402_v50 = vadd.f32 %v1401_v18, %v1388_v24 }
 0x43f   :  { %v1471_v55 = vpop.f32.mrf.mxu0  ;;  %v1485_v11 = vpop.f32.mrf.mxu1  ;;  %v1416_v0 = vadd.f32 %v1415_v42, %v1402_v50 }
 0x441   :  { %v1430_v12 = vadd.f32 %v1429_v7, %v1416_v0 }
 0x442   :  { %v1441_v62 = vpop.f32.mrf.mxu2  ;;  %v1455_v54 = vpop.f32.mrf.mxu3 }
 0x443   :  { %v1442_v31 = vadd.f32 %v1441_v62, %v1428_v9 }
 0x445   :  { %v1456_v34 = vadd.f32 %v1455_v54, %v1442_v31 }
 0x447   :  { %v1470_v39 = vadd.f32 %v1469_v19, %v1456_v34  ;;  %v1525_v21 = vpop.f32.mrf.mxu0  ;;  %v1539_v29 = vpop.f32.mrf.mxu1 }
 0x449   :  { %v1484_v10 = vadd.f32 %v1483_v35, %v1470_v39 }
 0x44a   :  { %v1443_v45 = vpop.f32.mrf.mxu2  ;;  %v1457_v61 = vpop.f32.mrf.mxu3 }
 0x44b   :  { %v1444_v15 = vadd.f32 %v1443_v45, %v1430_v12 }
 0x44d   :  { %v1458_v17 = vadd.f32 %v1457_v61, %v1444_v15 }
 0x44f   :  { %v1472_v20 = vadd.f32 %v1471_v55, %v1458_v17  ;;  %v1527_v51 = vpop.f32.mrf.mxu0  ;;  %v1541_v52 = vpop.f32.mrf.mxu1 }
 0x451   :  { %v1486_v53 = vadd.f32 %v1485_v11, %v1472_v20 }
 0x452   :  { %v1497_v27 = vpop.f32.mrf.mxu2  ;;  %v1511_v40 = vpop.f32.mrf.mxu3 }
 0x453   :  { %v1498_v28 = vadd.f32 %v1497_v27, %v1484_v10 }
 0x455   :  { %v1512_v46 = vadd.f32 %v1511_v40, %v1498_v28 }
 0x457   :  { %v1526_v44 = vadd.f32 %v1525_v21, %v1512_v46  ;;  %v1581_v48 = vpop.f32.mrf.mxu0  ;;  %v1595_v42 = vpop.f32.mrf.mxu1 }
 0x459   :  { %v1540_v43 = vadd.f32 %v1539_v29, %v1526_v44 }
 0x45a   :  { %v1499_v25 = vpop.f32.mrf.mxu2  ;;  %v1513_v30 = vpop.f32.mrf.mxu3 }
 0x45b   :  { %v1500_v14 = vadd.f32 %v1499_v25, %v1486_v53  ;;  %v4745_v53 = vld [vmem:[%s6597_s11] ss:$0 sm:$0xff] }
 0x45d   :  { %v1514_v4 = vadd.f32 %v1513_v30, %v1500_v14 }
 0x45f   :  { %v1528_v41 = vadd.f32 %v1527_v51, %v1514_v4  ;;  %v1583_v35 = vpop.f32.mrf.mxu0  ;;  %v1597_v24 = vpop.f32.mrf.mxu1  ;;  %v4746_v4 = vld [vmem:[#allocation11] ss:$0 sm:$0xff] }
 0x461   :  { %v1542_v38 = vadd.f32 %v1541_v52, %v1528_v41 }
 0x462   :  { %v1553_v57 = vpop.f32.mrf.mxu2  ;;  %v1567_v2 = vpop.f32.mrf.mxu3 }
 0x463   :  { %v1554_v58 = vadd.f32 %v1553_v57, %v1540_v43 }
 0x465   :  { %v1568_v8 = vadd.f32 %v1567_v2, %v1554_v58 }
 0x467   :  { %v1582_v1 = vadd.f32 %v1581_v48, %v1568_v8 }
 0x469   :  { %v1596_v7 = vadd.f32 %v1595_v42, %v1582_v1 }
 0x46a   :  { %v1555_v49 = vpop.f32.mrf.mxu2  ;;  %v1569_v18 = vpop.f32.mrf.mxu3 }
 0x46b   :  { %v1556_v63 = vadd.f32 %v1555_v49, %v1542_v38  ;;  %v1600_v47 = vadd.f32 %v1596_v7, %v5686_v59  ;;  %v4747_v38 = vld [vmem:[%s6588_s2 + $0x1] ss:$0 sm:$0xff] }
 0x46d   :  { %v1570_v19 = vadd.f32 %v1569_v18, %v1556_v63  ;;  %v1604_v22 = vsel %vm145_vm2, %v1600_v47, 0.0 }
 0x46e   :  { %1605 = vadd.xlane.f32.xlu0 %v1604_v22 }
 0x46f   :  { %v1584_v26 = vadd.f32 %v1583_v35, %v1570_v19 }
 0x471   :  { %v1598_v62 = vadd.f32 %v1597_v24, %v1584_v26 }
 0x473   :  { %v1601_v54 = vadd.f32 %v1598_v62, %v5688_v23  ;;  %v4636_v23 = vld [vmem:[%s6587_s1 + $0x8] sm:$0x7f] }
 0x474   :  { %4638 = vmatpush.msk.msrb.mxu2 %vm152_vm1, %v4636_v23 }
 0x475   :  { %v1607_v50 = vsel %vm145_vm2, %v1601_v54, 0.0 }
 0x476   :  { %1608 = vadd.xlane.f32.xlu1 %v1607_v50 }
 0x4e1   :  { %v1606_v55 = vpop.xlane.xlu0 %1605 }
 0x4e2   :  { %v1610_v9 = vmul.f32 %v1606_v55, %v5645_v16 }
 0x4e4   :  { %v1612_v11 = vsub.f32 %v1600_v47, %v1610_v9 }
 0x4e6   :  { %v1614_v31 = vmul.f32 %v1612_v11, %v1612_v11 }
 0x4e8   :  { %v1616_v59 = vsel %vm145_vm2, %v1614_v31, 0.0 }
 0x4e9   :  { %v1609_v0 = vpop.xlane.xlu1 %1608  ;;  %1617 = vadd.xlane.f32.xlu2 %v1616_v59 }
 0x4ea   :  { %v1611_v45 = vmul.f32 %v1609_v0, %v5645_v16 }
 0x4ec   :  { %v1613_v61 = vsub.f32 %v1601_v54, %v1611_v45 }
 0x4ee   :  { %v1615_v34 = vmul.f32 %v1613_v61, %v1613_v61 }
 0x4f0   :  { %v1619_v12 = vsel %vm145_vm2, %v1615_v34, 0.0 }
 0x4f1   :  { %1620 = vadd.xlane.f32.xlu0 %v1619_v12 }
 0x55c   :  { %v1618_v39 = vpop.xlane.xlu2 %1617 }
 0x55d   :  { %v1622_v21 = vmul.f32 %v1618_v39, %v5645_v16 }
 0x55f   :  { %v1624_v15 = vadd.f32 1e-05, %v1622_v21 }
 0x561   :  { %4833 = vrsqrt.f32 %v1624_v15  ;;  %vm1632_vm13 = vweird.f32 %v1624_v15 }
 0x564   :  { %v1621_v29 = vpop.xlane.xlu0 %1620 }
 0x565   :  { %v1623_v27 = vmul.f32 %v1621_v29, %v5645_v16 }
 0x567   :  { %v4834_v40 = vpop.eup %4833  ;;  %v1625_v17 = vadd.f32 1e-05, %v1623_v27 }
 0x568   :  { %v1627_v10 = vmul.f32 %v4834_v40, %v1624_v15  ;;  %vm1633_vm12 = vweird.f32 %v4834_v40 }
 0x569   :  { %4835 = vrsqrt.f32 %v1625_v17  ;;  %vm1634_vm14 = vmor %vm1632_vm13, %vm1633_vm12  ;;  %vm1642_vm0 = vweird.f32 %v1625_v17 }
 0x56a   :  { %v1628_v28 = vmul.f32 %v4834_v40, %v1627_v10 }
 0x56c   :  { %v1629_v20 = vmul.f32 0.5, %v1628_v28 }
 0x56e   :  { %v1630_v51 = vsub.f32 1.5, %v1629_v20 }
 0x56f   :  { %v4836_v46 = vpop.eup %4835 }
 0x570   :  { %v1631_v25 = vmul.f32 %v4834_v40, %v1630_v51  ;;  %v1637_v30 = vmul.f32 %v4836_v46, %v1625_v17  ;;  %vm1643_vm15 = vweird.f32 %v4836_v46 }
 0x571   :  { %vm1644_vm10 = vmor %vm1642_vm0, %vm1643_vm15 }
 0x572   :  { %v1635_v52 = vsel %vm1634_vm14, %v4834_v40, %v1631_v25  ;;  %v1638_v44 = vmul.f32 %v4836_v46, %v1637_v30 }
 0x573   :  { %v1646_v14 = vmul.f32 %v1635_v52, %v1612_v11 }
 0x574   :  { %v1639_v43 = vmul.f32 0.5, %v1638_v44 }
 0x575   :  { %v1651_v57 = vmul.f32 %v4745_v53, %v1646_v14 }
 0x576   :  { %v1640_v2 = vsub.f32 1.5, %v1639_v43 }
 0x577   :  { %v5756_v58 = vadd.f32 %v4746_v4, %v1651_v57 }
 0x578   :  { %v1641_v48 = vmul.f32 %v4836_v46, %v1640_v2 }
 0x579   :  { %4639 = vmatmul.msk.f32.vlgmr.msrb.gmra.mxu2 %vm145_vm2, %v5756_v58 }
 0x57a   :  { %v1645_v41 = vsel %vm1644_vm10, %v4836_v46, %v1641_v48 }
 0x57b   :  { %v1647_v8 = vmul.f32 %v1645_v41, %v1613_v61 }
 0x57d   :  { %v1652_v42 = vmul.f32 %v4745_v53, %v1647_v8 }
 0x57f   :  { %v5760_v1 = vadd.f32 %v4746_v4, %v1652_v42 }
 0x581   :  { %4640 = vmatmul.msk.f32.gmra.mxu2 %vm145_vm2, %v5760_v1 }
 0x5fc   :  { %v1691_v7 = vpop.f32.mrf.mxu2 }
 0x5fd   :  { %v5767_v49 = vadd.f32 %v4747_v38, %v1691_v7 }
 0x5ff   :  { %2087 = vrot.lane.b32.xlu0 %v5767_v49, %s5149_s23  ;;  %1745 = vrot.lane.b32.xlu1 %v5767_v49, %s5148_s9  ;;  %v1699_v54 = vrot.slane %v5767_v49, 1  ;;  %v1700_v50 = vrot.slane %v5767_v49, 2  ;;  %v1701_v55 = vrot.slane %v5767_v49, 3  ;;  %v1702_v12 = vrot.slane %v5767_v49, 4 }
 0x600   :  { %v1703_v53 = vrot.slane %v5767_v49, 5 }
 0x604   :  { %v1694_v63 = vpop.f32.mrf.mxu2 }
 0x605   :  { %v1695_v47 = vadd.f32 %v4747_v38, %v1694_v63  ;;  %v1704_v38 = vrot.slane %v5767_v49, 6 }
 0x607   :  { %2089 = vrot.lane.b32.xlu1 %v1695_v47, %s5149_s23  ;;  %1747 = vrot.lane.b32.xlu2 %v1695_v47, %s5148_s9  ;;  %v1706_v18 = vrot.slane %v1695_v47, 1  ;;  %v1707_v19 = vrot.slane %v1695_v47, 2  ;;  %v1708_v22 = vrot.slane %v1695_v47, 3  ;;  %v1709_v35 = vrot.slane %v1695_v47, 4 }
 0x608   :  { %v1710_v26 = vrot.slane %v1695_v47, 5  ;;  %v1711_v24 = vrot.slane %v1695_v47, 6  ;;  %v1712_v62 = vrot.slane %v1695_v47, 7  ;;  %v1721_v9 = vperm.slane %v1695_v47, 0 }
 0x609   :  { %v1722_v11 = vperm.slane %v1706_v18, 0  ;;  %v1723_v31 = vperm.slane %v1707_v19, 0  ;;  %v1724_v59 = vperm.slane %v1708_v22, 0  ;;  %v1725_v45 = vperm.slane %v1709_v35, 0 }
 0x60a   :  { %v1726_v61 = vperm.slane %v1710_v26, 0  ;;  %v1727_v34 = vperm.slane %v1711_v24, 0  ;;  %v1728_v29 = vperm.slane %v1712_v62, 0  ;;  %v1705_v26 = vrot.slane %v5767_v49, 7 }
 0x661   :  { %v1748_v0 = vpop.permute.xlu2 %1747 }
 0x662   :  { %v1759_v23 = vmul.f32 %v1748_v0, %v1721_v9  ;;  %v1760_v39 = vmul.f32 %v1748_v0, %v1722_v11  ;;  %v1761_v21 = vmul.f32 %v1748_v0, %v1723_v31  ;;  %v1762_v15 = vmul.f32 %v1748_v0, %v1724_v59 }
 0x663   :  { %v1763_v27 = vmul.f32 %v1748_v0, %v1725_v45  ;;  %v1764_v40 = vmul.f32 %v1748_v0, %v1726_v61  ;;  %v1765_v17 = vmul.f32 %v1748_v0, %v1727_v34  ;;  %v1766_v46 = vmul.f32 %v1748_v0, %v1728_v29 }
 0x664   :  { %v5780_v10 = vadd.f32 %v5416_v56, %v1759_v23  ;;  %v5783_v28 = vadd.f32 %v5411_v60, %v1760_v39  ;;  %v5786_v20 = vadd.f32 %v5289_v33, %v1761_v21  ;;  %v5789_v51 = vadd.f32 %v5287_v32, %v1762_v15 }
 0x665   :  { %v5792_v25 = vadd.f32 %v5293_v37, %v1763_v27  ;;  %v5795_v30 = vadd.f32 %v5291_v36, %v1764_v40  ;;  %v5807_v41 = vadd.f32 %v5318_v6, %v1765_v17  ;;  %v5815_v19 = vadd.f32 %v5316_v5, %v1766_v46 }
 0x666   :  { %v1839_v52 = vsel %vm145_vm2, %v5780_v10, -inf  ;;  %v1846_v44 = vsel %vm145_vm2, %v5783_v28, -inf  ;;  %v1853_v14 = vsel %vm145_vm2, %v5786_v20, -inf  ;;  %v1860_v4 = vsel %vm145_vm2, %v5789_v51, -inf }
 0x667   :  { %v1840_v43 = vrot.slane %v1839_v52, 4  ;;  %v1847_v57 = vrot.slane %v1846_v44, 4  ;;  %v1854_v2 = vrot.slane %v1853_v14, 4  ;;  %v1861_v48 = vrot.slane %v1860_v4, 4 }
 0x668   :  { %v1867_v8 = vsel %vm145_vm2, %v5792_v25, -inf  ;;  %v1874_v42 = vsel %vm145_vm2, %v5795_v30, -inf  ;;  %v1881_v0 = vsel %vm145_vm2, %v5807_v41, -inf  ;;  %v1713_v45 = vperm.slane %v5767_v49, 0 }
 0x669   :  { %v1841_v7 = vmax.f32 %v1839_v52, %v1840_v43  ;;  %v1848_v63 = vmax.f32 %v1846_v44, %v1847_v57  ;;  %v1855_v47 = vmax.f32 %v1853_v14, %v1854_v2  ;;  %v1862_v18 = vmax.f32 %v1860_v4, %v1861_v48 }
 0x66a   :  { %v1868_v22 = vrot.slane %v1867_v8, 4  ;;  %v1875_v35 = vrot.slane %v1874_v42, 4  ;;  %v1888_v29 = vsel %vm145_vm2, %v5815_v19, -inf  ;;  %v1714_v27 = vperm.slane %v1699_v54, 0 }
 0x66b   :  { %v1842_v24 = vrot.slane %v1841_v7, 2  ;;  %v1849_v62 = vrot.slane %v1848_v63, 2  ;;  %v1856_v9 = vrot.slane %v1855_v47, 2  ;;  %v1863_v11 = vrot.slane %v1862_v18, 2 }
 0x66c   :  { %v1869_v31 = vmax.f32 %v1867_v8, %v1868_v22  ;;  %v1876_v59 = vmax.f32 %v1874_v42, %v1875_v35  ;;  %v1882_v4 = vrot.slane %v1881_v0, 4  ;;  %v1715_v43 = vperm.slane %v1700_v50, 0 }
 0x66d   :  { %v1843_v61 = vmax.f32 %v1841_v7, %v1842_v24  ;;  %v1850_v34 = vmax.f32 %v1848_v63, %v1849_v62  ;;  %v1857_v23 = vmax.f32 %v1855_v47, %v1856_v9  ;;  %v1864_v39 = vmax.f32 %v1862_v18, %v1863_v11 }
 0x66e   :  { %v1870_v21 = vrot.slane %v1869_v31, 2  ;;  %v1877_v15 = vrot.slane %v1876_v59, 2  ;;  %v1889_v63 = vrot.slane %v1888_v29, 4  ;;  %v1716_v54 = vperm.slane %v1701_v55, 0 }
 0x66f   :  { %v1844_v40 = vrot.slane %v1843_v61, 1  ;;  %v1851_v17 = vrot.slane %v1850_v34, 1  ;;  %v1858_v46 = vrot.slane %v1857_v23, 1  ;;  %v1865_v52 = vrot.slane %v1864_v39, 1 }
 0x670   :  { %v1871_v44 = vmax.f32 %v1869_v31, %v1870_v21  ;;  %v1878_v14 = vmax.f32 %v1876_v59, %v1877_v15  ;;  %v1883_v9 = vmax.f32 %v1881_v0, %v1882_v4  ;;  %v1717_v11 = vperm.slane %v1702_v12, 0 }
 0x671   :  { %v1845_v57 = vmax.f32 %v1843_v61, %v1844_v40  ;;  %v1852_v2 = vmax.f32 %v1850_v34, %v1851_v17  ;;  %v1859_v48 = vmax.f32 %v1857_v23, %v1858_v46  ;;  %v1866_v8 = vmax.f32 %v1864_v39, %v1865_v52  ;;  %v1746_v47 = vpop.permute.xlu1 %1745 }
 0x672   :  { %v1872_v42 = vrot.slane %v1871_v44, 1  ;;  %v1879_v7 = vrot.slane %v1878_v14, 1  ;;  %v1751_v34 = vmul.f32 %v1746_v47, %v1713_v45  ;;  %v5835_v23 = vmax.f32 %v1888_v29, %v1889_v63 }
 0x673   :  { %v1903_v18 = vsub.f32 %v5780_v10, %v1845_v57  ;;  %v1904_v22 = vsub.f32 %v5783_v28, %v1852_v2  ;;  %v1905_v35 = vsub.f32 %v5786_v20, %v1859_v48  ;;  %v1906_v24 = vsub.f32 %v5789_v51, %v1866_v8 }
 0x674   :  { %v1873_v50 = vmax.f32 %v1871_v44, %v1872_v42  ;;  %v1880_v62 = vmax.f32 %v1878_v14, %v1879_v7  ;;  %v1752_v10 = vmul.f32 %v1746_v47, %v1714_v27  ;;  %v1753_v39 = vmul.f32 %v1746_v47, %v1715_v43 }
 0x675   :  { %v1927_v31 = vmul.f32 1.442695, %v1903_v18  ;;  %v1929_v59 = vmul.f32 1.442695, %v1904_v22  ;;  %v1931_v61 = vmul.f32 1.442695, %v1905_v35  ;;  %v1754_v51 = vmul.f32 %v1746_v47, %v1716_v54 }
 0x676   :  { %v1933_v55 = vmul.f32 1.442695, %v1906_v24  ;;  %v1907_v28 = vsub.f32 %v5792_v25, %v1873_v50  ;;  %v1908_v20 = vsub.f32 %v5795_v30, %v1880_v62  ;;  %v1718_v0 = vperm.slane %v1703_v53, 0 }
 0x677   :  { %4837 = vpow2.f32 %v1927_v31  ;;  %v1719_v12 = vperm.slane %v1704_v38, 0  ;;  %v1720_v21 = vperm.slane %v1705_v26, 0  ;;  %v1884_v45 = vrot.slane %v1883_v9, 2 }
 0x678   :  { %4839 = vpow2.f32 %v1929_v59  ;;  %v1755_v15 = vmul.f32 %v1746_v47, %v1717_v11  ;;  %v5844_v29 = vadd.f32 %v5416_v56, %v1751_v34  ;;  %v5847_v25 = vadd.f32 %v5411_v60, %v1752_v10 }
 0x679   :  { %4841 = vpow2.f32 %v1931_v61  ;;  %v5850_v30 = vadd.f32 %v5289_v33, %v1753_v39  ;;  %v5853_v27 = vadd.f32 %v5287_v32, %v1754_v51  ;;  %v1935_v53 = vmul.f32 1.442695, %v1907_v28 }
 0x67a   :  { %4843 = vpow2.f32 %v1933_v55  ;;  %v1937_v38 = vmul.f32 1.442695, %v1908_v20  ;;  %v1756_v26 = vmul.f32 %v1746_v47, %v1718_v0  ;;  %v1757_v40 = vmul.f32 %v1746_v47, %v1719_v12 }
 0x67b   :  { %v1758_v17 = vmul.f32 %v1746_v47, %v1720_v21  ;;  %v1783_v46 = vsel %vm145_vm2, %v5844_v29, -inf  ;;  %v1790_v52 = vsel %vm145_vm2, %v5847_v25, -inf  ;;  %v1797_v43 = vsel %vm145_vm2, %v5850_v30, -inf }
 0x67c   :  { %v1784_v14 = vrot.slane %v1783_v46, 4  ;;  %v1791_v4 = vrot.slane %v1790_v52, 4  ;;  %v1804_v57 = vsel %vm145_vm2, %v5853_v27, -inf  ;;  %v5871_v8 = vadd.f32 %v5293_v37, %v1755_v15 }
 0x67d   :  { %v5860_v44 = vpop.eup %4837  ;;  %v1798_v42 = vrot.slane %v1797_v43, 4  ;;  %v1805_v7 = vrot.slane %v1804_v57, 4  ;;  %v5879_v24 = vmax.f32 %v1883_v9, %v1884_v45  ;;  %4845 = vpow2.f32 %v1935_v53 }
 0x67e   :  { %v5866_v2 = vpop.eup %4839  ;;  %v1999_v48 = vsel %vm145_vm2, %v5860_v44, 0.0  ;;  %v1785_v18 = vmax.f32 %v1783_v46, %v1784_v14  ;;  %v1792_v22 = vmax.f32 %v1790_v52, %v1791_v4  ;;  %v5886_v31 = vadd.f32 %v5291_v36, %v1756_v26 }
 0x67f   :  { %v5873_v63 = vpop.eup %4841  ;;  %v2000_v47 = vrot.slane %v1999_v48, 4  ;;  %v2006_v54 = vsel %vm145_vm2, %v5866_v2, 0.0  ;;  %v1799_v62 = vmax.f32 %v1797_v43, %v1798_v42  ;;  %v1806_v61 = vmax.f32 %v1804_v57, %v1805_v7 }
 0x680   :  { %v5877_v35 = vpop.eup %4843  ;;  %v2007_v50 = vrot.slane %v2006_v54, 4  ;;  %v5883_v11 = vsel %vm145_vm2, %v5873_v63, 0.0  ;;  %v1786_v59 = vrot.slane %v1785_v18, 2  ;;  %v5893_v55 = vadd.f32 %v5318_v6, %v1757_v40 }
 0x681   :  { %v5890_v34 = vsel %vm145_vm2, %v5877_v35, 0.0  ;;  %v1793_v9 = vrot.slane %v1792_v22, 2  ;;  %v1811_v10 = vsel %vm145_vm2, %v5871_v8, -inf  ;;  %4847 = vpow2.f32 %v1937_v38 }
 0x682   :  { %v2001_v39 = vadd.f32 %v2000_v47, %v1999_v48  ;;  %v5898_v28 = vadd.f32 %v5316_v5, %v1758_v17  ;;  %v1787_v20 = vmax.f32 %v1785_v18, %v1786_v59  ;;  %v5900_v51 = vadd.f32 %v2007_v50, %v2006_v54 }
 0x683   :  { %v2014_v0 = vrot.slane %v5883_v11, 4  ;;  %v1794_v12 = vmax.f32 %v1792_v22, %v1793_v9  ;;  %v1800_v21 = vrot.slane %v1799_v62, 2  ;;  %v1807_v53 = vrot.slane %v1806_v61, 2  ;;  %v5904_v40 = vpop.eup %4845 }
 0x684   :  { %v1788_v15 = vrot.slane %v1787_v20, 1  ;;  %v1812_v26 = vrot.slane %v1811_v10, 4  ;;  %v1818_v17 = vsel %vm145_vm2, %v5886_v31, -inf  ;;  %v1825_v52 = vsel %vm145_vm2, %v5893_v55, -inf }
 0x685   :  { %v1795_v46 = vrot.slane %v1794_v12, 1  ;;  %v1801_v38 = vmax.f32 %v1799_v62, %v1800_v21  ;;  %v1808_v4 = vmax.f32 %v1806_v61, %v1807_v53  ;;  %v1819_v57 = vrot.slane %v1818_v17, 4 }
 0x686   :  { %v1789_v14 = vmax.f32 %v1787_v20, %v1788_v15  ;;  %v1813_v43 = vmax.f32 %v1811_v10, %v1812_v26  ;;  %v1826_v7 = vrot.slane %v1825_v52, 4  ;;  %v1832_v47 = vsel %vm145_vm2, %v5898_v28, -inf }
 0x687   :  { %v1796_v48 = vmax.f32 %v1794_v12, %v1795_v46  ;;  %v1802_v42 = vrot.slane %v1801_v38, 1  ;;  %v5912_v54 = vpop.eup %4847  ;;  %v1809_v18 = vrot.slane %v1808_v4, 1  ;;  %v1820_v50 = vmax.f32 %v1818_v17, %v1819_v57 }
 0x688   :  { %v1814_v22 = vrot.slane %v1813_v43, 2  ;;  %v1833_v62 = vrot.slane %v1832_v47, 4  ;;  %v1827_v9 = vmax.f32 %v1825_v52, %v1826_v7  ;;  %v1895_v21 = vsub.f32 %v5844_v29, %v1789_v14 }
 0x689   :  { %v1803_v59 = vmax.f32 %v1801_v38, %v1802_v42  ;;  %v1896_v61 = vsub.f32 %v5847_v25, %v1796_v48  ;;  %v1810_v10 = vmax.f32 %v1808_v4, %v1809_v18  ;;  %v1821_v12 = vrot.slane %v1820_v50, 2 }
 0x68a   :  { %v1815_v20 = vmax.f32 %v1813_v43, %v1814_v22  ;;  %v1834_v15 = vmax.f32 %v1832_v47, %v1833_v62  ;;  %v1828_v53 = vrot.slane %v1827_v9, 2  ;;  %v1911_v46 = vmul.f32 1.442695, %v1895_v21 }
 0x68b   :  { %v1897_v26 = vsub.f32 %v5850_v30, %v1803_v59  ;;  %v1913_v49 = vmul.f32 1.442695, %v1896_v61  ;;  %v1822_v3 = vmax.f32 %v1820_v50, %v1821_v12  ;;  %v1898_v17 = vsub.f32 %v5853_v27, %v1810_v10 }
 0x68c   :  { %v1816_v45 = vrot.slane %v1815_v20, 1  ;;  %v1835_v5 = vrot.slane %v1834_v15, 2  ;;  %v1829_v38 = vmax.f32 %v1827_v9, %v1828_v53  ;;  %4849 = vpow2.f32 %v1911_v46  ;;  %v2222_v53 = vld [vmem:[#allocation3 + $0x8] sm:$0x7f] }
 0x68d   :  { %v1915_v52 = vmul.f32 1.442695, %v1897_v26  ;;  %v2002_v29 = vrot.slane %v2001_v39, 2  ;;  %v1823_v25 = vrot.slane %v1822_v3, 1  ;;  %4851 = vpow2.f32 %v1913_v49  ;;  %4642 = vmatpush.msk.msrb.mxu3 %vm152_vm1, %v2222_v53 }
 0x68e   :  { %v1817_v14 = vmax.f32 %v1815_v20, %v1816_v45  ;;  %v1836_v4 = vmax.f32 %v1834_v15, %v1835_v5  ;;  %v1830_v43 = vrot.slane %v1829_v38, 1  ;;  %v1917_v57 = vmul.f32 1.442695, %v1898_v17 }
 0x68f   :  { %4853 = vpow2.f32 %v1915_v52  ;;  %v2003_v48 = vadd.f32 %v2002_v29, %v2001_v39  ;;  %v2027_v30 = vsel %vm145_vm2, %v5904_v40, 0.0  ;;  %v1824_v42 = vmax.f32 %v1822_v3, %v1823_v25 }
 0x690   :  { %v1837_v7 = vrot.slane %v1836_v4, 1  ;;  %v1899_v47 = vsub.f32 %v5871_v8, %v1817_v14  ;;  %v1886_v27 = vrot.slane %v5879_v24, 1  ;;  %v2015_v18 = vadd.f32 %v2014_v0, %v5883_v11 }
 0x691   :  { %v1831_v22 = vmax.f32 %v1829_v38, %v1830_v43  ;;  %4855 = vpow2.f32 %v1917_v57  ;;  %v1900_v5 = vsub.f32 %v5886_v31, %v1824_v42  ;;  %v2009_v50 = vrot.slane %v5900_v51, 2 }
 0x692   :  { %v1838_v45 = vmax.f32 %v1836_v4, %v1837_v7  ;;  %v1919_v49 = vmul.f32 1.442695, %v1899_v47  ;;  %v5925_v39 = vpop.eup %4849  ;;  %v6608_v3 = vrot.slane %v5890_v34, 4  ;;  %v2028_v8 = vrot.slane %v2027_v30, 4 }
 0x693   :  { %v1901_v59 = vsub.f32 %v5893_v55, %v1831_v22  ;;  %v2004_v9 = vrot.slane %v2003_v48, 1  ;;  %v5933_v11 = vpop.eup %4851  ;;  %v1921_v31 = vmul.f32 1.442695, %v1900_v5  ;;  %v1943_v21 = vsel %vm145_vm2, %v5925_v39, 0.0 }
 0x694   :  { %v5930_v62 = vadd.f32 %v6608_v3, %v5890_v34  ;;  %v1902_v0 = vsub.f32 %v5898_v28, %v1838_v45  ;;  %4857 = vpow2.f32 %v1919_v49  ;;  %v1944_v20 = vrot.slane %v1943_v21, 4 }
 0x695   :  { %v5938_v61 = vpop.eup %4853  ;;  %v1923_v10 = vmul.f32 1.442695, %v1901_v59  ;;  %v1950_v34 = vsel %vm145_vm2, %v5933_v11, 0.0  ;;  %v2016_v12 = vrot.slane %v2015_v18, 2  ;;  %4859 = vpow2.f32 %v1921_v31 }
 0x696   :  { %v1951_v55 = vrot.slane %v1950_v34, 4  ;;  %v1957_v15 = vsel %vm145_vm2, %v5938_v61, 0.0  ;;  %v2010_v28 = vadd.f32 %v2009_v50, %v5900_v51  ;;  %v5948_v46 = vmax.f32 %v5879_v24, %v1886_v27 }
 0x697   :  { %v5945_v26 = vpop.eup %4855  ;;  %4861 = vpow2.f32 %v1923_v10  ;;  %v1945_v17 = vadd.f32 %v1944_v20, %v1943_v21  ;;  %v1958_v38 = vrot.slane %v1957_v15, 4  ;;  %v2029_v52 = vadd.f32 %v2028_v8, %v2027_v30 }
 0x698   :  { %v1925_v29 = vmul.f32 1.442695, %v1902_v0  ;;  %v1952_v14 = vadd.f32 %v1951_v55, %v1950_v34  ;;  %v1964_v25 = vsel %vm145_vm2, %v5945_v26, 0.0  ;;  %v2005_v57 = vadd.f32 %v2004_v9, %v2003_v48 }
 0x699   :  { %v1959_v4 = vadd.f32 %v1958_v38, %v1957_v15  ;;  %v1965_v43 = vrot.slane %v1964_v25, 4  ;;  %v1946_v51 = vrot.slane %v1945_v17, 2  ;;  %v2011_v24 = vrot.slane %v2010_v28, 1 }
 0x69a   :  { %v5953_v42 = vpop.eup %4857  ;;  %v1953_v7 = vrot.slane %v1952_v14, 2  ;;  %v5955_v47 = vadd.f32 %v2016_v12, %v2015_v18  ;;  %v2023_v27 = vrot.slane %v5930_v62, 2  ;;  %4863 = vpow2.f32 %v1925_v29 }
 0x69b   :  { %v1966_v22 = vadd.f32 %v1965_v43, %v1964_v25  ;;  %v1971_v30 = vsel %vm145_vm2, %v5953_v42, 0.0  ;;  %v1947_v45 = vadd.f32 %v1946_v51, %v1945_v17  ;;  %v1960_v5 = vrot.slane %v1959_v4, 2  ;;  %v5960_v49 = vpop.eup %4859 }
 0x69c   :  { %v1972_v50 = vrot.slane %v1971_v30, 4  ;;  %v1954_v3 = vadd.f32 %v1953_v7, %v1952_v14  ;;  %v2030_v48 = vrot.slane %v2029_v52, 2  ;;  %v1978_v18 = vsel %vm145_vm2, %v5960_v49, 0.0 }
 0x69d   :  { %v5962_v8 = vpop.eup %4861  ;;  %v1948_v59 = vrot.slane %v1947_v45, 1  ;;  %v1961_v9 = vadd.f32 %v1960_v5, %v1959_v4  ;;  %v1967_v0 = vrot.slane %v1966_v22, 2  ;;  %v1979_v21 = vrot.slane %v1978_v18, 4 }
 0x69e   :  { %v1973_v31 = vadd.f32 %v1972_v50, %v1971_v30  ;;  %v1985_v10 = vsel %vm145_vm2, %v5962_v8, 0.0  ;;  %v1955_v20 = vrot.slane %v1954_v3, 1  ;;  %4865 = vrcp.f32 %v2005_v57 }
 0x69f   :  { %v1986_v34 = vrot.slane %v1985_v10, 4  ;;  %v1949_v12 = vadd.f32 %v1948_v59, %v1947_v45  ;;  %v1962_v55 = vrot.slane %v1961_v9, 1  ;;  %v1968_v15 = vadd.f32 %v1967_v0, %v1966_v22 }
 0x6a0   :  { %v1980_v53 = vadd.f32 %v1979_v21, %v1978_v18  ;;  %v1956_v17 = vadd.f32 %v1955_v20, %v1954_v3  ;;  %v1974_v38 = vrot.slane %v1973_v31, 2  ;;  %v5968_v4 = vpop.eup %4863  ;;  %v2012_v7 = vadd.f32 %v2011_v24, %v2010_v28 }
 0x6a1   :  { %v1987_v29 = vadd.f32 %v1986_v34, %v1985_v10  ;;  %v1963_v14 = vadd.f32 %v1962_v55, %v1961_v9  ;;  %v1969_v25 = vrot.slane %v1968_v15, 1  ;;  %4867 = vrcp.f32 %v1949_v12  ;;  %v5985_v55 = vpop.permute.xlu0 %2087 }
 0x6a2   :  { %v1975_v43 = vadd.f32 %v1974_v38, %v1973_v31  ;;  %v1981_v51 = vrot.slane %v1980_v53, 2  ;;  %4869 = vrcp.f32 %v1956_v17  ;;  %v2024_v45 = vadd.f32 %v2023_v27, %v5930_v62 }
 0x6a3   :  { %v1970_v30 = vadd.f32 %v1969_v25, %v1968_v15  ;;  %4871 = vrcp.f32 %v1963_v14  ;;  %v1988_v5 = vrot.slane %v1987_v29, 2  ;;  %v1909_v22 = vsub.f32 %v5807_v41, %v5948_v46 }
 0x6a4   :  { %v1976_v50 = vrot.slane %v1975_v43, 1  ;;  %v1982_v57 = vadd.f32 %v1981_v51, %v1980_v53  ;;  %v2031_v3 = vadd.f32 %v2030_v48, %v2029_v52  ;;  %v1992_v59 = vsel %vm145_vm2, %v5968_v4, 0.0  ;;  %v4866_v9 = vpop.eup %4865 }
 0x6a5   :  { %4873 = vrcp.f32 %v1970_v30  ;;  %v1989_v18 = vadd.f32 %v1988_v5, %v1987_v29  ;;  %v2018_v28 = vrot.slane %v5955_v47, 1  ;;  %v6609_v62 = vrot.slane %v5835_v23, 2  ;;  %v5999_v30 = vpop.permute.xlu1 %2089 }
 0x6a6   :  { %v1977_v0 = vadd.f32 %v1976_v50, %v1975_v43  ;;  %v1983_v31 = vrot.slane %v1982_v57, 1  ;;  %4875 = vrcp.f32 %v2012_v7  ;;  %v2025_v41 = vrot.slane %v2024_v45, 1 }
 0x6a7   :  { %v4868_v24 = vpop.eup %4867  ;;  %v5979_v27 = vmax.f32 %v5835_v23, %v6609_v62  ;;  %v1990_v46 = vrot.slane %v1989_v18, 1  ;;  %v1993_v21 = vrot.slane %v1992_v59, 4  ;;  %v5981_v48 = vmul.f32 1.442695, %v1909_v22 }
 0x6a8   :  { %v4870_v52 = vpop.eup %4869  ;;  %v1984_v10 = vadd.f32 %v1983_v31, %v1982_v57  ;;  %4877 = vrcp.f32 %v1977_v0  ;;  %v2071_v20 = vmul.f32 %v4868_v24, %v5925_v39  ;;  %v2032_v15 = vrot.slane %v2031_v3, 1 }
 0x6a9   :  { %v4872_v34 = vpop.eup %4871  ;;  %v2072_v12 = vmul.f32 %v4870_v52, %v5933_v11  ;;  %v2079_v53 = vmul.f32 %v4866_v9, %v5860_v44  ;;  %v1991_v23 = vadd.f32 %v1990_v46, %v1989_v18  ;;  %v2019_v29 = vadd.f32 %v2018_v28, %v5955_v47 }
 0x6aa   :  { %4879 = vrcp.f32 %v1984_v10  ;;  %v2073_v17 = vmul.f32 %v4872_v34, %v5938_v61  ;;  %v2093_v38 = vmul.f32 %v5985_v55, %v2071_v20  ;;  %v5993_v39 = vsel %vm145_vm2, %v5912_v54, 0.0 }
 0x6ab   :  { %v4874_v14 = vpop.eup %4873  ;;  %v2094_v11 = vmul.f32 %v5985_v55, %v2072_v12  ;;  %v2026_v25 = vadd.f32 %v2025_v41, %v2024_v45  ;;  %v1994_v43 = vadd.f32 %v1993_v21, %v1992_v59  ;;  %4881 = vrcp.f32 %v1991_v23 }
 0x6ac   :  { %v4876_v51 = vpop.eup %4875  ;;  %v2074_v44 = vmul.f32 %v4874_v14, %v5945_v26  ;;  %v2095_v7 = vmul.f32 %v5985_v55, %v2073_v17  ;;  %v2109_v61 = vsel %vm145_vm2, %v2093_v38, 0.0  ;;  %v2033_v22 = vadd.f32 %v2032_v15, %v2031_v3 }
 0x6ad   :  { %v2110_v47 = vrot.slane %v2109_v61, 4  ;;  %v2116_v5 = vsel %vm145_vm2, %v2094_v11, 0.0  ;;  %v2101_v50 = vmul.f32 %v5999_v30, %v2079_v53  ;;  %4883 = vrcp.f32 %v2019_v29 }
 0x6ae   :  { %v4878_v57 = vpop.eup %4877  ;;  %v2096_v45 = vmul.f32 %v5985_v55, %v2074_v44  ;;  %v2117_v18 = vrot.slane %v2116_v5, 4  ;;  %v2123_v59 = vsel %vm145_vm2, %v2095_v7, 0.0  ;;  %v2080_v31 = vmul.f32 %v4876_v51, %v5866_v2 }
 0x6af   :  { %v2075_v26 = vmul.f32 %v4878_v57, %v5953_v42  ;;  %v2111_v9 = vadd.f32 %v2110_v47, %v2109_v61  ;;  %v2124_v0 = vrot.slane %v2123_v59, 4  ;;  %4885 = vrcp.f32 %v2026_v25 }
 0x6b0   :  { %v4880_v28 = vpop.eup %4879  ;;  %v2118_v24 = vadd.f32 %v2117_v18, %v2116_v5  ;;  %v2130_v62 = vsel %vm145_vm2, %v2096_v45, 0.0  ;;  %v1995_v3 = vrot.slane %v1994_v43, 2  ;;  %v2165_v42 = vsel %vm145_vm2, %v2101_v50, 0.0 }
 0x6b1   :  { %v2076_v41 = vmul.f32 %v4880_v28, %v5960_v49  ;;  %v2097_v46 = vmul.f32 %v5985_v55, %v2075_v26  ;;  %v2112_v21 = vrot.slane %v2111_v9, 2  ;;  %v2125_v52 = vadd.f32 %v2124_v0, %v2123_v59  ;;  %v4882_v10 = vpop.eup %4881 }
 0x6b2   :  { %v2119_v20 = vrot.slane %v2118_v24, 2  ;;  %v2131_v34 = vrot.slane %v2130_v62, 4  ;;  %v1893_v12 = vrot.slane %v5979_v27, 1  ;;  %v2102_v23 = vmul.f32 %v5999_v30, %v2080_v31 }
 0x6b3   :  { %v2113_v2 = vadd.f32 %v2112_v21, %v2111_v9  ;;  %v2126_v15 = vrot.slane %v2125_v52, 2  ;;  %v2137_v53 = vsel %vm145_vm2, %v2097_v46, 0.0  ;;  %v4884_v17 = vpop.eup %4883  ;;  %v2098_v49 = vmul.f32 %v5985_v55, %v2076_v41 }
 0x6b4   :  { %v2120_v38 = vadd.f32 %v2119_v20, %v2118_v24  ;;  %v2132_v29 = vadd.f32 %v2131_v34, %v2130_v62  ;;  %v2138_v14 = vrot.slane %v2137_v53, 4  ;;  %4887 = vrcp.f32 %v2033_v22 }
 0x6b5   :  { %v1996_v11 = vadd.f32 %v1995_v3, %v1994_v43  ;;  %v2077_v25 = vmul.f32 %v4882_v10, %v5962_v8  ;;  %v2114_v51 = vrot.slane %v2113_v2, 1  ;;  %v4886_v44 = vpop.eup %4885  ;;  %v2035_v7 = vrot.slane %v5993_v39, 4 }
 0x6b6   :  { %v2166_v61 = vrot.slane %v2165_v42, 4  ;;  %v2121_v47 = vrot.slane %v2120_v38, 1  ;;  %v2127_v5 = vadd.f32 %v2126_v15, %v2125_v52  ;;  %v2133_v45 = vrot.slane %v2132_v29, 2 }
 0x6b7   :  { %v1997_v50 = vrot.slane %v1996_v11, 1  ;;  %v2099_v57 = vmul.f32 %v5985_v55, %v2077_v25  ;;  %v1894_v18 = vmax.f32 %v5979_v27, %v1893_v12  ;;  %v2081_v59 = vmul.f32 %v4884_v17, %v5873_v63 }
 0x6b8   :  { %v2172_v22 = vsel %vm145_vm2, %v2102_v23, 0.0  ;;  %v2139_v43 = vadd.f32 %v2138_v14, %v2137_v53  ;;  %v2144_v8 = vsel %vm145_vm2, %v2098_v49, 0.0  ;;  %v2115_v9 = vadd.f32 %v2114_v51, %v2113_v2 }
 0x6b9   :  { %v1998_v26 = vadd.f32 %v1997_v50, %v1996_v11  ;;  %v2145_v0 = vrot.slane %v2144_v8, 4  ;;  %v2151_v31 = vsel %vm145_vm2, %v2099_v57, 0.0  ;;  %v2122_v28 = vadd.f32 %v2121_v47, %v2120_v38 }
 0x6ba   :  { %v2128_v24 = vrot.slane %v2127_v5, 1  ;;  %v2140_v62 = vrot.slane %v2139_v43, 2  ;;  %v2152_v3 = vrot.slane %v2151_v31, 4  ;;  %v4888_v41 = vpop.eup %4887  ;;  %v2134_v46 = vadd.f32 %v2133_v45, %v2132_v29 }
 0x6bb   :  { %4889 = vrcp.f32 %v1998_v26  ;;  %v2146_v27 = vadd.f32 %v2145_v0, %v2144_v8  ;;  %v1910_v63 = vsub.f32 %v5815_v19, %v1894_v18  ;;  %v2082_v21 = vmul.f32 %v4886_v44, %v5877_v35 }
 0x6bc   :  { %v2103_v52 = vmul.f32 %v5999_v30, %v2081_v59  ;;  %v2153_v10 = vadd.f32 %v2152_v3, %v2151_v31  ;;  %4891 = vpow2.f32 %v5981_v48  ;;  %v2141_v20 = vadd.f32 %v2140_v62, %v2139_v43 }
 0x6bd   :  { %v2147_v34 = vrot.slane %v2146_v27, 2  ;;  %v1941_v12 = vmul.f32 1.442695, %v1910_v63  ;;  %v2036_v2 = vadd.f32 %v2035_v7, %v5993_v39  ;;  %v2083_v15 = vmul.f32 %v4888_v41, %v5904_v40 }
 0x6be   :  { %v2173_v53 = vrot.slane %v2172_v22, 4  ;;  %v2129_v23 = vadd.f32 %v2128_v24, %v2127_v5  ;;  %v2135_v17 = vrot.slane %v2134_v46, 1  ;;  %v2244_v49 = vsel %vm780_vm3, %v2122_v28, %v2115_v9 }
 0x6bf   :  { %4893 = vpow2.f32 %v1941_v12  ;;  %v2037_v19 = vrot.slane %v2036_v2, 2  ;;  %v2167_v35 = vadd.f32 %v2166_v61, %v2165_v42  ;;  %v2179_v38 = vsel %vm145_vm2, %v2103_v52, 0.0 }
 0x6c0   :  { %v2154_v29 = vrot.slane %v2153_v10, 2  ;;  %v2104_v48 = vmul.f32 %v5999_v30, %v2082_v21  ;;  %v2142_v11 = vrot.slane %v2141_v20, 1  ;;  %v2148_v25 = vadd.f32 %v2147_v34, %v2146_v27 }
 0x6c1   :  { %v4890_v14 = vpop.eup %4889  ;;  %v2038_v51 = vadd.f32 %v2037_v19, %v2036_v2  ;;  %v2105_v40 = vmul.f32 %v5999_v30, %v2083_v15  ;;  %v2174_v44 = vadd.f32 %v2173_v53, %v2172_v22  ;;  %v2245_v47 = vsel %vm782_vm4, %v2129_v23, %v2244_v49 }
 0x6c2   :  { %v6032_v39 = vpop.eup %4891  ;;  %v2078_v7 = vmul.f32 %v4890_v14, %v5968_v4  ;;  %v2180_v5 = vrot.slane %v2179_v38, 4  ;;  %v2136_v42 = vadd.f32 %v2135_v17, %v2134_v46  ;;  %v2155_v45 = vadd.f32 %v2154_v29, %v2153_v10 }
 0x6c3   :  { %v2039_v61 = vrot.slane %v2038_v51, 1  ;;  %v2041_v50 = vsel %vm145_vm2, %v6032_v39, 0.0  ;;  %v2168_v59 = vrot.slane %v2167_v35, 2  ;;  %v2143_v8 = vadd.f32 %v2142_v11, %v2141_v20 }
 0x6c4   :  { %v2100_v57 = vmul.f32 %v5985_v55, %v2078_v7  ;;  %v2042_v18 = vrot.slane %v2041_v50, 4  ;;  %v2149_v26 = vrot.slane %v2148_v25, 1  ;;  %v2246_v22 = vsel %vm784_vm5, %v2136_v42, %v2245_v47 }
 0x6c5   :  { %v6040_v43 = vpop.eup %4893  ;;  %v2040_v4 = vadd.f32 %v2039_v61, %v2038_v51  ;;  %v2186_v28 = vsel %vm145_vm2, %v2104_v48, 0.0  ;;  %v2175_v62 = vrot.slane %v2174_v44, 2  ;;  %v2156_v3 = vrot.slane %v2155_v45, 1 }
 0x6c6   :  { %v2158_v9 = vsel %vm145_vm2, %v2100_v57, 0.0  ;;  %v2043_v0 = vadd.f32 %v2042_v18, %v2041_v50  ;;  %v2048_v31 = vsel %vm145_vm2, %v6040_v43, 0.0  ;;  %v2247_v41 = vsel %vm786_vm6, %v2143_v8, %v2246_v22 }
 0x6c7   :  { %v2159_v24 = vrot.slane %v2158_v9, 4  ;;  %v2049_v55 = vrot.slane %v2048_v31, 4  ;;  %4895 = vrcp.f32 %v2040_v4  ;;  %v2181_v27 = vadd.f32 %v2180_v5, %v2179_v38 }
 0x6c8   :  { %v2044_v46 = vrot.slane %v2043_v0, 2  ;;  %v2187_v52 = vrot.slane %v2186_v28, 4  ;;  %v2193_v10 = vsel %vm145_vm2, %v2105_v40, 0.0  ;;  %v2150_v20 = vadd.f32 %v2149_v26, %v2148_v25 }
 0x6c9   :  { %v2160_v63 = vadd.f32 %v2159_v24, %v2158_v9  ;;  %v2050_v21 = vadd.f32 %v2049_v55, %v2048_v31  ;;  %v2169_v15 = vadd.f32 %v2168_v59, %v2167_v35  ;;  %v2176_v53 = vadd.f32 %v2175_v62, %v2174_v44 }
 0x6ca   :  { %v2045_v34 = vadd.f32 %v2044_v46, %v2043_v0  ;;  %v2248_v23 = vsel %vm788_vm7, %v2150_v20, %v2247_v41  ;;  %v2182_v49 = vrot.slane %v2181_v27, 2  ;;  %v2194_v19 = vrot.slane %v2193_v10, 4 }
 0x6cb   :  { %v2161_v12 = vrot.slane %v2160_v63, 2  ;;  %v2051_v2 = vrot.slane %v2050_v21, 2  ;;  %v2157_v14 = vadd.f32 %v2156_v3, %v2155_v45  ;;  %v2188_v11 = vadd.f32 %v2187_v52, %v2186_v28 }
 0x6cc   :  { %v2046_v17 = vrot.slane %v2045_v34, 1  ;;  %v2170_v5 = vrot.slane %v2169_v15, 1  ;;  %v2183_v44 = vadd.f32 %v2182_v49, %v2181_v27  ;;  %v2195_v42 = vadd.f32 %v2194_v19, %v2193_v10 }
 0x6cd   :  { %v4896_v29 = vpop.eup %4895  ;;  %v2162_v48 = vadd.f32 %v2161_v12, %v2160_v63  ;;  %v2052_v38 = vadd.f32 %v2051_v2, %v2050_v21  ;;  %v2249_v25 = vsel %vm790_vm8, %v2157_v14, %v2248_v23  ;;  %v2177_v57 = vrot.slane %v2176_v53, 1 }
 0x6ce   :  { %v2047_v51 = vadd.f32 %v2046_v17, %v2045_v34  ;;  %v2084_v7 = vmul.f32 %v4896_v29, %v5912_v54  ;;  %v2189_v45 = vrot.slane %v2188_v11, 2  ;;  %v2184_v8 = vrot.slane %v2183_v44, 1 }
 0x6cf   :  { %v2163_v40 = vrot.slane %v2162_v48, 1  ;;  %v2053_v47 = vrot.slane %v2052_v38, 1  ;;  %v2196_v26 = vrot.slane %v2195_v42, 2  ;;  %v2171_v22 = vadd.f32 %v2170_v5, %v2169_v15 }
 0x6d0   :  { %4897 = vrcp.f32 %v2047_v51  ;;  %v2106_v35 = vmul.f32 %v5999_v30, %v2084_v7  ;;  %v2178_v4 = vadd.f32 %v2177_v57, %v2176_v53  ;;  %v2190_v9 = vadd.f32 %v2189_v45, %v2188_v11 }
 0x6d1   :  { %v2164_v61 = vadd.f32 %v2163_v40, %v2162_v48  ;;  %v2054_v50 = vadd.f32 %v2053_v47, %v2052_v38  ;;  %v2185_v55 = vadd.f32 %v2184_v8, %v2183_v44  ;;  %v2197_v62 = vadd.f32 %v2196_v26, %v2195_v42 }
 0x6d2   :  { %v2200_v18 = vsel %vm145_vm2, %v2106_v35, 0.0  ;;  %v2191_v46 = vrot.slane %v2190_v9, 1  ;;  %v2251_v27 = vsel %vm780_vm3, %v2178_v4, %v2171_v22  ;;  %v4748_v35 = vld [vmem:[%s6590_s4 + $0x1] ss:$0 sm:$0xff] }
 0x6d3   :  { %v2250_v59 = vsel %vm792_vm9, %v2164_v61, %v2249_v25  ;;  %4899 = vrcp.f32 %v2054_v50  ;;  %v2201_v54 = vrot.slane %v2200_v18, 4  ;;  %v2198_v20 = vrot.slane %v2197_v62, 1 }
 0x6d4   :  { %4643 = vmatmul.msk.f32.vlgmr.msrb.gmra.mxu3 %vm145_vm2, %v2250_v59  ;;  %v2192_v12 = vadd.f32 %v2191_v46, %v2190_v9  ;;  %v2350_v46 = vld [vmem:[#allocation6 + $0x40] sm:$0xff] }
 0x6d5   :  { %v2202_v0 = vadd.f32 %v2201_v54, %v2200_v18  ;;  %v2199_v49 = vadd.f32 %v2198_v20, %v2197_v62 }
 0x6d6   :  { %v4898_v31 = vpop.eup %4897 }
 0x6d7   :  { %v2085_v28 = vmul.f32 %v4898_v31, %v6032_v39  ;;  %v2203_v24 = vrot.slane %v2202_v0, 2  ;;  %v2252_v39 = vsel %vm782_vm4, %v2185_v55, %v2251_v27 }
 0x6d8   :  { %v2253_v17 = vsel %vm784_vm5, %v2192_v12, %v2252_v39 }
 0x6d9   :  { %v4900_v3 = vpop.eup %4899  ;;  %v2107_v41 = vmul.f32 %v5999_v30, %v2085_v28  ;;  %v2204_v21 = vadd.f32 %v2203_v24, %v2202_v0  ;;  %v2254_v14 = vsel %vm786_vm6, %v2199_v49, %v2253_v17  ;;  %v2352_v17 = vld [vmem:[#allocation6 + $0x50] sm:$0xff] }
 0x6da   :  { %v2086_v63 = vmul.f32 %v4900_v3, %v6040_v43 }
 0x6db   :  { %v2207_v52 = vsel %vm145_vm2, %v2107_v41, 0.0  ;;  %v2205_v53 = vrot.slane %v2204_v21, 1  ;;  %v2351_v41 = vld [vmem:[#allocation6 + $0x48] sm:$0xff] }
 0x6dc   :  { %v2108_v10 = vmul.f32 %v5999_v30, %v2086_v63  ;;  %v2208_v34 = vrot.slane %v2207_v52, 4  ;;  %v2405_v27 = vunpack.c.l.b16 %v2351_v41  ;;  %v2406_v63 = vunpack.c.h.b16 %v2351_v41 }
 0x6dd   :  { %v2206_v48 = vadd.f32 %v2205_v53, %v2204_v21  ;;  %v2403_v21 = vunpack.c.l.b16 %v2350_v46 }
 0x6de   :  { %v2209_v2 = vadd.f32 %v2208_v34, %v2207_v52  ;;  %v2214_v15 = vsel %vm145_vm2, %v2108_v10, 0.0  ;;  %v2404_v52 = vunpack.c.h.b16 %v2350_v46  ;;  %v2421_v34 = vpack.c.b16 %v2405_v27, %v2405_v27 }
 0x6df   :  { %v2215_v23 = vrot.slane %v2214_v15, 4  ;;  %v2255_v51 = vsel %vm788_vm7, %v2206_v48, %v2254_v14  ;;  %v2422_v39 = vpack.c.b16 %v2406_v63, %v2406_v63  ;;  %v2419_v12 = vpack.c.b16 %v2403_v21, %v2403_v21 }
 0x6e0   :  { %v2210_v19 = vrot.slane %v2209_v2, 2  ;;  %v2420_v53 = vpack.c.b16 %v2404_v52, %v2404_v52  ;;  %v2445_v49 = vand.u32 %v2421_v34, %v5663_v13 }
 0x6e1   :  { %v2216_v43 = vadd.f32 %v2215_v23, %v2214_v15 }
 0x6e2   :  { %v2211_v29 = vadd.f32 %v2210_v19, %v2209_v2  ;;  %v2353_v2 = vld [vmem:[#allocation6 + $0x58] sm:$0xff]  ;;  %v2448_v19 = vand.u32 %v2422_v39, %v5663_v13  ;;  %v2442_v48 = vand.u32 %v2420_v53, %v5663_v13  ;;  %2521 = vmatpush.bf16.msra.mxu2 %v2445_v49 }
 0x6e3   :  { %v2217_v30 = vrot.slane %v2216_v43, 2  ;;  %v2409_v23 = vunpack.c.l.b16 %v2353_v2 }
 0x6e4   :  { %v2212_v38 = vrot.slane %v2211_v29, 1  ;;  %2535 = vmatpush.bf16.msra.mxu3 %v2448_v19  ;;  %2507 = vmatpush.bf16.msrb.mxu1 %v2442_v48 }
 0x6e5   :  { %v2218_v11 = vadd.f32 %v2217_v30, %v2216_v43  ;;  %v2439_v43 = vand.u32 %v2419_v12, %v5663_v13  ;;  %v2425_v30 = vpack.c.b16 %v2409_v23, %v2409_v23 }
 0x6e6   :  { %v2213_v7 = vadd.f32 %v2212_v38, %v2211_v29  ;;  %v2410_v29 = vunpack.c.h.b16 %v2353_v2  ;;  %v2357_v2 = vld [vmem:[#allocation6 + $0x78] sm:$0xff] }
 0x6e7   :  { %v2219_v40 = vrot.slane %v2218_v11, 1  ;;  %2493 = vmatpush.bf16.msrb.mxu0 %v2439_v43  ;;  %v2417_v53 = vunpack.c.l.b16 %v2357_v2  ;;  %v2418_v23 = vunpack.c.h.b16 %v2357_v2 }
 0x6e8   :  { %v2256_v25 = vsel %vm790_vm8, %v2213_v7, %v2255_v51  ;;  %v2407_v51 = vunpack.c.l.b16 %v2352_v17  ;;  %v2408_v7 = vunpack.c.h.b16 %v2352_v17 }
 0x6e9   :  { %v2220_v47 = vadd.f32 %v2219_v40, %v2218_v11  ;;  %v2426_v11 = vpack.c.b16 %v2410_v29, %v2410_v29  ;;  %v2457_v40 = vand.u32 %v2425_v30, %v5663_v13  ;;  %v2433_v19 = vpack.c.b16 %v2417_v53, %v2417_v53  ;;  %v2764_v53 = vld [vmem:[#allocation9 + $0x68] sm:$0xff] }
 0x6ea   :  { %v2434_v43 = vpack.c.b16 %v2418_v23, %v2418_v23 }
 0x6eb   :  { %v2257_v5 = vsel %vm792_vm9, %v2220_v47, %v2256_v25  ;;  %v2460_v25 = vand.u32 %v2426_v11, %v5663_v13  ;;  %v2423_v47 = vpack.c.b16 %v2407_v51, %v2407_v51  ;;  %2577 = vmatpush.bf16.msrb.mxu2 %v2457_v40  ;;  %v2481_v48 = vand.u32 %v2433_v19, %v5663_v13  ;;  %v2760_v51 = vld [vmem:[#allocation9 + $0x48] sm:$0xff] }
 0x6ec   :  { %4644 = vmatmul.msk.f32.gmra.mxu3 %vm145_vm2, %v2257_v5  ;;  %v2424_v5 = vpack.c.b16 %v2408_v7, %v2408_v7  ;;  %v2484_v30 = vand.u32 %v2434_v43, %v5663_v13  ;;  %v2782_v7 = vunpack.c.l.b16 %v2760_v51 }
 0x6ed   :  { %2591 = vmatpush.bf16.msrb.mxu3 %v2460_v25  ;;  %v2759_v25 = vld [vmem:[#allocation9 + $0x40] sm:$0xff] }
 0x6ee   :  { %v2798_v40 = vpack.c.b16 %v2782_v7, %v2782_v7 }
 0x757   :  { %v2282_v44 = vpop.f32.mrf.mxu3 }
 0x758   :  { %v2283_v42 = vadd.f32 %v4748_v35, %v2282_v44  ;;  %v2451_v44 = vand.u32 %v2423_v47, %v5663_v13  ;;  %v2783_v47 = vunpack.c.h.b16 %v2760_v51 }
 0x75a   :  { %v2288_v61 = vadd.f32 %v2283_v42, %v5756_v58  ;;  %v2454_v42 = vand.u32 %v2424_v5, %v5663_v13  ;;  %2549 = vmatpush.bf16.msra.mxu0 %v2451_v44  ;;  %v2780_v5 = vunpack.c.l.b16 %v2759_v25 }
 0x75c   :  { %v2294_v50 = vsel %vm145_vm2, %v2288_v61, 0.0  ;;  %2563 = vmatpush.bf16.msra.mxu1 %v2454_v42  ;;  %v2796_v44 = vpack.c.b16 %v2780_v5, %v2780_v5  ;;  %v2781_v42 = vunpack.c.h.b16 %v2759_v25 }
 0x75d   :  { %2295 = vadd.xlane.f32.xlu0 %v2294_v50 }
 0x76f   :  { %v2285_v57 = vpop.f32.mrf.mxu3 }
 0x770   :  { %v2286_v45 = vadd.f32 %v4748_v35, %v2285_v57 }
 0x772   :  { %v2289_v18 = vadd.f32 %v2286_v45, %v5760_v1 }
 0x774   :  { %v2297_v59 = vsel %vm145_vm2, %v2289_v18, 0.0 }
 0x775   :  { %2298 = vadd.xlane.f32.xlu2 %v2297_v59 }
 0x7d0   :  { %v2296_v54 = vpop.xlane.xlu0 %2295 }
 0x7d1   :  { %v2300_v8 = vmul.f32 %v2296_v54, %v5645_v16 }
 0x7d3   :  { %v6078_v26 = vsub.f32 %v2288_v61, %v2300_v8  ;;  %v2355_v8 = vld [vmem:[#allocation6 + $0x68] sm:$0xff] }
 0x7d5   :  { %v2304_v22 = vmul.f32 %v6078_v26, %v6078_v26 }
 0x7d7   :  { %v2306_v58 = vsel %vm145_vm2, %v2304_v22, 0.0  ;;  %v4749_v22 = vld [vmem:[%s6591_s5 + $0x1] ss:$0 sm:$0xff] }
 0x7d8   :  { %2307 = vadd.xlane.f32.xlu1 %v2306_v58 }
 0x7e8   :  { %v2299_v4 = vpop.xlane.xlu2 %2298 }
 0x7e9   :  { %v2301_v9 = vmul.f32 %v2299_v4, %v5645_v16  ;;  %v2354_v4 = vld [vmem:[#allocation6 + $0x60] sm:$0xff] }
 0x7eb   :  { %v6084_v0 = vsub.f32 %v2289_v18, %v2301_v9 }
 0x7ed   :  { %v2305_v1 = vmul.f32 %v6084_v0, %v6084_v0 }
 0x7ef   :  { %v2309_v31 = vsel %vm145_vm2, %v2305_v1, 0.0  ;;  %v2413_v1 = vunpack.c.l.b16 %v2355_v8 }
 0x7f0   :  { %2310 = vadd.xlane.f32.xlu0 %v2309_v31  ;;  %v2414_v31 = vunpack.c.h.b16 %v2355_v8 }
 0x7f1   :  { %v2429_v27 = vpack.c.b16 %v2413_v1, %v2413_v1 }
 0x7f2   :  { %v2430_v63 = vpack.c.b16 %v2414_v31, %v2414_v31 }
 0x7f3   :  { %v2469_v34 = vand.u32 %v2429_v27, %v5663_v13 }
 0x7f4   :  { %v2472_v39 = vand.u32 %v2430_v63, %v5663_v13 }
 0x84b   :  { %v2308_v28 = vpop.xlane.xlu1 %2307 }
 0x84c   :  { %v2312_v24 = vmul.f32 %v2308_v28, %v5645_v16 }
 0x84e   :  { %v2314_v55 = vadd.f32 1e-05, %v2312_v24  ;;  %v2411_v24 = vunpack.c.l.b16 %v2354_v4 }
 0x850   :  { %4901 = vrsqrt.f32 %v2314_v55  ;;  %vm2322_vm12 = vweird.f32 %v2314_v55 }
 0x856   :  { %v4902_v62 = vpop.eup %4901 }
 0x857   :  { %v2317_v3 = vmul.f32 %v4902_v62, %v2314_v55  ;;  %vm2323_vm11 = vweird.f32 %v4902_v62  ;;  %v2412_v55 = vunpack.c.h.b16 %v2354_v4  ;;  %v6137_v4 = vld [vmem:[#allocation8 + $0x10] sm:$0xff] }
 0x858   :  { %vm2324_vm13 = vmor %vm2322_vm12, %vm2323_vm11 }
 0x859   :  { %v2318_v10 = vmul.f32 %v4902_v62, %v2317_v3  ;;  %v2428_v21 = vpack.c.b16 %v2412_v55, %v2412_v55 }
 0x85b   :  { %v2319_v38 = vmul.f32 0.5, %v2318_v10 }
 0x85d   :  { %v2320_v35 = vsub.f32 1.5, %v2319_v38 }
 0x85f   :  { %v2321_v50 = vmul.f32 %v4902_v62, %v2320_v35  ;;  %v2799_v35 = vpack.c.b16 %v2783_v47, %v2783_v47  ;;  %v2367_v47 = vperm.slane %v6137_v4, 4 }
 0x861   :  { %v2325_v18 = vsel %vm2324_vm13, %v4902_v62, %v2321_v50  ;;  %v4750_v62 = vld [vmem:[%s6592_s6 + $0x1] ss:$0 sm:$0xff] }
 0x862   :  { %v2336_v58 = vmul.f32 %v2325_v18, %v6078_v26  ;;  %v2427_v26 = vpack.c.b16 %v2411_v24, %v2411_v24  ;;  %v2762_v50 = vld [vmem:[#allocation9 + $0x58] sm:$0xff]  ;;  %v2761_v18 = vld [vmem:[#allocation9 + $0x50] sm:$0xff]  ;;  %v2364_v24 = vperm.slane %v6137_v4, 1 }
 0x863   :  { %v2311_v20 = vpop.xlane.xlu0 %2310 }
 0x864   :  { %v2313_v15 = vmul.f32 %v2311_v20, %v5645_v16  ;;  %v2341_v3 = vmul.f32 %v4749_v22, %v2336_v58  ;;  %v2463_v12 = vand.u32 %v2427_v26, %v5663_v13  ;;  %v2785_v58 = vunpack.c.h.b16 %v2761_v18 }
 0x866   :  { %v2315_v14 = vadd.f32 1e-05, %v2313_v15  ;;  %v6107_v52 = vadd.f32 %v4750_v62, %v2341_v3  ;;  %v2356_v15 = vld [vmem:[#allocation6 + $0x70] sm:$0xff] }
 0x867   :  { %v2415_v17 = vunpack.c.l.b16 %v2356_v15  ;;  %v2416_v49 = vunpack.c.h.b16 %v2356_v15 }
 0x868   :  { %4903 = vrsqrt.f32 %v2315_v14  ;;  %vm2332_vm15 = vweird.f32 %v2315_v14 }
 0x869   :  { %v2431_v29 = vpack.c.b16 %v2415_v17, %v2415_v17 }
 0x86b   :  { %v2475_v38 = vand.u32 %v2431_v29, %v5663_v13 }
 0x86e   :  { %v4904_v61 = vpop.eup %4903 }
 0x86f   :  { %v2327_v57 = vmul.f32 %v4904_v61, %v2315_v14  ;;  %vm2333_vm14 = vweird.f32 %v4904_v61  ;;  %v2432_v14 = vpack.c.b16 %v2416_v49, %v2416_v49 }
 0x870   :  { %vm2334_vm0 = vmor %vm2332_vm15, %vm2333_vm14 }
 0x871   :  { %v2328_v45 = vmul.f32 %v4904_v61, %v2327_v57  ;;  %v2478_v11 = vand.u32 %v2432_v14, %v5663_v13  ;;  %v2786_v57 = vunpack.c.l.b16 %v2762_v50 }
 0x873   :  { %v2329_v59 = vmul.f32 0.5, %v2328_v45  ;;  %v2802_v45 = vpack.c.b16 %v2786_v57, %v2786_v57 }
 0x875   :  { %v2330_v54 = vsub.f32 1.5, %v2329_v59  ;;  %v2787_v59 = vunpack.c.h.b16 %v2762_v50 }
 0x877   :  { %v2331_v9 = vmul.f32 %v4904_v61, %v2330_v54  ;;  %v2784_v54 = vunpack.c.l.b16 %v2761_v18  ;;  %v2803_v8 = vpack.c.b16 %v2787_v59, %v2787_v59 }
 0x879   :  { %v2335_v28 = vsel %vm2334_vm0, %v4904_v61, %v2331_v9  ;;  %v2797_v61 = vpack.c.b16 %v2781_v42, %v2781_v42  ;;  %v2801_v9 = vpack.c.b16 %v2785_v58, %v2785_v58 }
 0x87a   :  { %v2337_v41 = vmul.f32 %v2335_v28, %v6084_v0  ;;  %v2466_v0 = vand.u32 %v2428_v21, %v5663_v13  ;;  %v2363_v28 = vperm.slane %v6137_v4, 0 }
 0x87c   :  { %v2342_v46 = vmul.f32 %v4749_v22, %v2337_v41  ;;  %v2800_v22 = vpack.c.b16 %v2784_v54, %v2784_v54 }
 0x87e   :  { %v6109_v10 = vadd.f32 %v4750_v62, %v2342_v46 }
 0x880   :  { %v2348_v20 = vpack.c.bf16 %v6109_v10, %v6107_v52 }
 0x882   :  { %4647 = vmatmul.msk.bf16.vlgmr.msrb.gmra.mxu0 %vm145_vm2, %v2348_v20  ;;  %4648 = vmatmul.msk.bf16.vlgmr.msrb.gmra.mxu1 %vm145_vm2, %v2348_v20 }
 0x883   :  { %4649 = vmatmul.msk.bf16.vlgmr.msra.gmra.mxu2 %vm145_vm2, %v2348_v20  ;;  %4650 = vmatmul.msk.bf16.vlgmr.msra.gmra.mxu3 %vm145_vm2, %v2348_v20 }
 0x884   :  { %2633 = vmatpush.bf16.msra.mxu2 %v2469_v34  ;;  %2647 = vmatpush.bf16.msra.mxu3 %v2472_v39  ;;  %v2366_v34 = vperm.slane %v6137_v4, 3  ;;  %v2763_v39 = vld [vmem:[#allocation9 + $0x60] sm:$0xff] }
 0x885   :  { %2605 = vmatpush.bf16.msrb.mxu0 %v2463_v12  ;;  %2619 = vmatpush.bf16.msrb.mxu1 %v2466_v0  ;;  %v2788_v15 = vunpack.c.l.b16 %v2763_v39  ;;  %v2789_v19 = vunpack.c.h.b16 %v2763_v39 }
 0x887   :  { %v2804_v49 = vpack.c.b16 %v2788_v15, %v2788_v15 }
 0x892   :  { %4651 = vmatmul.msk.bf16.vlgmr.msra.gmra.mxu0 %vm145_vm2, %v2348_v20  ;;  %4652 = vmatmul.msk.bf16.vlgmr.msra.gmra.mxu1 %vm145_vm2, %v2348_v20 }
 0x893   :  { %4653 = vmatmul.msk.bf16.vlgmr.msrb.gmra.mxu2 %vm145_vm2, %v2348_v20  ;;  %4654 = vmatmul.msk.bf16.vlgmr.msrb.gmra.mxu3 %vm145_vm2, %v2348_v20 }
 0x894   :  { %2689 = vmatpush.bf16.msrb.mxu2 %v2481_v48  ;;  %2703 = vmatpush.bf16.msrb.mxu3 %v2484_v30  ;;  %v2790_v30 = vunpack.c.l.b16 %v2764_v53 }
 0x895   :  { %2661 = vmatpush.bf16.msra.mxu0 %v2475_v38  ;;  %2675 = vmatpush.bf16.msra.mxu1 %v2478_v11  ;;  %v2791_v38 = vunpack.c.h.b16 %v2764_v53  ;;  %v2805_v11 = vpack.c.b16 %v2789_v19, %v2789_v19 }
 0x896   :  { %v2806_v50 = vpack.c.b16 %v2790_v30, %v2790_v30 }
 0x897   :  { %v2807_v57 = vpack.c.b16 %v2791_v38, %v2791_v38 }
 0x8a2   :  { %4655 = vmatmul.msk.bf16.vlgmr.msrb.gmra.mxu0 %vm145_vm2, %v2348_v20  ;;  %4656 = vmatmul.msk.bf16.vlgmr.msrb.gmra.mxu1 %vm145_vm2, %v2348_v20 }
 0x8a3   :  { %4657 = vmatmul.msk.bf16.vlgmr.msra.gmra.mxu2 %vm145_vm2, %v2348_v20  ;;  %4658 = vmatmul.msk.bf16.vlgmr.msra.gmra.mxu3 %vm145_vm2, %v2348_v20 }
 0x8a4   :  { %2863 = vmatpush.bf16.xpose.msra.mxu2 %v2798_v40  ;;  %2877 = vmatpush.bf16.xpose.msra.mxu3 %v2799_v35 }
 0x8a5   :  { %2835 = vmatpush.bf16.xpose.msrb.mxu0 %v2796_v44  ;;  %2849 = vmatpush.bf16.xpose.msrb.mxu1 %v2797_v61  ;;  %v2368_v61 = vperm.slane %v6137_v4, 5 }
 0x8b2   :  { %4659 = vmatmul.msk.bf16.vlgmr.msra.gmra.mxu0 %vm145_vm2, %v2348_v20  ;;  %4660 = vmatmul.msk.bf16.vlgmr.msra.gmra.mxu1 %vm145_vm2, %v2348_v20 }
 0x8b3   :  { %4661 = vmatmul.msk.bf16.vlgmr.msrb.gmra.mxu2 %vm145_vm2, %v2348_v20  ;;  %4662 = vmatmul.msk.bf16.vlgmr.msrb.gmra.mxu3 %vm145_vm2, %v2348_v20  ;;  %v2365_v20 = vperm.slane %v6137_v4, 2 }
 0x8b4   :  { %2919 = vmatpush.bf16.xpose.msrb.mxu2 %v2802_v45  ;;  %2933 = vmatpush.bf16.xpose.msrb.mxu3 %v2803_v8 }
 0x8b5   :  { %2891 = vmatpush.bf16.xpose.msra.mxu0 %v2800_v22  ;;  %2905 = vmatpush.bf16.xpose.msra.mxu1 %v2801_v9 }
 0x8ff   :  { %v2495_v1 = vpop.f32.mrf.mxu0  ;;  %v2509_v31 = vpop.f32.mrf.mxu1 }
 0x900   :  { %v2496_v55 = vadd.f32 %v2495_v1, %v2363_v28  ;;  %v2510_v62 = vadd.f32 %v2509_v31, %v2364_v24 }
 0x902   :  { %v2710_v21 = vmax.f32 %v2496_v55, 0.0  ;;  %v2711_v12 = vmax.f32 %v2510_v62, 0.0  ;;  %v2370_v55 = vperm.slane %v6137_v4, 7  ;;  %v2765_v62 = vld [vmem:[#allocation9 + $0x70] sm:$0xff] }
 0x906   :  { %v2523_v3 = vpop.f32.mrf.mxu2  ;;  %v2537_v41 = vpop.f32.mrf.mxu3 }
 0x907   :  { %v2497_v46 = vpop.f32.mrf.mxu0  ;;  %v2511_v27 = vpop.f32.mrf.mxu1  ;;  %v2524_v43 = vadd.f32 %v2523_v3, %v2365_v20  ;;  %v2538_v29 = vadd.f32 %v2537_v41, %v2366_v34 }
 0x908   :  { %v2498_v63 = vadd.f32 %v2497_v46, %v2363_v28  ;;  %v2512_v26 = vadd.f32 %v2511_v27, %v2364_v24  ;;  %v2369_v24 = vperm.slane %v6137_v4, 6  ;;  %v2792_v27 = vunpack.c.l.b16 %v2765_v62 }
 0x909   :  { %v2712_v5 = vmax.f32 %v2524_v43, 0.0  ;;  %v2713_v35 = vmax.f32 %v2538_v29, 0.0 }
 0x90a   :  { %v2726_v0 = vmax.f32 %v2498_v63, 0.0  ;;  %v2727_v2 = vmax.f32 %v2512_v26, 0.0  ;;  %v2766_v63 = vld [vmem:[#allocation9 + $0x78] sm:$0xff] }
 0x90b   :  { %v2794_v15 = vunpack.c.l.b16 %v2766_v63  ;;  %v2795_v53 = vunpack.c.h.b16 %v2766_v63 }
 0x90c   :  { %v2742_v23 = vpack.c.bf16 %v2726_v0, %v2710_v21  ;;  %v2743_v17 = vpack.c.bf16 %v2727_v2, %v2711_v12 }
 0x90e   :  { %v2525_v14 = vpop.f32.mrf.mxu2  ;;  %v2539_v48 = vpop.f32.mrf.mxu3  ;;  %2836 = vmatmul.bf16.vlgmr.msrb.gmra.mxu0 %v2742_v23  ;;  %2850 = vmatmul.bf16.vlgmr.msrb.gmra.mxu1 %v2743_v17 }
 0x90f   :  { %v2526_v51 = vadd.f32 %v2525_v14, %v2365_v20  ;;  %v2540_v7 = vadd.f32 %v2539_v48, %v2366_v34  ;;  %v2551_v40 = vpop.f32.mrf.mxu0  ;;  %v2565_v25 = vpop.f32.mrf.mxu1  ;;  %2947 = vmatpush.bf16.xpose.msrb.mxu0 %v2804_v49  ;;  %2961 = vmatpush.bf16.xpose.msrb.mxu1 %v2805_v11  ;;  %v2808_v20 = vpack.c.b16 %v2792_v27, %v2792_v27  ;;  %v2793_v34 = vunpack.c.h.b16 %v2765_v62  ;;  %v6147_v49 = vld [vmem:[#allocation8 + $0x18] sm:$0xff] }
 0x910   :  { %v2552_v59 = vadd.f32 %v2551_v40, %v2367_v47  ;;  %v2566_v54 = vadd.f32 %v2565_v25, %v2368_v61  ;;  %v2371_v38 = vperm.slane %v6147_v49, 0  ;;  %v2372_v11 = vperm.slane %v6147_v49, 1 }
 0x911   :  { %v2728_v44 = vmax.f32 %v2526_v51, 0.0  ;;  %v2729_v42 = vmax.f32 %v2540_v7, 0.0  ;;  %v2809_v23 = vpack.c.b16 %v2793_v34, %v2793_v34  ;;  %v2810_v51 = vpack.c.b16 %v2794_v15, %v2794_v15 }
 0x912   :  { %v2714_v28 = vmax.f32 %v2552_v59, 0.0  ;;  %v2715_v3 = vmax.f32 %v2566_v54, 0.0  ;;  %v2811_v7 = vpack.c.b16 %v2795_v53, %v2795_v53 }
 0x913   :  { %v2744_v45 = vpack.c.bf16 %v2728_v44, %v2712_v5  ;;  %v2745_v18 = vpack.c.bf16 %v2729_v42, %v2713_v35 }
 0x915   :  { %2864 = vmatmul.bf16.vlgmr.msra.gmra.mxu2 %v2744_v45  ;;  %2878 = vmatmul.bf16.vlgmr.msra.gmra.mxu3 %v2745_v18  ;;  %v2373_v45 = vperm.slane %v6147_v49, 2  ;;  %v2374_v18 = vperm.slane %v6147_v49, 3 }
 0x916   :  { %v2579_v8 = vpop.f32.mrf.mxu2  ;;  %v2593_v22 = vpop.f32.mrf.mxu3  ;;  %2975 = vmatpush.bf16.xpose.msra.mxu2 %v2806_v50  ;;  %2989 = vmatpush.bf16.xpose.msra.mxu3 %v2807_v57 }
 0x917   :  { %v2553_v58 = vpop.f32.mrf.mxu0  ;;  %v2567_v9 = vpop.f32.mrf.mxu1  ;;  %v2580_v39 = vadd.f32 %v2579_v8, %v2369_v24  ;;  %v2594_v12 = vadd.f32 %v2593_v22, %v2370_v55 }
 0x918   :  { %v2554_v1 = vadd.f32 %v2553_v58, %v2367_v47  ;;  %v2568_v31 = vadd.f32 %v2567_v9, %v2368_v61 }
 0x919   :  { %v2716_v29 = vmax.f32 %v2580_v39, 0.0  ;;  %v2717_v14 = vmax.f32 %v2594_v12, 0.0 }
 0x91a   :  { %v2730_v41 = vmax.f32 %v2554_v1, 0.0  ;;  %v2731_v46 = vmax.f32 %v2568_v31, 0.0 }
 0x91c   :  { %v2746_v26 = vpack.c.bf16 %v2730_v41, %v2714_v28  ;;  %v2747_v21 = vpack.c.bf16 %v2731_v46, %v2715_v3 }
 0x91e   :  { %v2581_v0 = vpop.f32.mrf.mxu2  ;;  %v2595_v2 = vpop.f32.mrf.mxu3  ;;  %2892 = vmatmul.bf16.vlgmr.msra.gmra.mxu0 %v2746_v26  ;;  %2906 = vmatmul.bf16.vlgmr.msra.gmra.mxu1 %v2747_v21  ;;  %v2375_v21 = vperm.slane %v6147_v49, 4 }
 0x91f   :  { %v2582_v4 = vadd.f32 %v2581_v0, %v2369_v24  ;;  %v2596_v17 = vadd.f32 %v2595_v2, %v2370_v55  ;;  %v2607_v19 = vpop.f32.mrf.mxu0  ;;  %v2621_v43 = vpop.f32.mrf.mxu1  ;;  %3003 = vmatpush.bf16.xpose.msra.mxu0 %v2808_v20  ;;  %3017 = vmatpush.bf16.xpose.msra.mxu1 %v2809_v23  ;;  %v2376_v20 = vperm.slane %v6147_v49, 5 }
 0x920   :  { %v2608_v47 = vadd.f32 %v2607_v19, %v2371_v38  ;;  %v2622_v5 = vadd.f32 %v2621_v43, %v2372_v11  ;;  %v2377_v19 = vperm.slane %v6147_v49, 6  ;;  %v2378_v43 = vperm.slane %v6147_v49, 7 }
 0x921   :  { %v2732_v48 = vmax.f32 %v2582_v4, 0.0  ;;  %v2733_v30 = vmax.f32 %v2596_v17, 0.0 }
 0x922   :  { %v2718_v59 = vmax.f32 %v2608_v47, 0.0  ;;  %v2719_v54 = vmax.f32 %v2622_v5, 0.0 }
 0x923   :  { %v2748_v40 = vpack.c.bf16 %v2732_v48, %v2716_v29  ;;  %v2749_v25 = vpack.c.bf16 %v2733_v30, %v2717_v14 }
 0x925   :  { %2920 = vmatmul.bf16.vlgmr.msrb.gmra.mxu2 %v2748_v40  ;;  %2934 = vmatmul.bf16.vlgmr.msrb.gmra.mxu3 %v2749_v25 }
 0x926   :  { %v2635_v35 = vpop.f32.mrf.mxu2  ;;  %v2649_v44 = vpop.f32.mrf.mxu3  ;;  %3031 = vmatpush.bf16.xpose.msrb.mxu2 %v2810_v51  ;;  %3045 = vmatpush.bf16.xpose.msrb.mxu3 %v2811_v7 }
 0x927   :  { %v2609_v42 = vpop.f32.mrf.mxu0  ;;  %v2623_v61 = vpop.f32.mrf.mxu1  ;;  %v2636_v1 = vadd.f32 %v2635_v35, %v2373_v45  ;;  %v2650_v31 = vadd.f32 %v2649_v44, %v2374_v18 }
 0x928   :  { %v2610_v50 = vadd.f32 %v2609_v42, %v2371_v38  ;;  %v2624_v57 = vadd.f32 %v2623_v61, %v2372_v11 }
 0x929   :  { %v2720_v46 = vmax.f32 %v2636_v1, 0.0  ;;  %v2721_v27 = vmax.f32 %v2650_v31, 0.0 }
 0x92a   :  { %v2734_v8 = vmax.f32 %v2610_v50, 0.0  ;;  %v2735_v22 = vmax.f32 %v2624_v57, 0.0 }
 0x92c   :  { %v2750_v58 = vpack.c.bf16 %v2734_v8, %v2718_v59  ;;  %v2751_v9 = vpack.c.bf16 %v2735_v22, %v2719_v54  ;;  %v4751_v54 = vld [vmem:[%s6596_s10 + $0x1] ss:$0 sm:$0xff] }
 0x92e   :  { %v2637_v28 = vpop.f32.mrf.mxu2  ;;  %v2651_v24 = vpop.f32.mrf.mxu3  ;;  %2948 = vmatmul.bf16.vlgmr.msrb.gmra.mxu0 %v2750_v58  ;;  %2962 = vmatmul.bf16.vlgmr.msrb.gmra.mxu1 %v2751_v9 }
 0x92f   :  { %v2638_v55 = vadd.f32 %v2637_v28, %v2373_v45  ;;  %v2652_v62 = vadd.f32 %v2651_v24, %v2374_v18  ;;  %v2663_v3 = vpop.f32.mrf.mxu0  ;;  %v2677_v41 = vpop.f32.mrf.mxu1 }
 0x930   :  { %v2664_v12 = vadd.f32 %v2663_v3, %v2375_v21  ;;  %v2678_v0 = vadd.f32 %v2677_v41, %v2376_v20 }
 0x931   :  { %v2736_v63 = vmax.f32 %v2638_v55, 0.0  ;;  %v2737_v26 = vmax.f32 %v2652_v62, 0.0 }
 0x932   :  { %v2722_v29 = vmax.f32 %v2664_v12, 0.0  ;;  %v2723_v14 = vmax.f32 %v2678_v0, 0.0 }
 0x933   :  { %v2752_v34 = vpack.c.bf16 %v2736_v63, %v2720_v46  ;;  %v2753_v39 = vpack.c.bf16 %v2737_v26, %v2721_v27 }
 0x935   :  { %2976 = vmatmul.bf16.vlgmr.msra.gmra.mxu2 %v2752_v34  ;;  %2990 = vmatmul.bf16.vlgmr.msra.gmra.mxu3 %v2753_v39 }
 0x936   :  { %v2691_v2 = vpop.f32.mrf.mxu2  ;;  %v2705_v15 = vpop.f32.mrf.mxu3 }
 0x937   :  { %v2665_v53 = vpop.f32.mrf.mxu0  ;;  %v2679_v23 = vpop.f32.mrf.mxu1  ;;  %v2692_v51 = vadd.f32 %v2691_v2, %v2377_v19  ;;  %v2706_v7 = vadd.f32 %v2705_v15, %v2378_v43 }
 0x938   :  { %v2666_v4 = vadd.f32 %v2665_v53, %v2375_v21  ;;  %v2680_v17 = vadd.f32 %v2679_v23, %v2376_v20 }
 0x939   :  { %v2724_v35 = vmax.f32 %v2692_v51, 0.0  ;;  %v2725_v44 = vmax.f32 %v2706_v7, 0.0 }
 0x93a   :  { %v2738_v48 = vmax.f32 %v2666_v4, 0.0  ;;  %v2739_v30 = vmax.f32 %v2680_v17, 0.0 }
 0x93c   :  { %v2754_v38 = vpack.c.bf16 %v2738_v48, %v2722_v29  ;;  %v2755_v11 = vpack.c.bf16 %v2739_v30, %v2723_v14 }
 0x93e   :  { %v2693_v40 = vpop.f32.mrf.mxu2  ;;  %v2707_v25 = vpop.f32.mrf.mxu3  ;;  %3004 = vmatmul.bf16.vlgmr.msra.gmra.mxu0 %v2754_v38  ;;  %3018 = vmatmul.bf16.vlgmr.msra.gmra.mxu1 %v2755_v11 }
 0x93f   :  { %v2694_v47 = vadd.f32 %v2693_v40, %v2377_v19  ;;  %v2708_v5 = vadd.f32 %v2707_v25, %v2378_v43 }
 0x941   :  { %v2740_v42 = vmax.f32 %v2694_v47, 0.0  ;;  %v2741_v61 = vmax.f32 %v2708_v5, 0.0 }
 0x943   :  { %v2756_v50 = vpack.c.bf16 %v2740_v42, %v2724_v35  ;;  %v2757_v49 = vpack.c.bf16 %v2741_v61, %v2725_v44 }
 0x945   :  { %3032 = vmatmul.bf16.vlgmr.msrb.gmra.mxu2 %v2756_v50  ;;  %3046 = vmatmul.bf16.vlgmr.msrb.gmra.mxu3 %v2757_v49 }
 0x98b   :  { %v2837_v57 = vpop.f32.mrf.mxu0  ;;  %v2851_v45 = vpop.f32.mrf.mxu1 }
 0x98c   :  { %v2838_v58 = vadd.f32 %v4751_v54, %v2837_v57 }
 0x98e   :  { %v2852_v31 = vadd.f32 %v2851_v45, %v2838_v58 }
 0x993   :  { %v2839_v18 = vpop.f32.mrf.mxu0  ;;  %v2853_v59 = vpop.f32.mrf.mxu1 }
 0x994   :  { %v2840_v62 = vadd.f32 %v4751_v54, %v2839_v18 }
 0x996   :  { %v2854_v46 = vadd.f32 %v2853_v59, %v2840_v62 }
 0x998   :  { %v2865_v8 = vpop.f32.mrf.mxu2  ;;  %v2879_v22 = vpop.f32.mrf.mxu3 }
 0x999   :  { %v2866_v28 = vadd.f32 %v2865_v8, %v2852_v31 }
 0x99b   :  { %v2893_v9 = vpop.f32.mrf.mxu0  ;;  %v2907_v1 = vpop.f32.mrf.mxu1  ;;  %v2880_v3 = vadd.f32 %v2879_v22, %v2866_v28 }
 0x99d   :  { %v2894_v63 = vadd.f32 %v2893_v9, %v2880_v3 }
 0x99f   :  { %v2908_v34 = vadd.f32 %v2907_v1, %v2894_v63 }
 0x9a0   :  { %v2867_v24 = vpop.f32.mrf.mxu2  ;;  %v2881_v55 = vpop.f32.mrf.mxu3 }
 0x9a1   :  { %v2868_v26 = vadd.f32 %v2867_v24, %v2854_v46 }
 0x9a3   :  { %v2895_v41 = vpop.f32.mrf.mxu0  ;;  %v2909_v27 = vpop.f32.mrf.mxu1  ;;  %v2882_v39 = vadd.f32 %v2881_v55, %v2868_v26 }
 0x9a5   :  { %v2896_v2 = vadd.f32 %v2895_v41, %v2882_v39 }
 0x9a7   :  { %v2910_v17 = vadd.f32 %v2909_v27, %v2896_v2 }
 0x9a8   :  { %v2921_v21 = vpop.f32.mrf.mxu2  ;;  %v2935_v20 = vpop.f32.mrf.mxu3 }
 0x9a9   :  { %v2922_v0 = vadd.f32 %v2921_v21, %v2908_v34 }
 0x9ab   :  { %v2949_v12 = vpop.f32.mrf.mxu0  ;;  %v2963_v15 = vpop.f32.mrf.mxu1  ;;  %v2936_v4 = vadd.f32 %v2935_v20, %v2922_v0 }
 0x9ad   :  { %v2950_v43 = vadd.f32 %v2949_v12, %v2936_v4 }
 0x9af   :  { %v2964_v30 = vadd.f32 %v2963_v15, %v2950_v43 }
 0x9b0   :  { %v2923_v53 = vpop.f32.mrf.mxu2  ;;  %v2937_v23 = vpop.f32.mrf.mxu3 }
 0x9b1   :  { %v2924_v29 = vadd.f32 %v2923_v53, %v2910_v17 }
 0x9b3   :  { %v2951_v19 = vpop.f32.mrf.mxu0  ;;  %v2938_v38 = vadd.f32 %v2937_v23, %v2924_v29  ;;  %v2965_v11 = vpop.f32.mrf.mxu1 }
 0x9b5   :  { %v2952_v7 = vadd.f32 %v2951_v19, %v2938_v38  ;;  %v4752_v38 = vld [vmem:[%s6597_s11 + $0x1] ss:$0 sm:$0xff] }
 0x9b7   :  { %v2966_v35 = vadd.f32 %v2965_v11, %v2952_v7  ;;  %v4753_v7 = vld [vmem:[#allocation11 + $0x1] ss:$0 sm:$0xff] }
 0x9b8   :  { %v2977_v14 = vpop.f32.mrf.mxu2  ;;  %v2991_v48 = vpop.f32.mrf.mxu3 }
 0x9b9   :  { %v2978_v51 = vadd.f32 %v2977_v14, %v2964_v30 }
 0x9bb   :  { %v3005_v40 = vpop.f32.mrf.mxu0  ;;  %v2992_v25 = vadd.f32 %v2991_v48, %v2978_v51  ;;  %v3019_v61 = vpop.f32.mrf.mxu1 }
 0x9bd   :  { %v3006_v44 = vadd.f32 %v3005_v40, %v2992_v25 }
 0x9bf   :  { %v3020_v50 = vadd.f32 %v3019_v61, %v3006_v44 }
 0x9c0   :  { %v2979_v47 = vpop.f32.mrf.mxu2  ;;  %v2993_v5 = vpop.f32.mrf.mxu3 }
 0x9c1   :  { %v2980_v42 = vadd.f32 %v2979_v47, %v2966_v35 }
 0x9c3   :  { %v2994_v49 = vadd.f32 %v2993_v5, %v2980_v42  ;;  %v3007_v57 = vpop.f32.mrf.mxu0  ;;  %v3021_v58 = vpop.f32.mrf.mxu1 }
 0x9c5   :  { %v3008_v54 = vadd.f32 %v3007_v57, %v2994_v49  ;;  %v4754_v57 = vld [vmem:[%s6588_s2 + $0x2] ss:$0 sm:$0xff] }
 0x9c7   :  { %v3022_v9 = vadd.f32 %v3021_v58, %v3008_v54 }
 0x9c8   :  { %v3033_v45 = vpop.f32.mrf.mxu2  ;;  %v3047_v18 = vpop.f32.mrf.mxu3 }
 0x9c9   :  { %v3034_v59 = vadd.f32 %v3033_v45, %v3020_v50 }
 0x9cb   :  { %v3048_v8 = vadd.f32 %v3047_v18, %v3034_v59 }
 0x9cd   :  { %v3052_v22 = vadd.f32 %v3048_v8, %v6107_v52 }
 0x9cf   :  { %v3058_v1 = vsel %vm145_vm2, %v3052_v22, 0.0 }
 0x9d0   :  { %v3035_v31 = vpop.f32.mrf.mxu2  ;;  %3059 = vadd.xlane.f32.xlu2 %v3058_v1  ;;  %v3049_v24 = vpop.f32.mrf.mxu3 }
 0x9d1   :  { %v3036_v28 = vadd.f32 %v3035_v31, %v3022_v9 }
 0x9d3   :  { %v3050_v55 = vadd.f32 %v3049_v24, %v3036_v28 }
 0x9d5   :  { %v3053_v62 = vadd.f32 %v3050_v55, %v6109_v10  ;;  %v4665_v10 = vld [vmem:[%s6587_s1 + $0x10] sm:$0x7f] }
 0x9d6   :  { %4667 = vmatpush.msk.msrb.mxu0 %vm152_vm1, %v4665_v10 }
 0x9d7   :  { %v3061_v3 = vsel %vm145_vm2, %v3053_v62, 0.0 }
 0x9d8   :  { %3062 = vadd.xlane.f32.xlu1 %v3061_v3 }
 0xa43   :  { %v3060_v41 = vpop.xlane.xlu2 %3059 }
 0xa44   :  { %v3064_v46 = vmul.f32 %v3060_v41, %v5645_v16 }
 0xa46   :  { %v3066_v27 = vsub.f32 %v3052_v22, %v3064_v46 }
 0xa48   :  { %v3068_v63 = vmul.f32 %v3066_v27, %v3066_v27 }
 0xa4a   :  { %v3070_v52 = vsel %vm145_vm2, %v3068_v63, 0.0 }
 0xa4b   :  { %v3063_v26 = vpop.xlane.xlu1 %3062  ;;  %3071 = vadd.xlane.f32.xlu0 %v3070_v52 }
 0xa4c   :  { %v3065_v21 = vmul.f32 %v3063_v26, %v5645_v16 }
 0xa4e   :  { %v3067_v20 = vsub.f32 %v3053_v62, %v3065_v21 }
 0xa50   :  { %v3069_v34 = vmul.f32 %v3067_v20, %v3067_v20 }
 0xa52   :  { %v3073_v39 = vsel %vm145_vm2, %v3069_v34, 0.0 }
 0xa53   :  { %3074 = vadd.xlane.f32.xlu2 %v3073_v39 }
 0xabe   :  { %v3072_v12 = vpop.xlane.xlu0 %3071 }
 0xabf   :  { %v3076_v0 = vmul.f32 %v3072_v12, %v5645_v16 }
 0xac1   :  { %v3078_v2 = vadd.f32 1e-05, %v3076_v0 }
 0xac3   :  { %4905 = vrsqrt.f32 %v3078_v2  ;;  %vm3086_vm11 = vweird.f32 %v3078_v2 }
 0xac6   :  { %v3075_v15 = vpop.xlane.xlu2 %3074 }
 0xac7   :  { %v3077_v53 = vmul.f32 %v3075_v15, %v5645_v16 }
 0xac9   :  { %v4906_v23 = vpop.eup %4905  ;;  %v3079_v4 = vadd.f32 1e-05, %v3077_v53 }
 0xaca   :  { %v3081_v17 = vmul.f32 %v4906_v23, %v3078_v2  ;;  %vm3087_vm10 = vweird.f32 %v4906_v23 }
 0xacb   :  { %4907 = vrsqrt.f32 %v3079_v4  ;;  %vm3088_vm12 = vmor %vm3086_vm11, %vm3087_vm10  ;;  %vm3096_vm14 = vweird.f32 %v3079_v4 }
 0xacc   :  { %v3082_v19 = vmul.f32 %v4906_v23, %v3081_v17 }
 0xace   :  { %v3083_v43 = vmul.f32 0.5, %v3082_v19 }
 0xad0   :  { %v3084_v29 = vsub.f32 1.5, %v3083_v43 }
 0xad1   :  { %v4908_v14 = vpop.eup %4907 }
 0xad2   :  { %v3085_v48 = vmul.f32 %v4906_v23, %v3084_v29  ;;  %v3091_v30 = vmul.f32 %v4908_v14, %v3079_v4  ;;  %vm3097_vm13 = vweird.f32 %v4908_v14 }
 0xad3   :  { %vm3098_vm15 = vmor %vm3096_vm14, %vm3097_vm13  ;;  %vm4593_vm14 = vcmask 58368  }
 0xad4   :  { %v3089_v11 = vsel %vm3088_vm12, %v4906_v23, %v3085_v48  ;;  %v3092_v51 = vmul.f32 %v4908_v14, %v3091_v30 }
 0xad5   :  { %v3100_v40 = vmul.f32 %v3089_v11, %v3066_v27 }
 0xad6   :  { %v3093_v25 = vmul.f32 0.5, %v3092_v51 }
 0xad7   :  { %v3105_v47 = vmul.f32 %v4752_v38, %v3100_v40  ;;  %v6610_v40 = vld [vmem:[#allocation18_spill] sm:$0xff] }
 0xad8   :  { %v3094_v5 = vsub.f32 1.5, %v3093_v25 }
 0xad9   :  { %v6177_v35 = vadd.f32 %v4753_v7, %v3105_v47 }
 0xada   :  { %v3095_v44 = vmul.f32 %v4908_v14, %v3094_v5 }
 0xadb   :  { %4668 = vmatmul.msk.f32.vlgmr.msrb.gmra.mxu0 %vm145_vm2, %v6177_v35 }
 0xadc   :  { %v3099_v42 = vsel %vm3098_vm15, %v4908_v14, %v3095_v44 }
 0xadd   :  { %v3101_v61 = vmul.f32 %v3099_v42, %v3067_v20 }
 0xadf   :  { %v3106_v50 = vmul.f32 %v4752_v38, %v3101_v61 }
 0xae1   :  { %v6181_v49 = vadd.f32 %v4753_v7, %v3106_v50 }
 0xae3   :  { %4669 = vmatmul.msk.f32.gmra.mxu0 %vm145_vm2, %v6181_v49 }
 0xb58   :  { %v3145_v45 = vpop.f32.mrf.mxu0 }
 0xb59   :  { %v3146_v18 = vadd.f32 %v4754_v57, %v3145_v45 }
 0xb5b   :  { %3541 = vrot.lane.b32.xlu2 %v3146_v18, %s5149_s23  ;;  %3199 = vrot.lane.b32.xlu1 %v3146_v18, %s5148_s9  ;;  %v3153_v8 = vrot.slane %v3146_v18, 1  ;;  %v3154_v22 = vrot.slane %v3146_v18, 2  ;;  %v3155_v58 = vrot.slane %v3146_v18, 3  ;;  %v3156_v9 = vrot.slane %v3146_v18, 4 }
 0xb5c   :  { %v3157_v1 = vrot.slane %v3146_v18, 5  ;;  %v3158_v31 = vrot.slane %v3146_v18, 6  ;;  %v3159_v28 = vrot.slane %v3146_v18, 7  ;;  %v3167_v62 = vperm.slane %v3146_v18, 0 }
 0xb5d   :  { %v3168_v3 = vperm.slane %v3153_v8, 0  ;;  %v3169_v41 = vperm.slane %v3154_v22, 0  ;;  %v3170_v46 = vperm.slane %v3155_v58, 0  ;;  %v3171_v27 = vperm.slane %v3156_v9, 0 }
 0xb5e   :  { %v3172_v63 = vperm.slane %v3157_v1, 0  ;;  %v3173_v52 = vperm.slane %v3158_v31, 0  ;;  %v3174_v26 = vperm.slane %v3159_v28, 0 }
 0xb60   :  { %v3148_v59 = vpop.f32.mrf.mxu0 }
 0xb61   :  { %v6190_v54 = vadd.f32 %v4754_v57, %v3148_v59 }
 0xb63   :  { %3201 = vrot.lane.b32.xlu0 %v6190_v54, %s5148_s9  ;;  %v3160_v24 = vrot.slane %v6190_v54, 1  ;;  %v3161_v55 = vrot.slane %v6190_v54, 2  ;;  %v3162_v21 = vrot.slane %v6190_v54, 3  ;;  %v3163_v20 = vrot.slane %v6190_v54, 4 }
 0xb64   :  { %v3164_v34 = vrot.slane %v6190_v54, 5  ;;  %v3165_v10 = vrot.slane %v6190_v54, 6  ;;  %v3175_v12 = vperm.slane %v6190_v54, 0 }
 0xb65   :  { %v6203_v0 = vperm.slane %v3160_v24, 0  ;;  %v6205_v2 = vperm.slane %v3161_v55, 0 }
 0xb6b   :  { %3543 = vrot.lane.b32.xlu0 %v6190_v54, %s5149_s23 }
 0xbcd   :  { %v3200_v39 = vpop.permute.xlu1 %3199 }
 0xbce   :  { %v3205_v15 = vmul.f32 %v3200_v39, %v3167_v62  ;;  %v3206_v53 = vmul.f32 %v3200_v39, %v3168_v3  ;;  %v3207_v23 = vmul.f32 %v3200_v39, %v3169_v41  ;;  %v3208_v4 = vmul.f32 %v3200_v39, %v3170_v46 }
 0xbcf   :  { %v3209_v17 = vmul.f32 %v3200_v39, %v3171_v27  ;;  %v3210_v19 = vmul.f32 %v3200_v39, %v3172_v63  ;;  %v3211_v43 = vmul.f32 %v3200_v39, %v3173_v52  ;;  %v3212_v29 = vmul.f32 %v3200_v39, %v3174_v26 }
 0xbd0   :  { %v6208_v14 = vadd.f32 %v5416_v56, %v3205_v15  ;;  %v6211_v48 = vadd.f32 %v5411_v60, %v3206_v53  ;;  %v6214_v30 = vadd.f32 %v5289_v33, %v3207_v23  ;;  %v6217_v38 = vadd.f32 %v5287_v32, %v3208_v4 }
 0xbd1   :  { %v6220_v11 = vadd.f32 %v5293_v37, %v3209_v17  ;;  %v6223_v51 = vadd.f32 %v5291_v36, %v3210_v19  ;;  %v6226_v7 = vadd.f32 %v5318_v6, %v3211_v43  ;;  %v6229_v25 = vadd.f32 %v6610_v40, %v3212_v29 }
 0xbd2   :  { %v3237_v47 = vsel %vm145_vm2, %v6208_v14, -inf  ;;  %v3244_v5 = vsel %vm145_vm2, %v6211_v48, -inf  ;;  %v3251_v44 = vsel %vm145_vm2, %v6214_v30, -inf  ;;  %v3258_v42 = vsel %vm145_vm2, %v6217_v38, -inf }
 0xbd3   :  { %v3238_v61 = vrot.slane %v3237_v47, 4  ;;  %v3245_v50 = vrot.slane %v3244_v5, 4  ;;  %v3252_v57 = vrot.slane %v3251_v44, 4  ;;  %v3259_v45 = vrot.slane %v3258_v42, 4 }
 0xbd4   :  { %v3265_v18 = vsel %vm145_vm2, %v6220_v11, -inf  ;;  %v3272_v59 = vsel %vm145_vm2, %v6223_v51, -inf  ;;  %v3279_v8 = vsel %vm145_vm2, %v6226_v7, -inf  ;;  %v3286_v22 = vsel %vm145_vm2, %v6229_v25, -inf }
 0xbd5   :  { %v3239_v58 = vmax.f32 %v3237_v47, %v3238_v61  ;;  %v3246_v9 = vmax.f32 %v3244_v5, %v3245_v50  ;;  %v3253_v1 = vmax.f32 %v3251_v44, %v3252_v57  ;;  %v3260_v31 = vmax.f32 %v3258_v42, %v3259_v45 }
 0xbd6   :  { %v3266_v28 = vrot.slane %v3265_v18, 4  ;;  %v3273_v24 = vrot.slane %v3272_v59, 4  ;;  %v3280_v55 = vrot.slane %v3279_v8, 4  ;;  %v3287_v62 = vrot.slane %v3286_v22, 4 }
 0xbd7   :  { %v3240_v3 = vrot.slane %v3239_v58, 2  ;;  %v3247_v41 = vrot.slane %v3246_v9, 2  ;;  %v3254_v46 = vrot.slane %v3253_v1, 2  ;;  %v3261_v27 = vrot.slane %v3260_v31, 2 }
 0xbd8   :  { %v3267_v63 = vmax.f32 %v3265_v18, %v3266_v28  ;;  %v3274_v52 = vmax.f32 %v3272_v59, %v3273_v24  ;;  %v3281_v26 = vmax.f32 %v3279_v8, %v3280_v55  ;;  %v3288_v39 = vmax.f32 %v3286_v22, %v3287_v62  ;;  %v3202_v28 = vpop.permute.xlu0 %3201 }
 0xbd9   :  { %v3241_v15 = vmax.f32 %v3239_v58, %v3240_v3  ;;  %v3248_v53 = vmax.f32 %v3246_v9, %v3247_v41  ;;  %v3255_v23 = vmax.f32 %v3253_v1, %v3254_v46  ;;  %v3262_v4 = vmax.f32 %v3260_v31, %v3261_v27 }
 0xbda   :  { %v3268_v17 = vrot.slane %v3267_v63, 2  ;;  %v3275_v19 = vrot.slane %v3274_v52, 2  ;;  %v3282_v43 = vrot.slane %v3281_v26, 2  ;;  %v3289_v29 = vrot.slane %v3288_v39, 2 }
 0xbdb   :  { %v3242_v47 = vrot.slane %v3241_v15, 1  ;;  %v3249_v5 = vrot.slane %v3248_v53, 1  ;;  %v3256_v44 = vrot.slane %v3255_v23, 1  ;;  %v3263_v42 = vrot.slane %v3262_v4, 1 }
 0xbdc   :  { %v3269_v61 = vmax.f32 %v3267_v63, %v3268_v17  ;;  %v3276_v50 = vmax.f32 %v3274_v52, %v3275_v19  ;;  %v3283_v57 = vmax.f32 %v3281_v26, %v3282_v43  ;;  %v3290_v45 = vmax.f32 %v3288_v39, %v3289_v29 }
 0xbdd   :  { %v3243_v18 = vmax.f32 %v3241_v15, %v3242_v47  ;;  %v3250_v59 = vmax.f32 %v3248_v53, %v3249_v5  ;;  %v3257_v8 = vmax.f32 %v3255_v23, %v3256_v44  ;;  %v3264_v22 = vmax.f32 %v3262_v4, %v3263_v42 }
 0xbde   :  { %v3270_v58 = vrot.slane %v3269_v61, 1  ;;  %v3277_v9 = vrot.slane %v3276_v50, 1  ;;  %v3284_v1 = vrot.slane %v3283_v57, 1  ;;  %v3291_v31 = vrot.slane %v3290_v45, 1 }
 0xbdf   :  { %v3349_v24 = vsub.f32 %v6208_v14, %v3243_v18  ;;  %v3350_v55 = vsub.f32 %v6211_v48, %v3250_v59  ;;  %v3351_v62 = vsub.f32 %v6214_v30, %v3257_v8  ;;  %v3352_v3 = vsub.f32 %v6217_v38, %v3264_v22 }
 0xbe0   :  { %v3271_v41 = vmax.f32 %v3269_v61, %v3270_v58  ;;  %v3278_v46 = vmax.f32 %v3276_v50, %v3277_v9  ;;  %v3285_v27 = vmax.f32 %v3283_v57, %v3284_v1  ;;  %v3292_v63 = vmax.f32 %v3290_v45, %v3291_v31 }
 0xbe1   :  { %v3365_v52 = vmul.f32 1.442695, %v3349_v24  ;;  %v3367_v26 = vmul.f32 1.442695, %v3350_v55  ;;  %v3369_v39 = vmul.f32 1.442695, %v3351_v62  ;;  %v3213_v15 = vmul.f32 %v3202_v28, %v3175_v12 }
 0xbe2   :  { %v3353_v53 = vsub.f32 %v6220_v11, %v3271_v41  ;;  %v3354_v14 = vsub.f32 %v6223_v51, %v3278_v46  ;;  %v3355_v48 = vsub.f32 %v6226_v7, %v3285_v27  ;;  %v3356_v30 = vsub.f32 %v6229_v25, %v3292_v63 }
 0xbe3   :  { %4909 = vpow2.f32 %v3365_v52  ;;  %v3371_v38 = vmul.f32 1.442695, %v3352_v3  ;;  %v3214_v23 = vmul.f32 %v3202_v28, %v6203_v0  ;;  %v3215_v4 = vmul.f32 %v3202_v28, %v6205_v2 }
 0xbe4   :  { %4911 = vpow2.f32 %v3367_v26  ;;  %v3373_v17 = vmul.f32 1.442695, %v3353_v53  ;;  %v3375_v19 = vmul.f32 1.442695, %v3354_v14  ;;  %v3166_v43 = vrot.slane %v6190_v54, 7 }
 0xbe5   :  { %4913 = vpow2.f32 %v3369_v39  ;;  %v3377_v12 = vmul.f32 1.442695, %v3355_v48  ;;  %v3178_v11 = vperm.slane %v3162_v21, 0  ;;  %v3179_v51 = vperm.slane %v3163_v20, 0 }
 0xbe6   :  { %4915 = vpow2.f32 %v3371_v38  ;;  %v3379_v7 = vmul.f32 1.442695, %v3356_v30  ;;  %v3180_v0 = vperm.slane %v3164_v34, 0  ;;  %v3181_v2 = vperm.slane %v3165_v10, 0 }
 0xbe7   :  { %4917 = vpow2.f32 %v3373_v17  ;;  %v6269_v25 = vadd.f32 %v5416_v56, %v3213_v15  ;;  %v6272_v29 = vadd.f32 %v5411_v60, %v3214_v23  ;;  %v6275_v21 = vadd.f32 %v5289_v33, %v3215_v4 }
 0xbe8   :  { %4919 = vpow2.f32 %v3375_v19  ;;  %v3182_v20 = vperm.slane %v3166_v43, 0  ;;  %v3216_v47 = vmul.f32 %v3202_v28, %v3178_v11  ;;  %v3217_v5 = vmul.f32 %v3202_v28, %v3179_v51 }
 0xbe9   :  { %v6277_v44 = vpop.eup %4909  ;;  %4921 = vpow2.f32 %v3377_v12  ;;  %v3218_v34 = vmul.f32 %v3202_v28, %v3180_v0  ;;  %v3219_v54 = vmul.f32 %v3202_v28, %v3181_v2  ;;  %v3293_v10 = vsel %vm145_vm2, %v6269_v25, -inf }
 0xbea   :  { %v6281_v56 = vpop.eup %4911  ;;  %4923 = vpow2.f32 %v3379_v7  ;;  %v3397_v60 = vsel %vm145_vm2, %v6277_v44, 0.0  ;;  %v3294_v33 = vrot.slane %v3293_v10, 4  ;;  %v3300_v42 = vsel %vm145_vm2, %v6272_v29, -inf }
 0xbeb   :  { %v6287_v61 = vpop.eup %4913  ;;  %v3398_v50 = vrot.slane %v3397_v60, 4  ;;  %v3404_v57 = vsel %vm145_vm2, %v6281_v56, 0.0  ;;  %v3220_v45 = vmul.f32 %v3202_v28, %v3182_v20  ;;  %v3307_v18 = vsel %vm145_vm2, %v6275_v21, -inf }
 0xbec   :  { %v6293_v59 = vpop.eup %4915  ;;  %v3405_v8 = vrot.slane %v3404_v57, 4  ;;  %v3411_v22 = vsel %vm145_vm2, %v6287_v61, 0.0  ;;  %v3295_v58 = vmax.f32 %v3293_v10, %v3294_v33  ;;  %v3301_v9 = vrot.slane %v3300_v42, 4 }
 0xbed   :  { %v6297_v1 = vpop.eup %4917  ;;  %v3399_v31 = vadd.f32 %v3398_v50, %v3397_v60  ;;  %v3412_v24 = vrot.slane %v3411_v22, 4  ;;  %v3418_v55 = vsel %vm145_vm2, %v6293_v59, 0.0  ;;  %v3308_v62 = vrot.slane %v3307_v18, 4 }
 0xbee   :  { %v6301_v28 = vpop.eup %4919  ;;  %v3406_v3 = vadd.f32 %v3405_v8, %v3404_v57  ;;  %v3419_v41 = vrot.slane %v3418_v55, 4  ;;  %v3425_v46 = vsel %vm145_vm2, %v6297_v1, 0.0  ;;  %v3296_v27 = vrot.slane %v3295_v58, 2 }
 0xbef   :  { %v6305_v63 = vpop.eup %4921  ;;  %v3400_v52 = vrot.slane %v3399_v31, 2  ;;  %v3413_v26 = vadd.f32 %v3412_v24, %v3411_v22  ;;  %v3426_v39 = vrot.slane %v3425_v46, 4  ;;  %v3432_v15 = vsel %vm145_vm2, %v6301_v28, 0.0 }
 0xbf0   :  { %v6309_v53 = vpop.eup %4923  ;;  %v3407_v14 = vrot.slane %v3406_v3, 2  ;;  %v3420_v48 = vadd.f32 %v3419_v41, %v3418_v55  ;;  %v3433_v30 = vrot.slane %v3432_v15, 4  ;;  %v3439_v38 = vsel %vm145_vm2, %v6305_v63, 0.0 }
 0xbf1   :  { %v3401_v23 = vadd.f32 %v3400_v52, %v3399_v31  ;;  %v3414_v4 = vrot.slane %v3413_v26, 2  ;;  %v3427_v17 = vadd.f32 %v3426_v39, %v3425_v46  ;;  %v3440_v19 = vrot.slane %v3439_v38, 4 }
 0xbf2   :  { %v3408_v43 = vadd.f32 %v3407_v14, %v3406_v3  ;;  %v3421_v12 = vrot.slane %v3420_v48, 2  ;;  %v6313_v11 = vadd.f32 %v3433_v30, %v3432_v15  ;;  %v3446_v51 = vsel %vm145_vm2, %v6309_v53, 0.0 }
 0xbf3   :  { %v3402_v7 = vrot.slane %v3401_v23, 1  ;;  %v3415_v0 = vadd.f32 %v3414_v4, %v3413_v26  ;;  %v3428_v2 = vrot.slane %v3427_v17, 2  ;;  %v6317_v20 = vadd.f32 %v3440_v19, %v3439_v38 }
 0xbf4   :  { %v3409_v10 = vrot.slane %v3408_v43, 1  ;;  %v3422_v60 = vadd.f32 %v3421_v12, %v3420_v48  ;;  %v3447_v33 = vrot.slane %v3446_v51, 4  ;;  %v3302_v50 = vmax.f32 %v3300_v42, %v3301_v9 }
 0xbf5   :  { %v3416_v57 = vrot.slane %v3415_v0, 1  ;;  %v6320_v8 = vadd.f32 %v5287_v32, %v3216_v47  ;;  %v6323_v22 = vadd.f32 %v5293_v37, %v3217_v5  ;;  %v6326_v31 = vadd.f32 %v5291_v36, %v3218_v34 }
 0xbf6   :  { %v3403_v24 = vadd.f32 %v3402_v7, %v3401_v23  ;;  %v3435_v55 = vrot.slane %v6313_v11, 2  ;;  %v6330_v3 = vadd.f32 %v5318_v6, %v3219_v54  ;;  %v6333_v41 = vadd.f32 %v6610_v40, %v3220_v45 }
 0xbf7   :  { %v3410_v42 = vadd.f32 %v3409_v10, %v3408_v43  ;;  %v6335_v9 = vadd.f32 %v3428_v2, %v3427_v17  ;;  %v3442_v32 = vrot.slane %v6317_v20, 2  ;;  %v3297_v47 = vmax.f32 %v3295_v58, %v3296_v27 }
 0xbf8   :  { %v3423_v37 = vrot.slane %v3422_v60, 1  ;;  %v6338_v5 = vadd.f32 %v3447_v33, %v3446_v51  ;;  %v3303_v36 = vrot.slane %v3302_v50, 2  ;;  %v3309_v34 = vmax.f32 %v3307_v18, %v3308_v62 }
 0xbf9   :  { %v3417_v46 = vadd.f32 %v3416_v57, %v3415_v0  ;;  %v3298_v52 = vrot.slane %v3297_v47, 1  ;;  %v3314_v6 = vsel %vm145_vm2, %v6320_v8, -inf  ;;  %v3321_v40 = vsel %vm145_vm2, %v6323_v22, -inf }
 0xbfa   :  { %4925 = vrcp.f32 %v3403_v24  ;;  %v3304_v54 = vmax.f32 %v3302_v50, %v3303_v36  ;;  %v3310_v45 = vrot.slane %v3309_v34, 2  ;;  %v3315_v26 = vrot.slane %v3314_v6, 4 }
 0xbfb   :  { %v3299_v39 = vmax.f32 %v3297_v47, %v3298_v52  ;;  %v3322_v15 = vrot.slane %v3321_v40, 4  ;;  %v3328_v58 = vsel %vm145_vm2, %v6326_v31, -inf  ;;  %v3335_v18 = vsel %vm145_vm2, %v6330_v3, -inf }
 0xbfc   :  { %v3305_v62 = vrot.slane %v3304_v54, 1  ;;  %v3311_v27 = vmax.f32 %v3309_v34, %v3310_v45  ;;  %v3316_v14 = vmax.f32 %v3314_v6, %v3315_v26  ;;  %v3329_v48 = vrot.slane %v3328_v58, 4 }
 0xbfd   :  { %v3424_v30 = vadd.f32 %v3423_v37, %v3422_v60  ;;  %v3323_v38 = vmax.f32 %v3321_v40, %v3322_v15  ;;  %v3336_v23 = vrot.slane %v3335_v18, 4  ;;  %v3342_v4 = vsel %vm145_vm2, %v6333_v41, -inf }
 0xbfe   :  { %v3306_v17 = vmax.f32 %v3304_v54, %v3305_v62  ;;  %v3312_v19 = vrot.slane %v3311_v27, 1  ;;  %v3317_v43 = vrot.slane %v3316_v14, 2  ;;  %v3357_v12 = vsub.f32 %v6269_v25, %v3299_v39 }
 0xbff   :  { %4927 = vrcp.f32 %v3410_v42  ;;  %v3324_v51 = vrot.slane %v3323_v38, 2  ;;  %v3330_v7 = vmax.f32 %v3328_v58, %v3329_v48  ;;  %v3337_v0 = vmax.f32 %v3335_v18, %v3336_v23 }
 0xc00   :  { %v4926_v2 = vpop.eup %4925  ;;  %4929 = vrcp.f32 %v3417_v46  ;;  %v3313_v10 = vmax.f32 %v3311_v27, %v3312_v19  ;;  %v3318_v33 = vmax.f32 %v3316_v14, %v3317_v43  ;;  %v3343_v50 = vrot.slane %v3342_v4, 4 }
 0xc01   :  { %v3325_v60 = vmax.f32 %v3323_v38, %v3324_v51  ;;  %v3331_v57 = vrot.slane %v3330_v7, 2  ;;  %v3338_v24 = vrot.slane %v3337_v0, 2  ;;  %v3358_v47 = vsub.f32 %v6272_v29, %v3306_v17 }
 0xc02   :  { %v3319_v37 = vrot.slane %v3318_v33, 1  ;;  %v3344_v36 = vmax.f32 %v3342_v4, %v3343_v50  ;;  %v3359_v34 = vsub.f32 %v6275_v21, %v3313_v10  ;;  %v3381_v52 = vmul.f32 1.442695, %v3357_v12  ;;  %v3676_v12 = vld [vmem:[#allocation3 + $0x10] sm:$0x7f] }
 0xc03   :  { %v3326_v25 = vrot.slane %v3325_v60, 1  ;;  %v3332_v42 = vmax.f32 %v3330_v7, %v3331_v57  ;;  %v3339_v6 = vmax.f32 %v3337_v0, %v3338_v24  ;;  %v3383_v40 = vmul.f32 1.442695, %v3358_v47  ;;  %4671 = vmatpush.msk.msrb.mxu1 %vm152_vm1, %v3676_v12 }
 0xc04   :  { %v3320_v54 = vmax.f32 %v3318_v33, %v3319_v37  ;;  %v3345_v45 = vrot.slane %v3344_v36, 2  ;;  %4931 = vpow2.f32 %v3381_v52  ;;  %v3385_v46 = vmul.f32 1.442695, %v3359_v34 }
 0xc05   :  { %v4928_v26 = vpop.eup %4927  ;;  %v3327_v39 = vmax.f32 %v3325_v60, %v3326_v25  ;;  %v3333_v15 = vrot.slane %v3332_v42, 1  ;;  %v3340_v58 = vrot.slane %v3339_v6, 1  ;;  %4933 = vpow2.f32 %v3383_v40 }
 0xc06   :  { %v4930_v18 = vpop.eup %4929  ;;  %v3430_v29 = vrot.slane %v6335_v9, 1  ;;  %v3436_v21 = vadd.f32 %v3435_v55, %v6313_v11  ;;  %v3360_v62 = vsub.f32 %v6320_v8, %v3320_v54  ;;  %4935 = vpow2.f32 %v3385_v46 }
 0xc07   :  { %v3334_v27 = vmax.f32 %v3332_v42, %v3333_v15  ;;  %v3341_v14 = vmax.f32 %v3339_v6, %v3340_v58  ;;  %v3346_v48 = vmax.f32 %v3344_v36, %v3345_v45  ;;  %v3361_v38 = vsub.f32 %v6323_v22, %v3327_v39  ;;  %v6393_v15 = vpop.permute.xlu2 %3541 }
 0xc08   :  { %v3387_v23 = vmul.f32 1.442695, %v3360_v62  ;;  %v3443_v4 = vadd.f32 %v3442_v32, %v6317_v20  ;;  %v3449_v17 = vrot.slane %v6338_v5, 2  ;;  %4937 = vrcp.f32 %v3424_v30 }
 0xc09   :  { %v3362_v19 = vsub.f32 %v6326_v31, %v3334_v27  ;;  %v3363_v11 = vsub.f32 %v6330_v3, %v3341_v14  ;;  %v3389_v55 = vmul.f32 1.442695, %v3361_v38  ;;  %v3525_v43 = vmul.f32 %v4926_v2, %v6277_v44 }
 0xc0a   :  { %v6365_v8 = vpop.eup %4931  ;;  %4939 = vpow2.f32 %v3387_v23  ;;  %v3431_v22 = vadd.f32 %v3430_v29, %v6335_v9  ;;  %v3450_v51 = vadd.f32 %v3449_v17, %v6338_v5  ;;  %v3347_v20 = vrot.slane %v3346_v48, 1 }
 0xc0b   :  { %v6370_v7 = vpop.eup %4933  ;;  %4941 = vpow2.f32 %v3389_v55  ;;  %v3453_v31 = vsel %vm145_vm2, %v6365_v8, 0.0  ;;  %v3437_v3 = vrot.slane %v3436_v21, 1  ;;  %v3391_v30 = vmul.f32 1.442695, %v3362_v19 }
 0xc0c   :  { %v6375_v32 = vpop.eup %4935  ;;  %v3454_v44 = vrot.slane %v3453_v31, 4  ;;  %v3460_v0 = vsel %vm145_vm2, %v6370_v7, 0.0  ;;  %v3444_v9 = vrot.slane %v3443_v4, 1  ;;  %v3393_v2 = vmul.f32 1.442695, %v3363_v11 }
 0xc0d   :  { %v3461_v5 = vrot.slane %v3460_v0, 4  ;;  %v3467_v10 = vsel %vm145_vm2, %v6375_v32, 0.0  ;;  %v3451_v33 = vrot.slane %v3450_v51, 1  ;;  %v3526_v50 = vmul.f32 %v4928_v26, %v6281_v56 }
 0xc0e   :  { %v3527_v60 = vmul.f32 %v4930_v18, %v6287_v61  ;;  %v3455_v57 = vadd.f32 %v3454_v44, %v3453_v31  ;;  %v3468_v24 = vrot.slane %v3467_v10, 4  ;;  %v4938_v47 = vpop.eup %4937  ;;  %v6383_v37 = vmax.f32 %v3346_v48, %v3347_v20 }
 0xc0f   :  { %v3462_v36 = vadd.f32 %v3461_v5, %v3460_v0  ;;  %v3438_v34 = vadd.f32 %v3437_v3, %v3436_v21  ;;  %4943 = vrcp.f32 %v3431_v22  ;;  %v3445_v6 = vadd.f32 %v3444_v9, %v3443_v4 }
 0xc10   :  { %v6385_v52 = vpop.eup %4939  ;;  %4945 = vpow2.f32 %v3391_v30  ;;  %v3469_v25 = vadd.f32 %v3468_v24, %v3467_v10  ;;  %v3456_v42 = vrot.slane %v3455_v57, 2  ;;  %v3452_v54 = vadd.f32 %v3451_v33, %v3450_v51 }
 0xc11   :  { %v6387_v40 = vpop.eup %4941  ;;  %4947 = vpow2.f32 %v3393_v2  ;;  %v3474_v56 = vsel %vm145_vm2, %v6385_v52, 0.0  ;;  %v3463_v61 = vrot.slane %v3462_v36, 2  ;;  %v3528_v29 = vmul.f32 %v4938_v47, %v6293_v59 }
 0xc12   :  { %v3475_v45 = vrot.slane %v3474_v56, 4  ;;  %v3481_v46 = vsel %vm145_vm2, %v6387_v40, 0.0  ;;  %v3457_v26 = vadd.f32 %v3456_v42, %v3455_v57  ;;  %v3470_v39 = vrot.slane %v3469_v25, 2 }
 0xc13   :  { %v3482_v58 = vrot.slane %v3481_v46, 4  ;;  %v3464_v18 = vadd.f32 %v3463_v61, %v3462_v36  ;;  %4949 = vrcp.f32 %v3438_v34  ;;  %v3547_v14 = vmul.f32 %v6393_v15, %v3525_v43 }
 0xc14   :  { %v3476_v21 = vadd.f32 %v3475_v45, %v3474_v56  ;;  %v3458_v62 = vrot.slane %v3457_v26, 1  ;;  %v3471_v27 = vadd.f32 %v3470_v39, %v3469_v25  ;;  %4951 = vrcp.f32 %v3445_v6 }
 0xc15   :  { %v4944_v48 = vpop.eup %4943  ;;  %v3483_v38 = vadd.f32 %v3482_v58, %v3481_v46  ;;  %v3465_v23 = vrot.slane %v3464_v18, 1  ;;  %v3548_v4 = vmul.f32 %v6393_v15, %v3526_v50  ;;  %4953 = vrcp.f32 %v3452_v54  ;;  %v6417_v58 = vpop.permute.xlu0 %3543 }
 0xc16   :  { %v6398_v17 = vpop.eup %4945  ;;  %v3459_v19 = vadd.f32 %v3458_v62, %v3457_v26  ;;  %v3472_v11 = vrot.slane %v3471_v27, 1  ;;  %v3477_v55 = vrot.slane %v3476_v21, 2  ;;  %v3529_v12 = vmul.f32 %v4944_v48, %v6297_v1 }
 0xc17   :  { %v6401_v22 = vpop.eup %4947  ;;  %v3466_v59 = vadd.f32 %v3465_v23, %v3464_v18  ;;  %v3484_v51 = vrot.slane %v3483_v38, 2  ;;  %v3549_v43 = vmul.f32 %v6393_v15, %v3527_v60  ;;  %v3550_v44 = vmul.f32 %v6393_v15, %v3528_v29 }
 0xc18   :  { %v3473_v20 = vadd.f32 %v3472_v11, %v3471_v27  ;;  %v3478_v31 = vadd.f32 %v3477_v55, %v3476_v21  ;;  %4955 = vrcp.f32 %v3459_v19  ;;  %v3551_v0 = vmul.f32 %v6393_v15, %v3529_v12 }
 0xc19   :  { %v4950_v3 = vpop.eup %4949  ;;  %v3485_v30 = vadd.f32 %v3484_v51, %v3483_v38  ;;  %4957 = vrcp.f32 %v3466_v59  ;;  %v3364_v1 = vsub.f32 %v6333_v41, %v6383_v37  ;;  %v3488_v9 = vsel %vm145_vm2, %v6398_v17, 0.0 }
 0xc1a   :  { %v3479_v2 = vrot.slane %v3478_v31, 1  ;;  %4959 = vrcp.f32 %v3473_v20  ;;  %v4952_v5 = vpop.eup %4951  ;;  %v3563_v33 = vsel %vm145_vm2, %v3547_v14, 0.0  ;;  %v3570_v50 = vsel %vm145_vm2, %v3548_v4, 0.0 }
 0xc1b   :  { %v3486_v10 = vrot.slane %v3485_v30, 1  ;;  %v3577_v60 = vsel %vm145_vm2, %v3549_v43, 0.0  ;;  %v3530_v24 = vmul.f32 %v4950_v3, %v6301_v28  ;;  %v3564_v47 = vrot.slane %v3563_v33, 4  ;;  %v4954_v34 = vpop.eup %4953 }
 0xc1c   :  { %v3480_v57 = vadd.f32 %v3479_v2, %v3478_v31  ;;  %v3571_v36 = vrot.slane %v3570_v50, 4  ;;  %v3578_v37 = vrot.slane %v3577_v60, 4  ;;  %v3584_v25 = vsel %vm145_vm2, %v3550_v44, 0.0 }
 0xc1d   :  { %v3487_v41 = vadd.f32 %v3486_v10, %v3485_v30  ;;  %v3591_v42 = vsel %vm145_vm2, %v3551_v0, 0.0  ;;  %v3565_v56 = vadd.f32 %v3564_v47, %v3563_v33  ;;  %v3585_v54 = vrot.slane %v3584_v25, 4 }
 0xc1e   :  { %v4956_v6 = vpop.eup %4955  ;;  %4961 = vrcp.f32 %v3480_v57  ;;  %v3572_v61 = vadd.f32 %v3571_v36, %v3570_v50  ;;  %v3579_v26 = vadd.f32 %v3578_v37, %v3577_v60  ;;  %v3592_v28 = vrot.slane %v3591_v42, 4 }
 0xc1f   :  { %v4958_v45 = vpop.eup %4957  ;;  %4963 = vrcp.f32 %v3487_v41  ;;  %v3533_v46 = vmul.f32 %v4956_v6, %v6365_v8  ;;  %v3566_v29 = vrot.slane %v3565_v56, 2  ;;  %v3586_v62 = vadd.f32 %v3585_v54, %v3584_v25 }
 0xc20   :  { %v4960_v39 = vpop.eup %4959  ;;  %v3534_v18 = vmul.f32 %v4958_v45, %v6370_v7  ;;  %v3573_v21 = vrot.slane %v3572_v61, 2  ;;  %v3580_v48 = vrot.slane %v3579_v26, 2  ;;  %v3593_v38 = vadd.f32 %v3592_v28, %v3591_v42 }
 0xc21   :  { %v3535_v27 = vmul.f32 %v4960_v39, %v6375_v32  ;;  %v3555_v14 = vmul.f32 %v6417_v58, %v3533_v46  ;;  %v3531_v8 = vmul.f32 %v4952_v5, %v6305_v63  ;;  %v3567_v4 = vadd.f32 %v3566_v29, %v3565_v56 }
 0xc22   :  { %v3556_v23 = vmul.f32 %v6417_v58, %v3534_v18  ;;  %v3574_v19 = vadd.f32 %v3573_v21, %v3572_v61  ;;  %v3489_v11 = vrot.slane %v3488_v9, 4  ;;  %v3532_v55 = vmul.f32 %v4954_v34, %v6309_v53 }
 0xc23   :  { %v3552_v7 = vmul.f32 %v6393_v15, %v3530_v24  ;;  %v3581_v12 = vadd.f32 %v3580_v48, %v3579_v26  ;;  %v3619_v51 = vsel %vm145_vm2, %v3555_v14, 0.0  ;;  %v3568_v32 = vrot.slane %v3567_v4, 1 }
 0xc24   :  { %v4962_v59 = vpop.eup %4961  ;;  %v3575_v43 = vrot.slane %v3574_v19, 1  ;;  %v3587_v20 = vrot.slane %v3586_v62, 2  ;;  %v3557_v3 = vmul.f32 %v6417_v58, %v3535_v27  ;;  %v3626_v30 = vsel %vm145_vm2, %v3556_v23, 0.0 }
 0xc25   :  { %v4964_v31 = vpop.eup %4963  ;;  %v3582_v63 = vrot.slane %v3581_v12, 1  ;;  %v3594_v44 = vrot.slane %v3593_v38, 2  ;;  %v3395_v0 = vmul.f32 1.442695, %v3364_v1  ;;  %v3553_v2 = vmul.f32 %v6393_v15, %v3531_v8 }
 0xc26   :  { %v3620_v53 = vrot.slane %v3619_v51, 4  ;;  %v3554_v5 = vmul.f32 %v6393_v15, %v3532_v55  ;;  %v3569_v10 = vadd.f32 %v3568_v32, %v3567_v4  ;;  %v3576_v33 = vadd.f32 %v3575_v43, %v3574_v19 }
 0xc27   :  { %v3490_v50 = vadd.f32 %v3489_v11, %v3488_v9  ;;  %v3536_v60 = vmul.f32 %v4962_v59, %v6385_v52  ;;  %v3627_v57 = vrot.slane %v3626_v30, 4  ;;  %v3588_v24 = vadd.f32 %v3587_v20, %v3586_v62 }
 0xc28   :  { %v3633_v47 = vsel %vm145_vm2, %v3557_v3, 0.0  ;;  %v3583_v36 = vadd.f32 %v3582_v63, %v3581_v12  ;;  %v3595_v34 = vadd.f32 %v3594_v44, %v3593_v38  ;;  %v3598_v41 = vsel %vm145_vm2, %v3552_v7, 0.0 }
 0xc29   :  { %v3537_v1 = vmul.f32 %v4964_v31, %v6387_v40  ;;  %v3589_v37 = vrot.slane %v3588_v24, 1  ;;  %v3599_v25 = vrot.slane %v3598_v41, 4  ;;  %v3605_v42 = vsel %vm145_vm2, %v3553_v2, 0.0 }
 0xc2a   :  { %v3621_v15 = vadd.f32 %v3620_v53, %v3619_v51  ;;  %v3606_v6 = vrot.slane %v3605_v42, 4  ;;  %v3612_v9 = vsel %vm145_vm2, %v3554_v5, 0.0  ;;  %v3698_v52 = vsel %vm780_vm3, %v3576_v33, %v3569_v10 }
 0xc2b   :  { %v3634_v56 = vrot.slane %v3633_v47, 4  ;;  %v3596_v61 = vrot.slane %v3595_v34, 1  ;;  %v3600_v54 = vadd.f32 %v3599_v25, %v3598_v41  ;;  %v3613_v45 = vrot.slane %v3612_v9, 4 }
 0xc2c   :  { %v3607_v46 = vadd.f32 %v3606_v6, %v3605_v42  ;;  %v3699_v26 = vsel %vm782_vm4, %v3583_v36, %v3698_v52  ;;  %4965 = vpow2.f32 %v3395_v0  ;;  %v3491_v28 = vrot.slane %v3490_v50, 2 }
 0xc2d   :  { %v3590_v40 = vadd.f32 %v3589_v37, %v3588_v24  ;;  %v3601_v39 = vrot.slane %v3600_v54, 2  ;;  %v3614_v18 = vadd.f32 %v3613_v45, %v3612_v9  ;;  %v3495_v29 = vsel %vm145_vm2, %v6401_v22, 0.0 }
 0xc2e   :  { %v3558_v21 = vmul.f32 %v6417_v58, %v3536_v60  ;;  %v3608_v62 = vrot.slane %v3607_v46, 2  ;;  %v3492_v27 = vadd.f32 %v3491_v28, %v3490_v50  ;;  %v3496_v14 = vrot.slane %v3495_v29, 4 }
 0xc2f   :  { %v3628_v48 = vadd.f32 %v3627_v57, %v3626_v30  ;;  %v3602_v38 = vadd.f32 %v3601_v39, %v3600_v54  ;;  %v3615_v23 = vrot.slane %v3614_v18, 2  ;;  %v3700_v8 = vsel %vm784_vm5, %v3590_v40, %v3699_v26 }
 0xc30   :  { %v3597_v4 = vadd.f32 %v3596_v61, %v3595_v34  ;;  %v3609_v19 = vadd.f32 %v3608_v62, %v3607_v46  ;;  %v3493_v11 = vrot.slane %v3492_v27, 1  ;;  %v3497_v55 = vadd.f32 %v3496_v14, %v3495_v29 }
 0xc31   :  { %v3559_v7 = vmul.f32 %v6417_v58, %v3537_v1  ;;  %v3622_v12 = vrot.slane %v3621_v15, 2  ;;  %v3603_v59 = vrot.slane %v3602_v38, 1  ;;  %v3616_v51 = vadd.f32 %v3615_v23, %v3614_v18 }
 0xc32   :  { %v6444_v32 = vpop.eup %4965  ;;  %v3610_v43 = vrot.slane %v3609_v19, 1  ;;  %v3701_v20 = vsel %vm786_vm6, %v3597_v4, %v3700_v8  ;;  %v3494_v31 = vadd.f32 %v3493_v11, %v3492_v27  ;;  %v3498_v3 = vrot.slane %v3497_v55, 2 }
 0xc33   :  { %v3640_v30 = vsel %vm145_vm2, %v3558_v21, 0.0  ;;  %v3604_v63 = vadd.f32 %v3603_v59, %v3602_v38  ;;  %v3617_v44 = vrot.slane %v3616_v51, 1  ;;  %v3502_v0 = vsel %vm145_vm2, %v6444_v32, 0.0 }
 0xc34   :  { %v3611_v2 = vadd.f32 %v3610_v43, %v3609_v19  ;;  %v3499_v53 = vadd.f32 %v3498_v3, %v3497_v55  ;;  %v3503_v5 = vrot.slane %v3502_v0, 4  ;;  %4967 = vrcp.f32 %v3494_v31 }
 0xc35   :  { %v3629_v10 = vrot.slane %v3628_v48, 2  ;;  %v3635_v33 = vadd.f32 %v3634_v56, %v3633_v47  ;;  %v3618_v50 = vadd.f32 %v3617_v44, %v3616_v51  ;;  %v3702_v60 = vsel %vm788_vm7, %v3604_v63, %v3701_v20 }
 0xc36   :  { %v3641_v57 = vrot.slane %v3640_v30, 4  ;;  %v3703_v24 = vsel %vm790_vm8, %v3611_v2, %v3702_v60  ;;  %v3500_v36 = vrot.slane %v3499_v53, 1  ;;  %v3504_v34 = vadd.f32 %v3503_v5, %v3502_v0 }
 0xc37   :  { %v3704_v41 = vsel %vm792_vm9, %v3618_v50, %v3703_v24  ;;  %v3647_v1 = vsel %vm145_vm2, %v3559_v7, 0.0  ;;  %v3623_v42 = vadd.f32 %v3622_v12, %v3621_v15  ;;  %v3636_v6 = vrot.slane %v3635_v33, 2 }
 0xc38   :  { %4672 = vmatmul.msk.f32.vlgmr.msrb.gmra.mxu1 %vm145_vm2, %v3704_v41  ;;  %v3501_v37 = vadd.f32 %v3500_v36, %v3499_v53  ;;  %v3505_v25 = vrot.slane %v3504_v34, 2  ;;  %v3648_v9 = vrot.slane %v3647_v1, 4  ;;  %v3630_v56 = vadd.f32 %v3629_v10, %v3628_v48 }
 0xc39   :  { %v3642_v61 = vadd.f32 %v3641_v57, %v3640_v30  ;;  %v3637_v26 = vadd.f32 %v3636_v6, %v3635_v33  ;;  %v3624_v39 = vrot.slane %v3623_v42, 1  ;;  %v4755_v6 = vld [vmem:[%s6590_s4 + $0x2] ss:$0 sm:$0xff] }
 0xc3a   :  { %v4968_v47 = vpop.eup %4967  ;;  %v3506_v52 = vadd.f32 %v3505_v25, %v3504_v34  ;;  %4969 = vrcp.f32 %v3501_v37  ;;  %v3649_v28 = vadd.f32 %v3648_v9, %v3647_v1  ;;  %v3631_v18 = vrot.slane %v3630_v56, 1 }
 0xc3b   :  { %v3538_v54 = vmul.f32 %v4968_v47, %v6398_v17  ;;  %v3643_v29 = vrot.slane %v3642_v61, 2  ;;  %v3638_v14 = vrot.slane %v3637_v26, 1  ;;  %v3625_v38 = vadd.f32 %v3624_v39, %v3623_v42 }
 0xc3c   :  { %v3507_v45 = vrot.slane %v3506_v52, 1  ;;  %v3650_v48 = vrot.slane %v3649_v28, 2  ;;  %v3632_v17 = vadd.f32 %v3631_v18, %v3630_v56 }
 0xc3d   :  { %v3560_v46 = vmul.f32 %v6417_v58, %v3538_v54  ;;  %v3644_v23 = vadd.f32 %v3643_v29, %v3642_v61  ;;  %v3639_v11 = vadd.f32 %v3638_v14, %v3637_v26 }
 0xc3e   :  { %v3508_v40 = vadd.f32 %v3507_v45, %v3506_v52  ;;  %v3651_v55 = vadd.f32 %v3650_v48, %v3649_v28  ;;  %v3705_v43 = vsel %vm780_vm3, %v3632_v17, %v3625_v38  ;;  %v3804_v17 = vld [vmem:[#allocation6 + $0x80] sm:$0xff] }
 0xc3f   :  { %v3654_v15 = vsel %vm145_vm2, %v3560_v46, 0.0  ;;  %v3645_v59 = vrot.slane %v3644_v23, 1  ;;  %v3706_v63 = vsel %vm782_vm4, %v3639_v11, %v3705_v43 }
 0xc40   :  { %v4970_v21 = vpop.eup %4969  ;;  %4971 = vrcp.f32 %v3508_v40  ;;  %v3655_v62 = vrot.slane %v3654_v15, 4  ;;  %v3652_v30 = vrot.slane %v3651_v55, 1 }
 0xc41   :  { %v3539_v27 = vmul.f32 %v4970_v21, %v6401_v22  ;;  %v3646_v44 = vadd.f32 %v3645_v59, %v3644_v23  ;;  %v3805_v23 = vld [vmem:[#allocation6 + $0x88] sm:$0xff] }
 0xc42   :  { %v3656_v8 = vadd.f32 %v3655_v62, %v3654_v15  ;;  %v3653_v50 = vadd.f32 %v3652_v30, %v3651_v55  ;;  %v3860_v11 = vunpack.c.h.b16 %v3805_v23  ;;  %v3806_v30 = vld [vmem:[#allocation6 + $0x90] sm:$0xff] }
 0xc43   :  { %v3561_v4 = vmul.f32 %v6417_v58, %v3539_v27  ;;  %v3707_v33 = vsel %vm784_vm5, %v3646_v44, %v3706_v63  ;;  %v3807_v63 = vld [vmem:[#allocation6 + $0x98] sm:$0xff] }
 0xc44   :  { %v3657_v19 = vrot.slane %v3656_v8, 2  ;;  %v3876_v59 = vpack.c.b16 %v3860_v11, %v3860_v11  ;;  %v3811_v11 = vld [vmem:[#allocation6 + $0xb8] sm:$0xff] }
 0xc45   :  { %v3661_v7 = vsel %vm145_vm2, %v3561_v4, 0.0  ;;  %v3858_v4 = vunpack.c.h.b16 %v3804_v17 }
 0xc46   :  { %v4972_v12 = vpop.eup %4971  ;;  %v3662_v51 = vrot.slane %v3661_v7, 4  ;;  %v3658_v20 = vadd.f32 %v3657_v19, %v3656_v8  ;;  %v3857_v8 = vunpack.c.l.b16 %v3804_v17  ;;  %v3859_v19 = vunpack.c.l.b16 %v3805_v23 }
 0xc47   :  { %v3540_v22 = vmul.f32 %v4972_v12, %v6444_v32  ;;  %v3708_v32 = vsel %vm786_vm6, %v3653_v50, %v3707_v33 }
 0xc48   :  { %v3663_v31 = vadd.f32 %v3662_v51, %v3661_v7  ;;  %v3659_v53 = vrot.slane %v3658_v20, 1  ;;  %v3873_v55 = vpack.c.b16 %v3857_v8, %v3857_v8  ;;  %v3874_v7 = vpack.c.b16 %v3858_v4, %v3858_v4 }
 0xc49   :  { %v3562_v3 = vmul.f32 %v6417_v58, %v3540_v22  ;;  %v3875_v12 = vpack.c.b16 %v3859_v19, %v3859_v19  ;;  %v3810_v19 = vld [vmem:[#allocation6 + $0xb0] sm:$0xff] }
 0xc4a   :  { %v3664_v0 = vrot.slane %v3663_v31, 2  ;;  %v3660_v24 = vadd.f32 %v3659_v53, %v3658_v20  ;;  %v3893_v22 = vand.u32 %v3873_v55, %v5663_v13  ;;  %v3896_v20 = vand.u32 %v3874_v7, %v5663_v13 }
 0xc4b   :  { %v3668_v2 = vsel %vm145_vm2, %v3562_v3, 0.0  ;;  %v3902_v3 = vand.u32 %v3876_v59, %v5663_v13  ;;  %v3863_v53 = vunpack.c.l.b16 %v3807_v63  ;;  %v3869_v55 = vunpack.c.l.b16 %v3810_v19 }
 0xc4c   :  { %v3665_v5 = vadd.f32 %v3664_v0, %v3663_v31  ;;  %v3669_v10 = vrot.slane %v3668_v2, 4  ;;  %v3709_v34 = vsel %vm788_vm7, %v3660_v24, %v3708_v32  ;;  %v3899_v31 = vand.u32 %v3875_v12, %v5663_v13  ;;  %3947 = vmatpush.bf16.msra.mxu2 %v3893_v22  ;;  %3961 = vmatpush.bf16.msra.mxu3 %v3896_v20 }
 0xc4d   :  { %v3861_v0 = vunpack.c.l.b16 %v3806_v30  ;;  %3989 = vmatpush.bf16.msra.mxu1 %v3902_v3  ;;  %v3870_v7 = vunpack.c.h.b16 %v3810_v19  ;;  %v3871_v12 = vunpack.c.l.b16 %v3811_v11  ;;  %v3872_v59 = vunpack.c.h.b16 %v3811_v11 }
 0xc4e   :  { %v3670_v60 = vadd.f32 %v3669_v10, %v3668_v2  ;;  %v3666_v57 = vrot.slane %v3665_v5, 1  ;;  %v3862_v2 = vunpack.c.h.b16 %v3806_v30  ;;  %3975 = vmatpush.bf16.msra.mxu0 %v3899_v31 }
 0xc4f   :  { %v3877_v33 = vpack.c.b16 %v3861_v0, %v3861_v0  ;;  %v3887_v22 = vpack.c.b16 %v3871_v12, %v3871_v12  ;;  %v3888_v20 = vpack.c.b16 %v3872_v59, %v3872_v59 }
 0xc50   :  { %v3671_v36 = vrot.slane %v3670_v60, 2  ;;  %v3667_v41 = vadd.f32 %v3666_v57, %v3665_v5  ;;  %v3864_v5 = vunpack.c.h.b16 %v3807_v63  ;;  %v3878_v50 = vpack.c.b16 %v3862_v2, %v3862_v2 }
 0xc51   :  { %v3905_v24 = vand.u32 %v3877_v33, %v5663_v13  ;;  %v3935_v30 = vand.u32 %v3887_v22, %v5663_v13  ;;  %v3938_v63 = vand.u32 %v3888_v20, %v5663_v13 }
 0xc52   :  { %v3672_v58 = vadd.f32 %v3671_v36, %v3670_v60  ;;  %v3710_v37 = vsel %vm790_vm8, %v3667_v41, %v3709_v34  ;;  %v3879_v60 = vpack.c.b16 %v3863_v53, %v3863_v53  ;;  %v3880_v32 = vpack.c.b16 %v3864_v5, %v3864_v5  ;;  %v4214_v53 = vld [vmem:[#allocation9 + $0x88] sm:$0xff] }
 0xc53   :  { %v3908_v36 = vand.u32 %v3878_v50, %v5663_v13  ;;  %4003 = vmatpush.bf16.msrb.mxu2 %v3905_v24  ;;  %v4236_v5 = vunpack.c.l.b16 %v4214_v53 }
 0xc54   :  { %v3673_v1 = vrot.slane %v3672_v58, 1  ;;  %v3914_v34 = vand.u32 %v3880_v32, %v5663_v13 }
 0xc55   :  { %4017 = vmatpush.bf16.msrb.mxu3 %v3908_v36  ;;  %v4252_v50 = vpack.c.b16 %v4236_v5, %v4236_v5 }
 0xc56   :  { %v3674_v25 = vadd.f32 %v3673_v1, %v3672_v58  ;;  %v3911_v58 = vand.u32 %v3879_v60, %v5663_v13  ;;  %4045 = vmatpush.bf16.msrb.mxu1 %v3914_v34 }
 0xc58   :  { %v3711_v42 = vsel %vm792_vm9, %v3674_v25, %v3710_v37  ;;  %4031 = vmatpush.bf16.msrb.mxu0 %v3911_v58  ;;  %v4216_v58 = vld [vmem:[#allocation9 + $0x98] sm:$0xff] }
 0xc59   :  { %4673 = vmatmul.msk.f32.gmra.mxu1 %vm145_vm2, %v3711_v42  ;;  %v4240_v34 = vunpack.c.l.b16 %v4216_v58 }
 0xcb5   :  { %v3736_v9 = vpop.f32.mrf.mxu1 }
 0xcb6   :  { %v3737_v47 = vadd.f32 %v4755_v6, %v3736_v9 }
 0xcb8   :  { %v3742_v52 = vadd.f32 %v3737_v47, %v6177_v35 }
 0xcba   :  { %v3748_v56 = vsel %vm145_vm2, %v3742_v52, 0.0 }
 0xcbb   :  { %3749 = vadd.xlane.f32.xlu1 %v3748_v56  ;;  %v4756_v56 = vld [vmem:[%s6591_s5 + $0x2] ss:$0 sm:$0xff] }
 0xcd6   :  { %v3739_v61 = vpop.f32.mrf.mxu1 }
 0xcd7   :  { %v3740_v54 = vadd.f32 %v4755_v6, %v3739_v61 }
 0xcd9   :  { %v3743_v45 = vadd.f32 %v3740_v54, %v6181_v49  ;;  %v3809_v54 = vld [vmem:[#allocation6 + $0xa8] sm:$0xff] }
 0xcdb   :  { %v3751_v46 = vsel %vm145_vm2, %v3743_v45, 0.0 }
 0xcdc   :  { %3752 = vadd.xlane.f32.xlu2 %v3751_v46 }
 0xd2e   :  { %v3750_v26 = vpop.xlane.xlu1 %3749 }
 0xd2f   :  { %v3754_v28 = vmul.f32 %v3750_v26, %v5645_v16 }
 0xd31   :  { %v6480_v40 = vsub.f32 %v3742_v52, %v3754_v28  ;;  %v3808_v52 = vld [vmem:[#allocation6 + $0xa0] sm:$0xff] }
 0xd32   :  { %v3865_v46 = vunpack.c.l.b16 %v3808_v52  ;;  %v3866_v26 = vunpack.c.h.b16 %v3808_v52 }
 0xd33   :  { %v3758_v39 = vmul.f32 %v6480_v40, %v6480_v40 }
 0xd35   :  { %v3760_v35 = vsel %vm145_vm2, %v3758_v39, 0.0  ;;  %v3867_v39 = vunpack.c.l.b16 %v3809_v54 }
 0xd36   :  { %3761 = vadd.xlane.f32.xlu0 %v3760_v35  ;;  %v3868_v35 = vunpack.c.h.b16 %v3809_v54 }
 0xd4f   :  { %v3753_v18 = vpop.xlane.xlu2 %3752 }
 0xd50   :  { %v3755_v29 = vmul.f32 %v3753_v18, %v5645_v16  ;;  %v4757_v18 = vld [vmem:[%s6592_s6 + $0x2] ss:$0 sm:$0xff] }
 0xd52   :  { %v6486_v15 = vsub.f32 %v3743_v45, %v3755_v29 }
 0xd54   :  { %v3759_v49 = vmul.f32 %v6486_v15, %v6486_v15 }
 0xd56   :  { %v3763_v21 = vsel %vm145_vm2, %v3759_v49, 0.0 }
 0xd57   :  { %3764 = vadd.xlane.f32.xlu1 %v3763_v21 }
 0xda9   :  { %v3762_v62 = vpop.xlane.xlu0 %3761 }
 0xdaa   :  { %v3766_v27 = vmul.f32 %v3762_v62, %v5645_v16  ;;  %v3881_v62 = vpack.c.b16 %v3865_v46, %v3865_v46 }
 0xdac   :  { %v3768_v14 = vadd.f32 1e-05, %v3766_v27  ;;  %v3882_v27 = vpack.c.b16 %v3866_v26, %v3866_v26  ;;  %v3917_v23 = vand.u32 %v3881_v62, %v5663_v13  ;;  %v4217_v62 = vld [vmem:[#allocation9 + $0xa0] sm:$0xff] }
 0xdad   :  { %v4242_v12 = vunpack.c.l.b16 %v4217_v62  ;;  %v4243_v59 = vunpack.c.h.b16 %v4217_v62 }
 0xdae   :  { %4973 = vrsqrt.f32 %v3768_v14  ;;  %vm3776_vm4 = vweird.f32 %v3768_v14  ;;  %v3920_v8 = vand.u32 %v3882_v27, %v5663_v13 }
 0xdb4   :  { %v4974_v48 = vpop.eup %4973 }
 0xdb5   :  { %v3771_v38 = vmul.f32 %v4974_v48, %v3768_v14  ;;  %vm3777_vm1 = vweird.f32 %v4974_v48  ;;  %v3884_v14 = vpack.c.b16 %v3868_v35, %v3868_v35  ;;  %v4218_v35 = vld [vmem:[#allocation9 + $0xa8] sm:$0xff] }
 0xdb6   :  { %vm3778_vm5 = vmor %vm3776_vm4, %vm3777_vm1 }
 0xdb7   :  { %v3772_v51 = vmul.f32 %v4974_v48, %v3771_v38 }
 0xdb9   :  { %v3773_v57 = vmul.f32 0.5, %v3772_v51  ;;  %v3885_v51 = vpack.c.b16 %v3869_v55, %v3869_v55 }
 0xdbb   :  { %v3774_v41 = vsub.f32 1.5, %v3773_v57  ;;  %v3929_v31 = vand.u32 %v3885_v51, %v5663_v13  ;;  %v4215_v57 = vld [vmem:[#allocation9 + $0x90] sm:$0xff] }
 0xdbc   :  { %v4238_v32 = vunpack.c.l.b16 %v4215_v57  ;;  %v4239_v36 = vunpack.c.h.b16 %v4215_v57 }
 0xdbd   :  { %v3775_v37 = vmul.f32 %v4974_v48, %v3774_v41  ;;  %v4241_v41 = vunpack.c.h.b16 %v4216_v58  ;;  %v4220_v58 = vld [vmem:[#allocation9 + $0xb8] sm:$0xff] }
 0xdbe   :  { %v4254_v24 = vpack.c.b16 %v4238_v32, %v4238_v32 }
 0xdbf   :  { %v3779_v6 = vsel %vm3778_vm5, %v4974_v48, %v3775_v37  ;;  %v4256_v37 = vpack.c.b16 %v4240_v34, %v4240_v34 }
 0xdc0   :  { %v3790_v61 = vmul.f32 %v3779_v6, %v6480_v40  ;;  %v3883_v40 = vpack.c.b16 %v3867_v39, %v3867_v39 }
 0xdc2   :  { %v3795_v29 = vmul.f32 %v4756_v56, %v3790_v61  ;;  %v3923_v4 = vand.u32 %v3883_v40, %v5663_v13 }
 0xdc4   :  { %v6509_v48 = vadd.f32 %v4757_v18, %v3795_v29 }
 0xdca   :  { %v3765_v43 = vpop.xlane.xlu1 %3764 }
 0xdcb   :  { %v3767_v44 = vmul.f32 %v3765_v43, %v5645_v16  ;;  %v3886_v43 = vpack.c.b16 %v3870_v7, %v3870_v7 }
 0xdcd   :  { %v3769_v10 = vadd.f32 1e-05, %v3767_v44  ;;  %v3932_v3 = vand.u32 %v3886_v43, %v5663_v13 }
 0xdcf   :  { %4975 = vrsqrt.f32 %v3769_v10  ;;  %vm3786_vm7 = vweird.f32 %v3769_v10 }
 0xdd5   :  { %v4976_v1 = vpop.eup %4975 }
 0xdd6   :  { %v3781_v25 = vmul.f32 %v4976_v1, %v3769_v10  ;;  %vm3787_vm6 = vweird.f32 %v4976_v1  ;;  %v4237_v10 = vunpack.c.h.b16 %v4214_v53 }
 0xdd7   :  { %vm3788_vm8 = vmor %vm3786_vm7, %vm3787_vm6 }
 0xdd8   :  { %v3782_v42 = vmul.f32 %v4976_v1, %v3781_v25  ;;  %v4253_v60 = vpack.c.b16 %v4237_v10, %v4237_v10  ;;  %v4257_v25 = vpack.c.b16 %v4241_v41, %v4241_v41 }
 0xdda   :  { %v3783_v9 = vmul.f32 0.5, %v3782_v42  ;;  %v6539_v42 = vld [vmem:[#allocation8 + $0x20] sm:$0xff] }
 0xddb   :  { %v3820_v52 = vperm.slane %v6539_v42, 3  ;;  %v3817_v46 = vperm.slane %v6539_v42, 0  ;;  %v3818_v26 = vperm.slane %v6539_v42, 1  ;;  %v3823_v53 = vperm.slane %v6539_v42, 6 }
 0xddc   :  { %v3784_v47 = vsub.f32 1.5, %v3783_v9  ;;  %v3824_v5 = vperm.slane %v6539_v42, 7  ;;  %v3821_v57 = vperm.slane %v6539_v42, 4  ;;  %v3822_v32 = vperm.slane %v6539_v42, 5 }
 0xdde   :  { %v3785_v45 = vmul.f32 %v4976_v1, %v3784_v47  ;;  %v3819_v47 = vperm.slane %v6539_v42, 2 }
 0xde0   :  { %v3789_v28 = vsel %vm3788_vm8, %v4976_v1, %v3785_v45  ;;  %v4255_v1 = vpack.c.b16 %v4239_v36, %v4239_v36 }
 0xde1   :  { %v3791_v49 = vmul.f32 %v3789_v28, %v6486_v15  ;;  %v3926_v15 = vand.u32 %v3884_v14, %v5663_v13  ;;  %v4213_v13 = vld [vmem:[#allocation9 + $0x80] sm:$0xff] }
 0xde2   :  { %v4234_v44 = vunpack.c.l.b16 %v4213_v13  ;;  %v4235_v2 = vunpack.c.h.b16 %v4213_v13  ;;  %v4258_v13 = vpack.c.b16 %v4242_v12, %v4242_v12 }
 0xde3   :  { %v3796_v21 = vmul.f32 %v4756_v56, %v3791_v49  ;;  %v4244_v49 = vunpack.c.l.b16 %v4218_v35 }
 0xde4   :  { %v4250_v0 = vpack.c.b16 %v4234_v44, %v4234_v44  ;;  %v4251_v33 = vpack.c.b16 %v4235_v2, %v4235_v2  ;;  %v4259_v44 = vpack.c.b16 %v4243_v59, %v4243_v59 }
 0xde5   :  { %v6511_v38 = vadd.f32 %v4757_v18, %v3796_v21  ;;  %v4245_v21 = vunpack.c.h.b16 %v4218_v35 }
 0xde7   :  { %v3802_v17 = vpack.c.bf16 %v6511_v38, %v6509_v48 }
 0xde9   :  { %4676 = vmatmul.msk.bf16.vlgmr.msra.gmra.mxu2 %vm145_vm2, %v3802_v17  ;;  %4677 = vmatmul.msk.bf16.vlgmr.msra.gmra.mxu3 %vm145_vm2, %v3802_v17 }
 0xdea   :  { %4678 = vmatmul.msk.bf16.vlgmr.msra.gmra.mxu0 %vm145_vm2, %v3802_v17  ;;  %4679 = vmatmul.msk.bf16.vlgmr.msra.gmra.mxu1 %vm145_vm2, %v3802_v17 }
 0xdeb   :  { %4059 = vmatpush.bf16.msra.mxu2 %v3917_v23  ;;  %4073 = vmatpush.bf16.msra.mxu3 %v3920_v8 }
 0xdec   :  { %4087 = vmatpush.bf16.msra.mxu0 %v3923_v4  ;;  %4101 = vmatpush.bf16.msra.mxu1 %v3926_v15  ;;  %v4260_v4 = vpack.c.b16 %v4244_v49, %v4244_v49  ;;  %v4261_v15 = vpack.c.b16 %v4245_v21, %v4245_v21 }
 0xdf9   :  { %4680 = vmatmul.msk.bf16.vlgmr.msrb.gmra.mxu2 %vm145_vm2, %v3802_v17  ;;  %4681 = vmatmul.msk.bf16.vlgmr.msrb.gmra.mxu3 %vm145_vm2, %v3802_v17 }
 0xdfa   :  { %4682 = vmatmul.msk.bf16.vlgmr.msrb.gmra.mxu0 %vm145_vm2, %v3802_v17  ;;  %4683 = vmatmul.msk.bf16.vlgmr.msrb.gmra.mxu1 %vm145_vm2, %v3802_v17 }
 0xdfb   :  { %4115 = vmatpush.bf16.msrb.mxu2 %v3929_v31  ;;  %4129 = vmatpush.bf16.msrb.mxu3 %v3932_v3 }
 0xdfc   :  { %4143 = vmatpush.bf16.msrb.mxu0 %v3935_v30  ;;  %4157 = vmatpush.bf16.msrb.mxu1 %v3938_v63 }
 0xe09   :  { %4684 = vmatmul.msk.bf16.vlgmr.msra.gmra.mxu2 %vm145_vm2, %v3802_v17  ;;  %4685 = vmatmul.msk.bf16.vlgmr.msra.gmra.mxu3 %vm145_vm2, %v3802_v17 }
 0xe0a   :  { %4686 = vmatmul.msk.bf16.vlgmr.msra.gmra.mxu0 %vm145_vm2, %v3802_v17  ;;  %4687 = vmatmul.msk.bf16.vlgmr.msra.gmra.mxu1 %vm145_vm2, %v3802_v17 }
 0xe0b   :  { %4289 = vmatpush.bf16.xpose.msra.mxu2 %v4250_v0  ;;  %4303 = vmatpush.bf16.xpose.msra.mxu3 %v4251_v33 }
 0xe0c   :  { %4317 = vmatpush.bf16.xpose.msra.mxu0 %v4252_v50  ;;  %4331 = vmatpush.bf16.xpose.msra.mxu1 %v4253_v60 }
 0xe19   :  { %4688 = vmatmul.msk.bf16.vlgmr.msrb.gmra.mxu2 %vm145_vm2, %v3802_v17  ;;  %4689 = vmatmul.msk.bf16.vlgmr.msrb.gmra.mxu3 %vm145_vm2, %v3802_v17 }
 0xe1a   :  { %4690 = vmatmul.msk.bf16.vlgmr.msrb.gmra.mxu0 %vm145_vm2, %v3802_v17  ;;  %4691 = vmatmul.msk.bf16.vlgmr.msrb.gmra.mxu1 %vm145_vm2, %v3802_v17 }
 0xe1b   :  { %4345 = vmatpush.bf16.xpose.msrb.mxu2 %v4254_v24  ;;  %4359 = vmatpush.bf16.xpose.msrb.mxu3 %v4255_v1  ;;  %v4248_v1 = vunpack.c.l.b16 %v4220_v58 }
 0xe1c   :  { %4373 = vmatpush.bf16.xpose.msrb.mxu0 %v4256_v37  ;;  %4387 = vmatpush.bf16.xpose.msrb.mxu1 %v4257_v25  ;;  %v4249_v37 = vunpack.c.h.b16 %v4220_v58  ;;  %v4219_v25 = vld [vmem:[#allocation9 + $0xb0] sm:$0xff] }
 0xe1d   :  { %v4247_v35 = vunpack.c.h.b16 %v4219_v25 }
 0xe67   :  { %v3977_v6 = vpop.f32.mrf.mxu0  ;;  %v3991_v9 = vpop.f32.mrf.mxu1 }
 0xe68   :  { %v3978_v54 = vadd.f32 %v3977_v6, %v3819_v47  ;;  %v3992_v45 = vadd.f32 %v3991_v9, %v3820_v52 }
 0xe6a   :  { %v4166_v27 = vmax.f32 %v3978_v54, 0.0  ;;  %v4167_v40 = vmax.f32 %v3992_v45, 0.0  ;;  %v4264_v54 = vpack.c.b16 %v4248_v1, %v4248_v1  ;;  %v4265_v45 = vpack.c.b16 %v4249_v37, %v4249_v37 }
 0xe6c   :  { %v3949_v56 = vpop.f32.mrf.mxu2  ;;  %v3963_v61 = vpop.f32.mrf.mxu3 }
 0xe6d   :  { %v3950_v23 = vadd.f32 %v3949_v56, %v3817_v46  ;;  %v3964_v8 = vadd.f32 %v3963_v61, %v3818_v26 }
 0xe6f   :  { %v3979_v28 = vpop.f32.mrf.mxu0  ;;  %v3993_v39 = vpop.f32.mrf.mxu1  ;;  %v4164_v22 = vmax.f32 %v3950_v23, 0.0  ;;  %v4165_v20 = vmax.f32 %v3964_v8, 0.0  ;;  %v4263_v8 = vpack.c.b16 %v4247_v35, %v4247_v35 }
 0xe70   :  { %v3980_v18 = vadd.f32 %v3979_v28, %v3819_v47  ;;  %v3994_v29 = vadd.f32 %v3993_v39, %v3820_v52  ;;  %v4246_v39 = vunpack.c.l.b16 %v4219_v25 }
 0xe72   :  { %v4182_v14 = vmax.f32 %v3980_v18, 0.0  ;;  %v4183_v17 = vmax.f32 %v3994_v29, 0.0  ;;  %v4262_v23 = vpack.c.b16 %v4246_v39, %v4246_v39 }
 0xe74   :  { %v4198_v19 = vpack.c.bf16 %v4182_v14, %v4166_v27  ;;  %v4199_v11 = vpack.c.bf16 %v4183_v17, %v4167_v40  ;;  %v3951_v55 = vpop.f32.mrf.mxu2  ;;  %v3965_v7 = vpop.f32.mrf.mxu3  ;;  %v6549_v40 = vld [vmem:[#allocation8 + $0x28] sm:$0xff] }
 0xe75   :  { %v3952_v51 = vadd.f32 %v3951_v55, %v3817_v46  ;;  %v3966_v43 = vadd.f32 %v3965_v7, %v3818_v26  ;;  %v3831_v37 = vperm.slane %v6549_v40, 6  ;;  %v3832_v25 = vperm.slane %v6549_v40, 7 }
 0xe76   :  { %4318 = vmatmul.bf16.vlgmr.msra.gmra.mxu0 %v4198_v19  ;;  %4332 = vmatmul.bf16.vlgmr.msra.gmra.mxu1 %v4199_v11  ;;  %v3827_v19 = vperm.slane %v6549_v40, 2  ;;  %v3828_v11 = vperm.slane %v6549_v40, 3 }
 0xe77   :  { %v4180_v31 = vmax.f32 %v3952_v51, 0.0  ;;  %v4181_v3 = vmax.f32 %v3966_v43, 0.0  ;;  %v4033_v30 = vpop.f32.mrf.mxu0  ;;  %v4047_v63 = vpop.f32.mrf.mxu1  ;;  %4429 = vmatpush.bf16.xpose.msra.mxu0 %v4260_v4  ;;  %4443 = vmatpush.bf16.xpose.msra.mxu1 %v4261_v15  ;;  %v3825_v51 = vperm.slane %v6549_v40, 0  ;;  %v3826_v43 = vperm.slane %v6549_v40, 1 }
 0xe78   :  { %v4034_v50 = vadd.f32 %v4033_v30, %v3823_v53  ;;  %v4048_v60 = vadd.f32 %v4047_v63, %v3824_v5 }
 0xe79   :  { %v4196_v0 = vpack.c.bf16 %v4180_v31, %v4164_v22  ;;  %v4197_v2 = vpack.c.bf16 %v4181_v3, %v4165_v20 }
 0xe7a   :  { %v4170_v6 = vmax.f32 %v4034_v50, 0.0  ;;  %v4171_v9 = vmax.f32 %v4048_v60, 0.0 }
 0xe7b   :  { %4290 = vmatmul.bf16.vlgmr.msra.gmra.mxu2 %v4196_v0  ;;  %4304 = vmatmul.bf16.vlgmr.msra.gmra.mxu3 %v4197_v2 }
 0xe7c   :  { %v4005_v10 = vpop.f32.mrf.mxu2  ;;  %v4019_v33 = vpop.f32.mrf.mxu3  ;;  %4401 = vmatpush.bf16.xpose.msra.mxu2 %v4258_v13  ;;  %4415 = vmatpush.bf16.xpose.msra.mxu3 %v4259_v44 }
 0xe7d   :  { %v4006_v56 = vadd.f32 %v4005_v10, %v3821_v57  ;;  %v4020_v61 = vadd.f32 %v4019_v33, %v3822_v32 }
 0xe7f   :  { %v4035_v24 = vpop.f32.mrf.mxu0  ;;  %v4049_v36 = vpop.f32.mrf.mxu1  ;;  %v4168_v49 = vmax.f32 %v4006_v56, 0.0  ;;  %v4169_v21 = vmax.f32 %v4020_v61, 0.0  ;;  %v3829_v56 = vperm.slane %v6549_v40, 4  ;;  %v3830_v61 = vperm.slane %v6549_v40, 5 }
 0xe80   :  { %v4036_v34 = vadd.f32 %v4035_v24, %v3823_v53  ;;  %v4050_v41 = vadd.f32 %v4049_v36, %v3824_v5 }
 0xe82   :  { %v4186_v47 = vmax.f32 %v4036_v34, 0.0  ;;  %v4187_v52 = vmax.f32 %v4050_v41, 0.0 }
 0xe84   :  { %v4202_v46 = vpack.c.bf16 %v4186_v47, %v4170_v6  ;;  %v4203_v26 = vpack.c.bf16 %v4187_v52, %v4171_v9  ;;  %v4007_v28 = vpop.f32.mrf.mxu2  ;;  %v4021_v42 = vpop.f32.mrf.mxu3 }
 0xe85   :  { %v4008_v18 = vadd.f32 %v4007_v28, %v3821_v57  ;;  %v4022_v29 = vadd.f32 %v4021_v42, %v3822_v32 }
 0xe86   :  { %4374 = vmatmul.bf16.vlgmr.msrb.gmra.mxu0 %v4202_v46  ;;  %4388 = vmatmul.bf16.vlgmr.msrb.gmra.mxu1 %v4203_v26 }
 0xe87   :  { %v4184_v62 = vmax.f32 %v4008_v18, 0.0  ;;  %v4185_v27 = vmax.f32 %v4022_v29, 0.0  ;;  %v4089_v14 = vpop.f32.mrf.mxu0  ;;  %v4103_v17 = vpop.f32.mrf.mxu1  ;;  %4485 = vmatpush.bf16.xpose.msrb.mxu0 %v4264_v54  ;;  %4499 = vmatpush.bf16.xpose.msrb.mxu1 %v4265_v45 }
 0xe88   :  { %v4090_v12 = vadd.f32 %v4089_v14, %v3827_v19  ;;  %v4104_v59 = vadd.f32 %v4103_v17, %v3828_v11 }
 0xe89   :  { %v4200_v4 = vpack.c.bf16 %v4184_v62, %v4168_v49  ;;  %v4201_v15 = vpack.c.bf16 %v4185_v27, %v4169_v21 }
 0xe8a   :  { %v4174_v30 = vmax.f32 %v4090_v12, 0.0  ;;  %v4175_v63 = vmax.f32 %v4104_v59, 0.0 }
 0xe8b   :  { %4346 = vmatmul.bf16.vlgmr.msrb.gmra.mxu2 %v4200_v4  ;;  %4360 = vmatmul.bf16.vlgmr.msrb.gmra.mxu3 %v4201_v15 }
 0xe8c   :  { %v4061_v55 = vpop.f32.mrf.mxu2  ;;  %v4075_v7 = vpop.f32.mrf.mxu3  ;;  %4457 = vmatpush.bf16.xpose.msrb.mxu2 %v4262_v23  ;;  %4471 = vmatpush.bf16.xpose.msrb.mxu3 %v4263_v8 }
 0xe8d   :  { %v4062_v0 = vadd.f32 %v4061_v55, %v3825_v51  ;;  %v4076_v2 = vadd.f32 %v4075_v7, %v3826_v43 }
 0xe8f   :  { %v4091_v22 = vpop.f32.mrf.mxu0  ;;  %v4105_v20 = vpop.f32.mrf.mxu1  ;;  %v4172_v57 = vmax.f32 %v4062_v0, 0.0  ;;  %v4173_v32 = vmax.f32 %v4076_v2, 0.0 }
 0xe90   :  { %v4092_v31 = vadd.f32 %v4091_v22, %v3827_v19  ;;  %v4106_v3 = vadd.f32 %v4105_v20, %v3828_v11 }
 0xe92   :  { %v4190_v13 = vmax.f32 %v4092_v31, 0.0  ;;  %v4191_v44 = vmax.f32 %v4106_v3, 0.0 }
 0xe94   :  { %v4206_v53 = vpack.c.bf16 %v4190_v13, %v4174_v30  ;;  %v4207_v5 = vpack.c.bf16 %v4191_v44, %v4175_v63  ;;  %v4063_v10 = vpop.f32.mrf.mxu2  ;;  %v4077_v33 = vpop.f32.mrf.mxu3 }
 0xe95   :  { %v4064_v50 = vadd.f32 %v4063_v10, %v3825_v51  ;;  %v4078_v60 = vadd.f32 %v4077_v33, %v3826_v43  ;;  %v4758_v43 = vld [vmem:[%s6596_s10 + $0x2] ss:$0 sm:$0xff] }
 0xe96   :  { %4430 = vmatmul.bf16.vlgmr.msra.gmra.mxu0 %v4206_v53  ;;  %4444 = vmatmul.bf16.vlgmr.msra.gmra.mxu1 %v4207_v5 }
 0xe97   :  { %v4188_v24 = vmax.f32 %v4064_v50, 0.0  ;;  %v4189_v36 = vmax.f32 %v4078_v60, 0.0  ;;  %v4145_v58 = vpop.f32.mrf.mxu0  ;;  %v4159_v34 = vpop.f32.mrf.mxu1 }
 0xe98   :  { %v4146_v47 = vadd.f32 %v4145_v58, %v3831_v37  ;;  %v4160_v52 = vadd.f32 %v4159_v34, %v3832_v25 }
 0xe99   :  { %v4204_v41 = vpack.c.bf16 %v4188_v24, %v4172_v57  ;;  %v4205_v1 = vpack.c.bf16 %v4189_v36, %v4173_v32 }
 0xe9a   :  { %v4178_v28 = vmax.f32 %v4146_v47, 0.0  ;;  %v4179_v42 = vmax.f32 %v4160_v52, 0.0 }
 0xe9b   :  { %4402 = vmatmul.bf16.vlgmr.msra.gmra.mxu2 %v4204_v41  ;;  %4416 = vmatmul.bf16.vlgmr.msra.gmra.mxu3 %v4205_v1 }
 0xe9c   :  { %v4117_v6 = vpop.f32.mrf.mxu2  ;;  %v4131_v9 = vpop.f32.mrf.mxu3 }
 0xe9d   :  { %v4118_v18 = vadd.f32 %v4117_v6, %v3829_v56  ;;  %v4132_v29 = vadd.f32 %v4131_v9, %v3830_v61 }
 0xe9f   :  { %v4147_v54 = vpop.f32.mrf.mxu0  ;;  %v4161_v45 = vpop.f32.mrf.mxu1  ;;  %v4176_v23 = vmax.f32 %v4118_v18, 0.0  ;;  %v4177_v40 = vmax.f32 %v4132_v29, 0.0 }
 0xea0   :  { %v4148_v46 = vadd.f32 %v4147_v54, %v3831_v37  ;;  %v4162_v26 = vadd.f32 %v4161_v45, %v3832_v25 }
 0xea2   :  { %v4194_v39 = vmax.f32 %v4148_v46, 0.0  ;;  %v4195_v35 = vmax.f32 %v4162_v26, 0.0 }
 0xea4   :  { %v4210_v49 = vpack.c.bf16 %v4194_v39, %v4178_v28  ;;  %v4211_v21 = vpack.c.bf16 %v4195_v35, %v4179_v42  ;;  %v4119_v62 = vpop.f32.mrf.mxu2  ;;  %v4133_v27 = vpop.f32.mrf.mxu3 }
 0xea5   :  { %v4120_v14 = vadd.f32 %v4119_v62, %v3829_v56  ;;  %v4134_v17 = vadd.f32 %v4133_v27, %v3830_v61 }
 0xea6   :  { %4486 = vmatmul.bf16.vlgmr.msrb.gmra.mxu0 %v4210_v49  ;;  %4500 = vmatmul.bf16.vlgmr.msrb.gmra.mxu1 %v4211_v21 }
 0xea7   :  { %v4192_v8 = vmax.f32 %v4120_v14, 0.0  ;;  %v4193_v4 = vmax.f32 %v4134_v17, 0.0 }
 0xea9   :  { %v4208_v15 = vpack.c.bf16 %v4192_v8, %v4176_v23  ;;  %v4209_v19 = vpack.c.bf16 %v4193_v4, %v4177_v40 }
 0xeab   :  { %4458 = vmatmul.bf16.vlgmr.msrb.gmra.mxu2 %v4208_v15  ;;  %4472 = vmatmul.bf16.vlgmr.msrb.gmra.mxu3 %v4209_v19 }
 0xef3   :  { %v4319_v11 = vpop.f32.mrf.mxu0  ;;  %v4333_v55 = vpop.f32.mrf.mxu1 }
 0xefb   :  { %v4321_v7 = vpop.f32.mrf.mxu0  ;;  %v4335_v51 = vpop.f32.mrf.mxu1 }
 0xefe   :  { %v4291_v12 = vpop.f32.mrf.mxu2  ;;  %v4305_v59 = vpop.f32.mrf.mxu3 }
 0xeff   :  { %v4292_v22 = vadd.f32 %v4758_v43, %v4291_v12 }
 0xf01   :  { %v4306_v30 = vadd.f32 %v4305_v59, %v4292_v22 }
 0xf03   :  { %v4375_v3 = vpop.f32.mrf.mxu0  ;;  %v4389_v63 = vpop.f32.mrf.mxu1  ;;  %v4320_v13 = vadd.f32 %v4319_v11, %v4306_v30 }
 0xf05   :  { %v4334_v10 = vadd.f32 %v4333_v55, %v4320_v13 }
 0xf06   :  { %v4293_v20 = vpop.f32.mrf.mxu2  ;;  %v4307_v31 = vpop.f32.mrf.mxu3 }
 0xf07   :  { %v4294_v44 = vadd.f32 %v4758_v43, %v4293_v20 }
 0xf09   :  { %v4308_v53 = vadd.f32 %v4307_v31, %v4294_v44 }
 0xf0b   :  { %v4377_v5 = vpop.f32.mrf.mxu0  ;;  %v4391_v33 = vpop.f32.mrf.mxu1  ;;  %v4322_v60 = vadd.f32 %v4321_v7, %v4308_v53 }
 0xf0d   :  { %v4336_v36 = vadd.f32 %v4335_v51, %v4322_v60  ;;  %v5152_v60 = vmov 0  }
 0xf0e   :  { %v4347_v0 = vpop.f32.mrf.mxu2  ;;  %v4361_v2 = vpop.f32.mrf.mxu3  ;;  %4738 = vset.pattern.permute.xlu2 %v5152_v60  ;;  %4739 = vset.pattern.permute.xlu0 %v5152_v60 }
 0xf0f   :  { %v4348_v50 = vadd.f32 %v4347_v0, %v4334_v10 }
 0xf11   :  { %v4362_v24 = vadd.f32 %v4361_v2, %v4348_v50 }
 0xf13   :  { %v4376_v58 = vadd.f32 %v4375_v3, %v4362_v24  ;;  %v4431_v34 = vpop.f32.mrf.mxu0  ;;  %v4445_v1 = vpop.f32.mrf.mxu1 }
 0xf15   :  { %v4390_v9 = vadd.f32 %v4389_v63, %v4376_v58 }
 0xf16   :  { %v4349_v57 = vpop.f32.mrf.mxu2  ;;  %v4363_v32 = vpop.f32.mrf.mxu3 }
 0xf17   :  { %v4350_v41 = vadd.f32 %v4349_v57, %v4336_v36 }
 0xf19   :  { %v4364_v6 = vadd.f32 %v4363_v32, %v4350_v41 }
 0xf1b   :  { %v4378_v52 = vadd.f32 %v4377_v5, %v4364_v6  ;;  %v4433_v56 = vpop.f32.mrf.mxu0  ;;  %v4447_v26 = vpop.f32.mrf.mxu1 }
 0xf1d   :  { %v4392_v46 = vadd.f32 %v4391_v33, %v4378_v52  ;;  %v4762_v33 = vld [vmem:[#allocation2] ss:$0 sm:$0xff] }
 0xf1e   :  { %v4403_v37 = vpop.f32.mrf.mxu2  ;;  %v4417_v25 = vpop.f32.mrf.mxu3 }
 0xf1f   :  { %v4404_v47 = vadd.f32 %v4403_v37, %v4390_v9 }
 0xf21   :  { %v4418_v61 = vadd.f32 %v4417_v25, %v4404_v47  ;;  %v4760_v47 = vld [vmem:[#allocation11 + $0x2] ss:$0 sm:$0xff] }
 0xf23   :  { %v4432_v28 = vadd.f32 %v4431_v34, %v4418_v61  ;;  %v4487_v21 = vpop.f32.mrf.mxu0  ;;  %v4501_v14 = vpop.f32.mrf.mxu1  ;;  %v4761_v61 = vld [vmem:[%s6599_s13] ss:$0 sm:$0xff] }
 0xf25   :  { %v4446_v35 = vadd.f32 %v4445_v1, %v4432_v28 }
 0xf26   :  { %v4405_v54 = vpop.f32.mrf.mxu2  ;;  %v4419_v45 = vpop.f32.mrf.mxu3 }
 0xf27   :  { %v4406_v42 = vadd.f32 %v4405_v54, %v4392_v46 }
 0xf29   :  { %v4420_v39 = vadd.f32 %v4419_v45, %v4406_v42 }
 0xf2b   :  { %v4434_v62 = vadd.f32 %v4433_v56, %v4420_v39  ;;  %v4489_v7 = vpop.f32.mrf.mxu0  ;;  %v4503_v59 = vpop.f32.mrf.mxu1 }
 0xf2d   :  { %v4448_v23 = vadd.f32 %v4447_v26, %v4434_v62 }
 0xf2e   :  { %v4459_v18 = vpop.f32.mrf.mxu2  ;;  %v4473_v29 = vpop.f32.mrf.mxu3 }
 0xf2f   :  { %v4460_v49 = vadd.f32 %v4459_v18, %v4446_v35 }
 0xf31   :  { %v4474_v27 = vadd.f32 %v4473_v29, %v4460_v49 }
 0xf33   :  { %v4488_v17 = vadd.f32 %v4487_v21, %v4474_v27 }
 0xf35   :  { %v4502_v40 = vadd.f32 %v4501_v14, %v4488_v17 }
 0xf36   :  { %v4461_v8 = vpop.f32.mrf.mxu2  ;;  %v4475_v19 = vpop.f32.mrf.mxu3 }
 0xf37   :  { %v4462_v4 = vadd.f32 %v4461_v8, %v4448_v23  ;;  %v4506_v15 = vadd.f32 %v4502_v40, %v6509_v48  ;;  %v6611_v23 = vld [vmem:[#allocation17_spill] sm:$0xff] }
 0xf39   :  { %v4476_v11 = vadd.f32 %v4475_v19, %v4462_v4  ;;  %v4512_v55 = vsel %vm145_vm2, %v4506_v15, 0.0 }
 0xf3a   :  { %4513 = vadd.xlane.f32.xlu2 %v4512_v55 }
 0xf3b   :  { %v4490_v12 = vadd.f32 %v4489_v7, %v4476_v11 }
 0xf3d   :  { %v4504_v51 = vadd.f32 %v4503_v59, %v4490_v12 }
 0xf3f   :  { %v4507_v43 = vadd.f32 %v4504_v51, %v6511_v38 }
 0xf41   :  { %v4515_v22 = vsel %vm145_vm2, %v4507_v43, 0.0 }
 0xf42   :  { %4516 = vadd.xlane.f32.xlu0 %v4515_v22 }
 0xfad   :  { %v4514_v20 = vpop.xlane.xlu2 %4513 }
 0xfae   :  { %v4518_v31 = vmul.f32 %v4514_v20, %v5645_v16 }
 0xfb0   :  { %v4520_v3 = vsub.f32 %v4506_v15, %v4518_v31 }
 0xfb2   :  { %v4522_v30 = vmul.f32 %v4520_v3, %v4520_v3 }
 0xfb4   :  { %v4524_v48 = vsel %vm145_vm2, %v4522_v30, 0.0 }
 0xfb5   :  { %v4517_v63 = vpop.xlane.xlu0 %4516  ;;  %4525 = vadd.xlane.f32.xlu1 %v4524_v48 }
 0xfb6   :  { %v4519_v13 = vmul.f32 %v4517_v63, %v5645_v16 }
 0xfb8   :  { %v4521_v44 = vsub.f32 %v4507_v43, %v4519_v13 }
 0xfba   :  { %v4523_v0 = vmul.f32 %v4521_v44, %v4521_v44 }
 0xfbc   :  { %v4527_v2 = vsel %vm145_vm2, %v4523_v0, 0.0 }
 0xfbd   :  { %4528 = vadd.xlane.f32.xlu2 %v4527_v2 }
 0xfd5   :  { %4582 = vperm.xlu2 %4738, %v4762_v33  }
0x1028   :  { %v4526_v38 = vpop.xlane.xlu1 %4525 }
0x1029   :  { %v4530_v53 = vmul.f32 %v4526_v38, %v5645_v16 }
0x102b   :  { %v4532_v5 = vadd.f32 1e-05, %v4530_v53 }
0x102d   :  { %4977 = vrsqrt.f32 %v4532_v5  ;;  %vm4540_vm0 = vweird.f32 %v4532_v5 }
0x1030   :  { %v4529_v10 = vpop.xlane.xlu2 %4528 }
0x1031   :  { %v4531_v50 = vmul.f32 %v4529_v10, %v5645_v16  ;;  %v4759_v16 = vld [vmem:[%s6597_s11 + $0x2] ss:$0 sm:$0xff]  ;;  %s5153_s11 = smov [#allocation12]  }
0x1032   :  { %s4600_s13 = sshll.u32 %s5153_s11, 4  ;;  %s4601_s13 = int_to_ptr.vmem [resolvable:$true] %s4600_s13 }
0x1033   :  { %v4978_v57 = vpop.eup %4977  ;;  %v4533_v32 = vadd.f32 1e-05, %v4531_v50 }
0x1034   :  { %v4535_v24 = vmul.f32 %v4978_v57, %v4532_v5  ;;  %vm4541_vm9 = vweird.f32 %v4978_v57 }
0x1035   :  { %4979 = vrsqrt.f32 %v4533_v32  ;;  %vm4542_vm10 = vmor %vm4540_vm0, %vm4541_vm9  ;;  %vm4550_vm12 = vweird.f32 %v4533_v32 }
0x1036   :  { %v4536_v36 = vmul.f32 %v4978_v57, %v4535_v24 }
0x1038   :  { %v4537_v58 = vmul.f32 0.5, %v4536_v36  ;;  %v4583_v62 = vpop.permute.xlu2 %4582 }
0x103a   :  { %v4538_v34 = vsub.f32 1.5, %v4537_v58 }
0x103b   :  { %v4980_v41 = vpop.eup %4979 }
0x103c   :  { %v4539_v1 = vmul.f32 %v4978_v57, %v4538_v34  ;;  %v4545_v37 = vmul.f32 %v4980_v41, %v4533_v32  ;;  %vm4551_vm11 = vweird.f32 %v4980_v41 }
0x103d   :  { %vm4552_vm13 = vmor %vm4550_vm12, %vm4551_vm11 }
0x103e   :  { %v4543_v25 = vsel %vm4542_vm10, %v4978_v57, %v4539_v1  ;;  %v4546_v6 = vmul.f32 %v4980_v41, %v4545_v37 }
0x103f   :  { %v4554_v9 = vmul.f32 %v4543_v25, %v4520_v3 }
0x1040   :  { %v4547_v52 = vmul.f32 0.5, %v4546_v6 }
0x1041   :  { %v4559_v56 = vmul.f32 %v4759_v16, %v4554_v9 }
0x1042   :  { %v4548_v54 = vsub.f32 1.5, %v4547_v52 }
0x1043   :  { %v4564_v45 = vadd.f32 %v4760_v47, %v4559_v56 }
0x1044   :  { %v4549_v46 = vmul.f32 %v4980_v41, %v4548_v54 }
0x1045   :  { %v4570_v26 = vmul.f32 %v4761_v61, %v4564_v45 }
0x1046   :  { %v4553_v28 = vsel %vm4552_vm13, %v4980_v41, %v4549_v46 }
0x1047   :  { %v4572_v42 = vsel %vm145_vm2, %v4570_v26, 0.0  ;;  %v4555_v39 = vmul.f32 %v4553_v28, %v4521_v44 }
0x1048   :  { %4573 = vadd.xlane.f32.xlu0 %v4572_v42 }
0x1049   :  { %v4560_v35 = vmul.f32 %v4759_v16, %v4555_v39 }
0x104b   :  { %v4565_v18 = vadd.f32 %v4760_v47, %v4560_v35 }
0x104d   :  { %v4571_v29 = vmul.f32 %v4761_v61, %v4565_v18 }
0x104f   :  { %v4575_v49 = vsel %vm145_vm2, %v4571_v29, 0.0 }
0x1050   :  { %4576 = vadd.xlane.f32.xlu1 %v4575_v49 }
0x10bb   :  { %v4574_v21 = vpop.xlane.xlu0 %4573 }
0x10bc   :  { %v4585_v27 = vadd.f32 %v4583_v62, %v4574_v21 }
0x10be   :  { %v4589_v40 = vperm.slane %v4585_v27, %v6611_v23 }
0x10c3   :  { %v4577_v14 = vpop.xlane.xlu1 %4576 }
0x10c4   :  { %v4586_v17 = vadd.f32 %v4583_v62, %v4577_v14 }
0x10c6   :  { %v4590_v8 = vperm.slane %v4586_v17, %v6611_v23 }
0x10c8   :  { %v4591_v4 = vsel %vm780_vm3, %v4590_v8, %v4589_v40 }
0x10c9   :  { %4594 = vst.msk [vmem:[#allocation12] sm:$0x3] %vm4593_vm14, %v4591_v4 }
0x10ca   :  { %4605 = dma.vmem_to_hbm [thread:$0]  %s4601_s13, 32, %s4603_s20, [#allocation5]  }
0x10cb   :  { %5133 = dma.done.wait [#allocation5], 32  }
0x10cc   :  { %5134 = vsyncadd [#allocation5], 4294967264 }
0x10cd   :  { %4610 = vsyncpa [#allocation4], 1 }
0x10ce   :  { %4611 = vsyncpa [#allocation7], 1 }
0x10cf   :  { %4612 = vsyncpa [#allocation10], 1 }
0x10d0   :  { %4613 = vsyncpa [#allocation5], 1 }

</bundles_post_ra>
